<compile_context>
chip_gen: v7x
topology: tpu7x:2x2x1
jax: 0.10.0
libtpu: 0.0.40
codegen_flags: <defaults>
</compile_context>

<pallas_src>
import functools

import jax
import jax.numpy as jnp
from jax import lax
from jax.experimental import pallas as pl
from jax.experimental.pallas import tpu as pltpu

LANE = 128
F32 = jnp.float32
BF16 = jnp.bfloat16


def _ru(x, m):
    return ((x + m - 1) // m) * m


def _m_pad(m):
    # canonical row padding shared by every kernel so activations hand off
    # between pallas_calls without re-padding.
    return _ru(m, 8) if m <= 256 else _ru(m, 256)


def _gemm_m_tile(mp):
    # 256-row tiles feed the v6e/v7x 256-wide MXU at full height; small
    # problems use the whole (padded) M as a single block.
    return mp if mp <= 256 else 256


def _stream_tile(mp):
    # streaming kernels (BN apply / VQ) are pure HBM streams: use the largest
    # row tile dividing padded M to amortize the ~0.35us per-grid-step cost.
    for t in (1024, 512, 256):
        if mp % t == 0:
            return t
    return mp


def _pick_tile(padded, cands):
    for t in cands:
        if padded % t == 0:
            return t
    return padded


def _cparams(dims, block_bytes):
    # VMEM ask scaled from actual block footprints (tiny here) instead of a
    # blanket large limit -- matters on v7x's 64 MiB VMEM.
    limit = int(min(max(4 * block_bytes, 16 * 1024 * 1024), 48 * 1024 * 1024))
    return pltpu.CompilerParams(dimension_semantics=dims,
                                vmem_limit_bytes=limit)


# ----------------------------------------------------------------------------
# Activation container: (Mp, Cp) lane-dense zero-padded bf16 view of NHWC
# ----------------------------------------------------------------------------
class Act:
    def __init__(self, data, nhwc):
        self.data = data     # (Mp, Cp) bf16; padded rows/lanes are zero
        self.nhwc = nhwc     # logical (N, H, W, C)


def from_act(a):
    N, H, W, C = a.nhwc
    return a.data[:N * H * W, :C].reshape(N, H, W, C)


# ----------------------------------------------------------------------------
# Tiled GEMM: bf16 MXU, f32 accumulator, fused bias / input-relu / relu / tanh,
# padded-row zeroing, optional fused BN column sum/sumsq accumulator outputs.
# Grid order (nn, nm, nk): the stats block (0, j) stays VMEM-resident across
# the whole (i, k) sweep for a given j.
# ----------------------------------------------------------------------------
def _gemm_kernel(a_ref, b_ref, bias_ref, *rest, nk, tm, m_rows,
                 activation, input_relu, emit_stats):
    if emit_stats:
        o_ref, sum_ref, sq_ref, acc_ref = rest
    else:
        o_ref, acc_ref = rest
    i = pl.program_id(1)
    k = pl.program_id(2)

    @pl.when(k == 0)
    def _():
        acc_ref[...] = jnp.zeros_like(acc_ref)

    if emit_stats:
        @pl.when((i == 0) & (k == 0))
        def _():
            sum_ref[...] = jnp.zeros_like(sum_ref)
            sq_ref[...] = jnp.zeros_like(sq_ref)

    a = a_ref[...]
    if input_relu:
        a = jnp.maximum(a, 0)                     # relu commutes with im2col
    acc_ref[...] += jnp.dot(a, b_ref[...], preferred_element_type=jnp.float32)

    @pl.when(k == nk - 1)
    def _():
        y = acc_ref[...] + bias_ref[...]
        if activation == "relu":
            y = jnp.maximum(y, 0.0)
        elif activation == "tanh":
            y = jnp.tanh(y)
        if m_rows is not None:                    # zero padded rows
            row = i * tm + lax.broadcasted_iota(jnp.int32, y.shape, 0)
            y = jnp.where(row < m_rows, y, 0.0)
        o_ref[...] = y.astype(o_ref.dtype)
        if emit_stats:                            # free filler under the MXU
            sum_ref[...] += jnp.sum(y, axis=0, keepdims=True)
            sq_ref[...] += jnp.sum(y * y, axis=0, keepdims=True)


def matmul_bias(a_p, w_p, b_p, m_true, *, activation=None, input_relu=False,
                emit_stats=False):
    """(Mp,Kp)bf16 @ (Kp,Np)bf16 + bias -> (Mp,Np)bf16 [, colsum, colsumsq]."""
    Mp, Kp = a_p.shape
    assert w_p.shape[0] == Kp
    Np = w_p.shape[1]
    tm = _gemm_m_tile(Mp)
    tk = _pick_tile(Kp, (512, 256, 128))
    tn = _pick_tile(Np, (256, 128))
    nm, nn, nk = Mp // tm, Np // tn, Kp // tk
    m_rows = m_true if m_true < Mp else None

    out_shape = [jax.ShapeDtypeStruct((Mp, Np), BF16)]
    out_specs = [pl.BlockSpec((tm, tn), lambda j, i, k: (i, j))]
    if emit_stats:
        out_shape += [jax.ShapeDtypeStruct((1, Np), F32)] * 2
        out_specs += [pl.BlockSpec((1, tn), lambda j, i, k: (0, j))] * 2

    dims = (("parallel", "arbitrary", "arbitrary") if emit_stats
            else ("parallel", "parallel", "arbitrary"))
    blk = (2 * tm * tk * 2 + 2 * tk * tn * 2 + 2 * tm * tn * 2
           + tm * tn * 4 + 8 * tn * 4)
    cost = pl.CostEstimate(
        flops=2 * Mp * Np * Kp,
        transcendentals=Mp * Np if activation == "tanh" else 0,
        bytes_accessed=(2 * Mp * Kp * nn + 2 * Kp * Np * nm + 2 * Mp * Np
                        + 4 * Np * (3 if emit_stats else 1)))
    return pl.pallas_call(
        functools.partial(_gemm_kernel, nk=nk, tm=tm, m_rows=m_rows,
                          activation=activation, input_relu=input_relu,
                          emit_stats=emit_stats),
        out_shape=tuple(out_shape) if emit_stats else out_shape[0],
        grid_spec=pltpu.PrefetchScalarGridSpec(
            num_scalar_prefetch=0,
            grid=(nn, nm, nk),
            in_specs=[pl.BlockSpec((tm, tk), lambda j, i, k: (i, k)),
                      pl.BlockSpec((tk, tn), lambda j, i, k: (k, j)),
                      pl.BlockSpec((1, tn), lambda j, i, k: (0, j))],
            out_specs=tuple(out_specs) if emit_stats else out_specs[0],
            scratch_shapes=[pltpu.VMEM((tm, tn), F32)]),
        compiler_params=_cparams(dims, blk),
        cost_estimate=cost,
    )(a_p, w_p, b_p)


# ----------------------------------------------------------------------------
# BatchNorm apply (train-mode stats come fused from the producing GEMM):
# normalize + ReLU + residual-add + trailing ReLU in one streaming pass.
# ----------------------------------------------------------------------------
def _bn_apply_kernel(*refs, inv_m, eps, relu, has_res, post_relu, m_rows, ts):
    if has_res:
        x_ref, sum_ref, sq_ref, g_ref, b_ref, res_ref, o_ref = refs
    else:
        x_ref, sum_ref, sq_ref, g_ref, b_ref, o_ref = refs
        res_ref = None
    mean = sum_ref[...] * inv_m
    var = sq_ref[...] * inv_m - mean * mean        # biased, torch train mode
    scale = lax.rsqrt(var + eps) * g_ref[...]
    shift = b_ref[...] - mean * scale
    y = x_ref[...].astype(F32) * scale + shift
    if relu:
        y = jnp.maximum(y, 0.0)
    if res_ref is not None:
        y = y + res_ref[...].astype(F32)
    if post_relu:
        y = jnp.maximum(y, 0.0)
    if m_rows is not None:                         # keep padded rows zero
        row = pl.program_id(0) * ts + lax.broadcasted_iota(jnp.int32, y.shape, 0)
        y = jnp.where(row < m_rows, y, 0.0)
    o_ref[...] = y.astype(o_ref.dtype)


def batchnorm_apply(a, sums, sqs, bn, *, relu=False, residual=None,
                    post_relu=False, eps=1e-5):
    N, H, W, C = a.nhwc
    M = N * H * W
    Mp, Cp = a.data.shape
    assert sums.shape[1] == Cp and bn["g"].shape[1] == Cp
    ts = _stream_tile(Mp)
    nm = Mp // ts
    row_spec = pl.BlockSpec((ts, Cp), lambda i: (i, 0))
    vec_spec = pl.BlockSpec((1, Cp), lambda i: (0, 0))
    inputs = [a.data, sums, sqs, bn["g"], bn["b"]]
    in_specs = [row_spec, vec_spec, vec_spec, vec_spec, vec_spec]
    if residual is not None:
        assert residual.data.shape == a.data.shape
        inputs.append(residual.data)
        in_specs.append(row_spec)
    blk = 2 * ts * Cp * 2 * (3 if residual is not None else 2) + 5 * Cp * 4
    out = pl.pallas_call(
        functools.partial(_bn_apply_kernel, inv_m=1.0 / M, eps=eps, relu=relu,
                          has_res=residual is not None, post_relu=post_relu,
                          m_rows=M if M < Mp else None, ts=ts),
        out_shape=jax.ShapeDtypeStruct((Mp, Cp), BF16),
        grid_spec=pltpu.PrefetchScalarGridSpec(
            num_scalar_prefetch=0, grid=(nm,),
            in_specs=in_specs,
            out_specs=row_spec),
        compiler_params=_cparams(("parallel",), blk),
    )(*inputs)
    return Act(out, a.nhwc)


# ----------------------------------------------------------------------------
# Fused vector quantization: bf16 distance GEMM -> first-argmin -> one-hot
# gather -> commitment-loss accumulation (distances never hit HBM).
# ----------------------------------------------------------------------------
def _vq_kernel(z_ref, et_ref, e2_ref, emb_ref, zq_ref, loss_ref, acc_ref,
               *, m_true, scale, nm, n_e, ts):
    i = pl.program_id(0)

    @pl.when(i == 0)
    def _():
        acc_ref[...] = jnp.zeros_like(acc_ref)

    z = z_ref[...]                                            # bf16 (ts, Cp)
    zf = z.astype(F32)
    z2 = jnp.sum(zf * zf, axis=1, keepdims=True)
    d = z2 + e2_ref[...] - 2.0 * jnp.dot(z, et_ref[...],
                                         preferred_element_type=jnp.float32)
    lane = lax.broadcasted_iota(jnp.int32, d.shape, 1)
    mins = jnp.min(d, axis=1, keepdims=True)
    idx = jnp.min(jnp.where(d == mins, lane, n_e), axis=1, keepdims=True)
    onehot = (lane == idx).astype(BF16)                       # exact in bf16
    zq = jnp.dot(onehot, emb_ref[...], preferred_element_type=jnp.float32)

    row = i * ts + lax.broadcasted_iota(jnp.int32, (ts, 1), 0)
    zq = jnp.where(row < m_true, zq, 0.0)                     # keep pad rows 0
    zq_ref[...] = zq.astype(zq_ref.dtype)

    diff = jnp.where(row < m_true, zq - zf, 0.0)
    acc_ref[...] += jnp.sum(diff * diff, axis=0, keepdims=True)

    @pl.when(i == nm - 1)
    def _():
        tot = jnp.sum(acc_ref[...], axis=1, keepdims=True)    # (1, 1)
        loss_ref[...] = jnp.broadcast_to(tot * scale, loss_ref.shape)


def vector_quantize(a, vq, beta, dim_e):
    # TODO(synk): reference VectorQuantizer.forward references undefined z_q /
    # dists; standard VQ-VAE quantization (nearest embedding + commitment
    # loss) implemented instead. Forward-only (no straight-through estimator).
    N, H, W, C = a.nhwc
    M = N * H * W
    Mp, Cp = a.data.shape
    et, e2, emb_p = vq["et"], vq["e2"], vq["emb"]
    nep = e2.shape[1]
    ts = _stream_tile(Mp)
    nm = Mp // ts
    blk = (2 * ts * Cp * 2 * 2 + Cp * nep * 2 + nep * 4 + nep * Cp * 2
           + Cp * 4 + LANE * 4)
    cost = pl.CostEstimate(
        flops=4 * Mp * Cp * nep, transcendentals=0,
        bytes_accessed=2 * 2 * Mp * Cp + nm * (2 * Cp * nep + 4 * nep
                                               + 2 * nep * Cp) + 4 * LANE)
    zq, loss = pl.pallas_call(
        functools.partial(_vq_kernel, m_true=M,
                          scale=(1.0 + beta) / float(M * dim_e),
                          nm=nm, n_e=nep, ts=ts),
        out_shape=(jax.ShapeDtypeStruct((Mp, Cp), BF16),
                   jax.ShapeDtypeStruct((1, LANE), F32)),
        grid_spec=pltpu.PrefetchScalarGridSpec(
            num_scalar_prefetch=0, grid=(nm,),
            in_specs=[pl.BlockSpec((ts, Cp), lambda i: (i, 0)),
                      pl.BlockSpec((Cp, nep), lambda i: (0, 0)),
                      pl.BlockSpec((1, nep), lambda i: (0, 0)),
                      pl.BlockSpec((nep, Cp), lambda i: (0, 0))],
            out_specs=(pl.BlockSpec((ts, Cp), lambda i: (i, 0)),
                       pl.BlockSpec((1, LANE), lambda i: (0, 0))),
            scratch_shapes=[pltpu.VMEM((1, Cp), F32)]),
        compiler_params=_cparams(("arbitrary",), blk),
        cost_estimate=cost,
    )(a.data, et, e2, emb_p)
    return Act(zq, a.nhwc), loss[0, 0]


# ----------------------------------------------------------------------------
# Convolutions: im2col glue feeding the Pallas GEMM; 1x1 convs bypass im2col.
# ----------------------------------------------------------------------------
def im2col(x_nhwc, kh, kw, stride, pad):
    N, H, W, C = x_nhwc.shape
    xp = jnp.pad(x_nhwc, ((0, 0), (pad, pad), (pad, pad), (0, 0)))
    Hp, Wp = H + 2 * pad, W + 2 * pad
    Ho = (Hp - kh) // stride + 1
    Wo = (Wp - kw) // stride + 1
    cols = []
    for i in range(kh):
        for j in range(kw):
            cols.append(xp[:, i:i + stride * Ho:stride,
                           j:j + stride * Wo:stride, :])
    patches = jnp.concatenate(cols, axis=-1)
    return patches.reshape(N * Ho * Wo, kh * kw * C), (N, Ho, Wo)


def _conv_im2col(x_nhwc, layer, *, cout, kh, kw, stride, pad, activation=None,
                 input_relu=False, emit_stats=False):
    # TODO(synk): fusing the kh*kw window reads into the GEMM (shifted A
    # index_maps) would avoid materializing the expanded patch matrix in HBM.
    patches, (N, Ho, Wo) = im2col(x_nhwc, kh, kw, stride, pad)
    M, K = patches.shape
    Kp = layer["w"].shape[0]
    assert K <= Kp
    Mp = _m_pad(M)
    a_p = jnp.zeros((Mp, Kp), BF16).at[:M, :K].set(patches.astype(BF16))
    res = matmul_bias(a_p, layer["w"], layer["b"], M, activation=activation,
                      input_relu=input_relu, emit_stats=emit_stats)
    nhwc = (N, Ho, Wo, cout)
    if emit_stats:
        return Act(res[0], nhwc), res[1], res[2]
    return Act(res, nhwc)


def conv2d(a, layer, *, cout, kh=1, kw=None, stride=1, pad=0, activation=None,
           input_relu=False, emit_stats=False):
    kw = kh if kw is None else kw
    N, H, W, Cin = a.nhwc
    if kh == 1 and kw == 1 and stride == 1 and pad == 0:
        # 1x1 bypass: Act.data is already the lane-dense GEMM operand (zero
        # padded lanes x zero weight rows), no im2col HBM round trip.
        assert a.data.shape[1] == layer["w"].shape[0]
        res = matmul_bias(a.data, layer["w"], layer["b"], N * H * W,
                          activation=activation, input_relu=input_relu,
                          emit_stats=emit_stats)
        nhwc = (N, H, W, cout)
        if emit_stats:
            return Act(res[0], nhwc), res[1], res[2]
        return Act(res, nhwc)
    return _conv_im2col(from_act(a), layer, cout=cout, kh=kh, kw=kw,
                        stride=stride, pad=pad, activation=activation,
                        input_relu=input_relu, emit_stats=emit_stats)


def conv_transpose2d(a, layer, *, cout, kh, stride, pad, activation=None,
                     emit_stats=False):
    # TODO(synk): a subpixel (stride^2 sub-conv) decomposition would avoid the
    # zero-stuffed GEMM work for stride>1; zero-insertion form kept.
    x = from_act(a)
    N, H, W, C = x.shape
    if stride > 1:
        Hd, Wd = (H - 1) * stride + 1, (W - 1) * stride + 1
        x = jnp.zeros((N, Hd, Wd, C), x.dtype).at[:, ::stride, ::stride, :].set(x)
    return _conv_im2col(x, layer, cout=cout, kh=kh, kw=kh, stride=1,
                        pad=kh - 1 - pad, activation=activation,
                        emit_stats=emit_stats)


# ----------------------------------------------------------------------------
# Model pieces
# ----------------------------------------------------------------------------
def residual_block(a, p, in_dim, final_relu=False):
    # res_block = ReLU -> Conv3x3 -> BN -> ReLU -> Conv1x1 -> BN; out = x + res
    # Leading ReLU fused into the conv3x3 GEMM input; BN stats fused into the
    # producing GEMMs; residual add + optional trailing ReLU fused into BN2.
    h, s1, s2 = conv2d(a, p["c1"], cout=in_dim, kh=3, stride=1, pad=1,
                       input_relu=True, emit_stats=True)
    h = batchnorm_apply(h, s1, s2, p["bn1"], relu=True)
    h, s1, s2 = conv2d(h, p["c2"], cout=in_dim, emit_stats=True)   # 1x1 bypass
    return batchnorm_apply(h, s1, s2, p["bn2"], residual=a,
                           post_relu=final_relu)


def residual_stack(a, p, in_dim, n_res_layers):
    # Reference builds [ResidualBlock(in_dim)] * n -> same module instance
    # repeated, i.e. shared weights; trailing F.relu fused into the last
    # block's final BN-apply.
    for li in range(n_res_layers):
        a = residual_block(a, p, in_dim, final_relu=(li == n_res_layers - 1))
    return a


def vqvae_forward(pk, x_nchw, *, in_dim=4, dim=2, n_res_layers=2, beta=0.25):
    half = in_dim // 2
    x = jnp.transpose(x_nchw, (0, 2, 3, 1)).astype(BF16)   # NCHW -> NHWC bf16

    # ---------------- encoder ----------------
    h, s1, s2 = _conv_im2col(x, pk["enc1"], cout=half, kh=4, kw=4, stride=2,
                             pad=1, emit_stats=True)
    # TODO(synk): reference declares BatchNorm2d(in_dim) here but the conv
    # outputs in_dim//2 channels (would raise in PyTorch); BN over actual C.
    h = batchnorm_apply(h, s1, s2, pk["enc_bn"], relu=True)
    h = conv2d(h, pk["enc2"], cout=in_dim, kh=4, stride=2, pad=1,
               activation="relu")
    h = conv2d(h, pk["enc3"], cout=in_dim, kh=3, stride=1, pad=1)
    encoded = residual_stack(h, pk["enc_res"], in_dim, n_res_layers)

    # ---------------- quantization ----------------
    quant_input = conv2d(encoded, pk["pre"], cout=dim)          # 1x1 bypass
    latents, quantize_loss = vector_quantize(quant_input, pk["vq"], beta, dim)
    decoder_input = conv2d(latents, pk["post"], cout=in_dim)    # 1x1 bypass

    # ---------------- decoder ----------------
    h = conv_transpose2d(decoder_input, pk["dec1"], cout=in_dim, kh=3,
                         stride=1, pad=1)
    h = residual_stack(h, pk["dec_res"], in_dim, n_res_layers)
    h, s1, s2 = conv_transpose2d(h, pk["dec2"], cout=half, kh=4, stride=2,
                                 pad=1, emit_stats=True)
    # TODO(synk): same BatchNorm2d(in_dim) vs in_dim//2 channel mismatch.
    h = batchnorm_apply(h, s1, s2, pk["dec_bn"], relu=True)
    decoded = conv_transpose2d(h, pk["dec3"], cout=3, kh=4, stride=2, pad=1,
                               activation="tanh")

    return (jnp.transpose(from_act(encoded), (0, 3, 1, 2)).astype(F32),
            jnp.transpose(from_act(decoded), (0, 3, 1, 2)).astype(F32),
            jnp.transpose(from_act(latents), (0, 3, 1, 2)).astype(F32),
            quantize_loss)


# ----------------------------------------------------------------------------
# One-time weight packing (done eagerly, outside jit): padded bf16 GEMM weight
# matrices, f32 bias rows, BN gamma/beta rows, VQ lookup tables.
# ----------------------------------------------------------------------------
def pack_conv(w, b):  # torch Conv2d weight (Cout, Cin, kh, kw)
    Cout, Cin, kh, kw = w.shape
    K = kh * kw * Cin
    Kp, Np = _ru(K, LANE), _ru(Cout, LANE)
    wm = jnp.transpose(w, (2, 3, 1, 0)).reshape(K, Cout).astype(BF16)
    return {"w": jnp.zeros((Kp, Np), BF16).at[:K, :Cout].set(wm),
            "b": jnp.zeros((1, Np), F32).at[0, :Cout].set(b.astype(F32))}


def pack_conv_t(w, b):  # torch ConvTranspose2d weight (Cin, Cout, kh, kw)
    w_eq = jnp.transpose(jnp.flip(w, (2, 3)), (1, 0, 2, 3))
    return pack_conv(w_eq, b)


def pack_bn(g, be):
    C = g.shape[0]
    Cp = _ru(C, LANE)
    return {"g": jnp.zeros((1, Cp), F32).at[0, :C].set(g.astype(F32)),
            "b": jnp.zeros((1, Cp), F32).at[0, :C].set(be.astype(F32))}


def pack_vq(emb):
    n_e, de = emb.shape
    cp, nep = _ru(de, LANE), _ru(n_e, LANE)
    emb_b = emb.astype(BF16)
    e2 = jnp.sum(emb_b.astype(F32) ** 2, axis=1)
    return {"et": jnp.zeros((cp, nep), BF16).at[:de, :n_e].set(emb_b.T),
            "e2": jnp.full((1, nep), 1e30, F32).at[0, :n_e].set(e2),
            "emb": jnp.zeros((nep, cp), BF16).at[:n_e, :de].set(emb_b)}


def pack_params(p):
    def res(rp):
        return dict(c1=pack_conv(rp["w1"], rp["b1"]),
                    bn1=pack_bn(rp["g1"], rp["be1"]),
                    c2=pack_conv(rp["w2"], rp["b2"]),
                    bn2=pack_bn(rp["g2"], rp["be2"]))
    return dict(
        enc1=pack_conv(p["enc_w1"], p["enc_b1"]),
        enc_bn=pack_bn(p["enc_bn_g"], p["enc_bn_b"]),
        enc2=pack_conv(p["enc_w2"], p["enc_b2"]),
        enc3=pack_conv(p["enc_w3"], p["enc_b3"]),
        enc_res=res(p["enc_res"]),
        pre=pack_conv(p["pre_w"], p["pre_b"]),
        vq=pack_vq(p["emb"]),
        post=pack_conv(p["post_w"], p["post_b"]),
        dec1=pack_conv_t(p["dec_wt1"], p["dec_bt1"]),
        dec_res=res(p["dec_res"]),
        dec2=pack_conv_t(p["dec_wt2"], p["dec_bt2"]),
        dec_bn=pack_bn(p["dec_bn_g"], p["dec_bn_b"]),
        dec3=pack_conv_t(p["dec_wt3"], p["dec_bt3"]),
    )


# ----------------------------------------------------------------------------
# Deterministic parameter init (shapes implied by the module; in_dim=4, dim=2)
# ----------------------------------------------------------------------------
def init_params(key, in_dim=4, dim=2, num_embeddings=512):
    keys = iter(jax.random.split(key, 32))
    half = in_dim // 2

    def w(shape, scale=0.1):
        return scale * jax.random.normal(next(keys), shape, jnp.float32)

    def zeros(shape):
        return jnp.zeros(shape, jnp.float32)

    def ones(shape):
        return jnp.ones(shape, jnp.float32)

    def res_block():
        return dict(w1=w((in_dim, in_dim, 3, 3)), b1=zeros((in_dim,)),
                    g1=ones((in_dim,)), be1=zeros((in_dim,)),
                    w2=w((in_dim, in_dim, 1, 1)), b2=zeros((in_dim,)),
                    g2=ones((in_dim,)), be2=zeros((in_dim,)))

    return dict(
        enc_w1=w((half, in_dim, 4, 4)), enc_b1=zeros((half,)),
        enc_bn_g=ones((half,)), enc_bn_b=zeros((half,)),
        enc_w2=w((in_dim, half, 4, 4)), enc_b2=zeros((in_dim,)),
        enc_w3=w((in_dim, in_dim, 3, 3)), enc_b3=zeros((in_dim,)),
        enc_res=res_block(),
        pre_w=w((dim, in_dim, 1, 1)), pre_b=zeros((dim,)),
        emb=jax.random.uniform(next(keys), (num_embeddings, dim), jnp.float32,
                               -1.0 / num_embeddings, 1.0 / num_embeddings),
        post_w=w((in_dim, dim, 1, 1)), post_b=zeros((in_dim,)),
        dec_wt1=w((in_dim, in_dim, 3, 3)), dec_bt1=zeros((in_dim,)),
        dec_res=res_block(),
        dec_wt2=w((in_dim, half, 4, 4)), dec_bt2=zeros((half,)),
        dec_bn_g=ones((half,)), dec_bn_b=zeros((half,)),
        dec_wt3=w((half, 3, 4, 4)), dec_bt3=zeros((3,)),
    )


if __name__ == "__main__":
    key = jax.random.PRNGKey(0)
    pkey, xkey = jax.random.split(key)
    raw = init_params(pkey, in_dim=4, dim=2, num_embeddings=512)
    packed = pack_params(raw)                       # pack weights once, eagerly
    x = jax.random.normal(xkey, (2, 4, 16, 16), jnp.float32)  # NCHW like torch

    fwd = jax.jit(functools.partial(vqvae_forward, in_dim=4, dim=2,
                                    n_res_layers=2, beta=0.25))
    encoded, decoded, latents, loss = fwd(packed, x)
    jax.block_until_ready((encoded, decoded, latents, loss))

    assert encoded.shape == (2, 4, 4, 4)
    assert decoded.shape == (2, 3, 16, 16)
    assert latents.shape == (2, 2, 4, 4)
    assert loss.shape == ()
    print("KERNEL_OK")
</pallas_src>

<mosaic_0001>
module attributes {stable_mosaic.version = 11 : i64} {
  func.func @_gemm_kernel(%arg0: i32, %arg1: i32, %arg2: i32, %arg3: memref<128x128xbf16, #tpu.memory_space<vmem>>, %arg4: memref<128x128xbf16, #tpu.memory_space<vmem>>, %arg5: memref<1x128xf32, #tpu.memory_space<vmem>>, %arg6: memref<128x128xbf16, #tpu.memory_space<vmem>>, %arg7: memref<1x128xf32, #tpu.memory_space<vmem>>, %arg8: memref<1x128xf32, #tpu.memory_space<vmem>>, %arg9: memref<128x128xf32, #tpu.memory_space<vmem>>) attributes {dimension_semantics = [#tpu.dimension_semantics<parallel>, #tpu.dimension_semantics<arbitrary>, #tpu.dimension_semantics<arbitrary>], iteration_bounds = array<i64: 1, 1, 1>, scalar_prefetch = 0 : i64, scratch_operands = 1 : i64, tpu.core_type = #tpu.core_type<tc>, window_params = [{transform_indices = @transform_0, window_bounds = array<i64: 128, 128>}, {transform_indices = @transform_1, window_bounds = array<i64: 128, 128>}, {transform_indices = @transform_2, window_bounds = array<i64: 1, 128>}, {transform_indices = @transform_3, window_bounds = array<i64: 128, 128>}, {transform_indices = @transform_4, window_bounds = array<i64: 1, 128>}, {transform_indices = @transform_5, window_bounds = array<i64: 1, 128>}]} {
    %c0_i32 = arith.constant 0 : i32
    %0 = arith.cmpi eq, %arg2, %c0_i32 : i32
    %1 = arith.extui %0 : i1 to i32
    %c0_i32_0 = arith.constant 0 : i32
    %2 = arith.cmpi ne, %1, %c0_i32_0 : i32
    scf.if %2 {
      %cst_13 = arith.constant 0.000000e+00 : f32
      %17 = vector.broadcast %cst_13 : f32 to vector<128x128xf32>
      %c0_14 = arith.constant 0 : index
      %c0_15 = arith.constant 0 : index
      %18 = vector.load %arg9[%c0_14, %c0_15] : memref<128x128xf32, #tpu.memory_space<vmem>>, vector<128x128xf32>
      tpu.vector_store %arg9[%c0_14, %c0_15], %17 {strides = array<i32>} : memref<128x128xf32, #tpu.memory_space<vmem>>, vector<128x128xf32>,
    } else {
    }
    %c0_i32_1 = arith.constant 0 : i32
    %3 = arith.cmpi eq, %arg1, %c0_i32_1 : i32
    %c0_i32_2 = arith.constant 0 : i32
    %4 = arith.cmpi eq, %arg2, %c0_i32_2 : i32
    %5 = arith.andi %3, %4 : i1
    %6 = arith.extui %5 : i1 to i32
    %c0_i32_3 = arith.constant 0 : i32
    %7 = arith.cmpi ne, %6, %c0_i32_3 : i32
    scf.if %7 {
      %cst_13 = arith.constant 0.000000e+00 : f32
      %17 = vector.broadcast %cst_13 : f32 to vector<1x128xf32>
      %c0_14 = arith.constant 0 : index
      %c0_15 = arith.constant 0 : index
      %18 = vector.load %arg7[%c0_14, %c0_15] : memref<1x128xf32, #tpu.memory_space<vmem>>, vector<1x128xf32>
      tpu.vector_store %arg7[%c0_14, %c0_15], %17 {strides = array<i32>} : memref<1x128xf32, #tpu.memory_space<vmem>>, vector<1x128xf32>,
      %cst_16 = arith.constant 0.000000e+00 : f32
      %19 = vector.broadcast %cst_16 : f32 to vector<1x128xf32>
      %c0_17 = arith.constant 0 : index
      %c0_18 = arith.constant 0 : index
      %20 = vector.load %arg8[%c0_17, %c0_18] : memref<1x128xf32, #tpu.memory_space<vmem>>, vector<1x128xf32>
      tpu.vector_store %arg8[%c0_17, %c0_18], %19 {strides = array<i32>} : memref<1x128xf32, #tpu.memory_space<vmem>>, vector<1x128xf32>,
    } else {
    }
    %c0 = arith.constant 0 : index
    %c0_4 = arith.constant 0 : index
    %8 = vector.load %arg3[%c0, %c0_4] : memref<128x128xbf16, #tpu.memory_space<vmem>>, vector<128x128xbf16>
    %c0_5 = arith.constant 0 : index
    %c0_6 = arith.constant 0 : index
    %9 = vector.load %arg9[%c0_5, %c0_6] : memref<128x128xf32, #tpu.memory_space<vmem>>, vector<128x128xf32>
    %c0_7 = arith.constant 0 : index
    %c0_8 = arith.constant 0 : index
    %10 = vector.load %arg4[%c0_7, %c0_8] : memref<128x128xbf16, #tpu.memory_space<vmem>>, vector<128x128xbf16>
    %cst = arith.constant dense<0.000000e+00> : vector<128x128xf32>
    %11 = tpu.matmul %8, %10, %cst {dimension_numbers = #tpu.dot_dimension_numbers<[1], [0], [0], [1], [0, 0, 1, 1], [], []>} : vector<128x128xbf16>, vector<128x128xbf16>, vector<128x128xf32> -> vector<128x128xf32>
    %12 = arith.addf %9, %11 : vector<128x128xf32>
    %c0_9 = arith.constant 0 : index
    %c0_10 = arith.constant 0 : index
    %13 = vector.load %arg9[%c0_9, %c0_10] : memref<128x128xf32, #tpu.memory_space<vmem>>, vector<128x128xf32>
    tpu.vector_store %arg9[%c0_9, %c0_10], %12 {strides = array<i32>} : memref<128x128xf32, #tpu.memory_space<vmem>>, vector<128x128xf32>,
    %c0_i32_11 = arith.constant 0 : i32
    %14 = arith.cmpi eq, %arg2, %c0_i32_11 : i32
    %15 = arith.extui %14 : i1 to i32
    %c0_i32_12 = arith.constant 0 : i32
    %16 = arith.cmpi ne, %15, %c0_i32_12 : i32
    scf.if %16 {
      %c0_13 = arith.constant 0 : index
      %c0_14 = arith.constant 0 : index
      %17 = vector.load %arg9[%c0_13, %c0_14] : memref<128x128xf32, #tpu.memory_space<vmem>>, vector<128x128xf32>
      %c0_15 = arith.constant 0 : index
      %c0_16 = arith.constant 0 : index
      %18 = vector.load %arg5[%c0_15, %c0_16] : memref<1x128xf32, #tpu.memory_space<vmem>>, vector<1x128xf32>
      %19 = vector.broadcast %18 : vector<1x128xf32> to vector<128x128xf32>
      %20 = arith.addf %17, %19 : vector<128x128xf32>
      %21 = arith.truncf %20 : vector<128x128xf32> to vector<128x128xbf16>
      %c0_17 = arith.constant 0 : index
      %c0_18 = arith.constant 0 : index
      %22 = vector.load %arg6[%c0_17, %c0_18] : memref<128x128xbf16, #tpu.memory_space<vmem>>, vector<128x128xbf16>
      tpu.vector_store %arg6[%c0_17, %c0_18], %21 {strides = array<i32>} : memref<128x128xbf16, #tpu.memory_space<vmem>>, vector<128x128xbf16>,
      %c0_19 = arith.constant 0 : index
      %c0_20 = arith.constant 0 : index
      %23 = vector.load %arg7[%c0_19, %c0_20] : memref<1x128xf32, #tpu.memory_space<vmem>>, vector<1x128xf32>
      %cst_21 = arith.constant dense<0.000000e+00> : vector<128xf32>
      %24 = vector.multi_reduction <add>, %20, %cst_21 [0] : vector<128x128xf32> to vector<128xf32>
      %25 = vector.shape_cast %24 : vector<128xf32> to vector<1x128xf32>
      %26 = arith.addf %23, %25 : vector<1x128xf32>
      %c0_22 = arith.constant 0 : index
      %c0_23 = arith.constant 0 : index
      %27 = vector.load %arg7[%c0_22, %c0_23] : memref<1x128xf32, #tpu.memory_space<vmem>>, vector<1x128xf32>
      tpu.vector_store %arg7[%c0_22, %c0_23], %26 {strides = array<i32>} : memref<1x128xf32, #tpu.memory_space<vmem>>, vector<1x128xf32>,
      %c0_24 = arith.constant 0 : index
      %c0_25 = arith.constant 0 : index
      %28 = vector.load %arg8[%c0_24, %c0_25] : memref<1x128xf32, #tpu.memory_space<vmem>>, vector<1x128xf32>
      %29 = arith.mulf %20, %20 : vector<128x128xf32>
      %cst_26 = arith.constant dense<0.000000e+00> : vector<128xf32>
      %30 = vector.multi_reduction <add>, %29, %cst_26 [0] : vector<128x128xf32> to vector<128xf32>
      %31 = vector.shape_cast %30 : vector<128xf32> to vector<1x128xf32>
      %32 = arith.addf %28, %31 : vector<1x128xf32>
      %c0_27 = arith.constant 0 : index
      %c0_28 = arith.constant 0 : index
      %33 = vector.load %arg8[%c0_27, %c0_28] : memref<1x128xf32, #tpu.memory_space<vmem>>, vector<1x128xf32>
      tpu.vector_store %arg8[%c0_27, %c0_28], %32 {strides = array<i32>} : memref<1x128xf32, #tpu.memory_space<vmem>>, vector<1x128xf32>,
    } else {
    }
    return
  }
  func.func @transform_0(%arg0: i32, %arg1: i32, %arg2: i32) -> (i32, i32) {
    %c0_i32 = arith.constant 0 : i32
    return %arg1, %arg2 : i32, i32
  }
  func.func @transform_1(%arg0: i32, %arg1: i32, %arg2: i32) -> (i32, i32) {
    %c0_i32 = arith.constant 0 : i32
    return %arg2, %arg0 : i32, i32
  }
  func.func @transform_2(%arg0: i32, %arg1: i32, %arg2: i32) -> (i32, i32) {
    %c0_i32 = arith.constant 0 : i32
    %c0_i32_0 = arith.constant 0 : i32
    return %c0_i32, %arg0 : i32, i32
  }
  func.func @transform_3(%arg0: i32, %arg1: i32, %arg2: i32) -> (i32, i32) {
    %c0_i32 = arith.constant 0 : i32
    return %arg1, %arg0 : i32, i32
  }
  func.func @transform_4(%arg0: i32, %arg1: i32, %arg2: i32) -> (i32, i32) {
    %c0_i32 = arith.constant 0 : i32
    %c0_i32_0 = arith.constant 0 : i32
    return %c0_i32, %arg0 : i32, i32
  }
  func.func @transform_5(%arg0: i32, %arg1: i32, %arg2: i32) -> (i32, i32) {
    %c0_i32 = arith.constant 0 : i32
    %c0_i32_0 = arith.constant 0 : i32
    return %c0_i32, %arg0 : i32, i32
  }
}

module attributes {stable_mosaic.version = 11 : i64} {
  func.func @_bn_apply_kernel(%arg0: i32, %arg1: memref<128x128xbf16, #tpu.memory_space<vmem>>, %arg2: memref<1x128xf32, #tpu.memory_space<vmem>>, %arg3: memref<1x128xf32, #tpu.memory_space<vmem>>, %arg4: memref<1x128xf32, #tpu.memory_space<vmem>>, %arg5: memref<1x128xf32, #tpu.memory_space<vmem>>, %arg6: memref<128x128xbf16, #tpu.memory_space<vmem>>) attributes {dimension_semantics = [#tpu.dimension_semantics<parallel>], iteration_bounds = array<i64: 1>, scalar_prefetch = 0 : i64, scratch_operands = 0 : i64, tpu.core_type = #tpu.core_type<tc>, window_params = [{transform_indices = @transform_0, window_bounds = array<i64: 128, 128>}, {pipeline_mode = #tpu.pipeline_mode<synchronous>, transform_indices = @transform_1, window_bounds = array<i64: 1, 128>}, {pipeline_mode = #tpu.pipeline_mode<synchronous>, transform_indices = @transform_2, window_bounds = array<i64: 1, 128>}, {pipeline_mode = #tpu.pipeline_mode<synchronous>, transform_indices = @transform_3, window_bounds = array<i64: 1, 128>}, {pipeline_mode = #tpu.pipeline_mode<synchronous>, transform_indices = @transform_4, window_bounds = array<i64: 1, 128>}, {transform_indices = @transform_5, window_bounds = array<i64: 128, 128>}]} {
    %c0 = arith.constant 0 : index
    %c0_0 = arith.constant 0 : index
    %0 = vector.load %arg2[%c0, %c0_0] : memref<1x128xf32, #tpu.memory_space<vmem>>, vector<1x128xf32>
    %cst = arith.constant 7.812500e-03 : f32
    %1 = vector.broadcast %cst : f32 to vector<1x128xf32>
    %2 = arith.mulf %0, %1 : vector<1x128xf32>
    %c0_1 = arith.constant 0 : index
    %c0_2 = arith.constant 0 : index
    %3 = vector.load %arg3[%c0_1, %c0_2] : memref<1x128xf32, #tpu.memory_space<vmem>>, vector<1x128xf32>
    %cst_3 = arith.constant 7.812500e-03 : f32
    %4 = vector.broadcast %cst_3 : f32 to vector<1x128xf32>
    %5 = arith.mulf %3, %4 : vector<1x128xf32>
    %6 = arith.mulf %2, %2 : vector<1x128xf32>
    %7 = arith.subf %5, %6 : vector<1x128xf32>
    %cst_4 = arith.constant 9.99999974E-6 : f32
    %8 = vector.broadcast %cst_4 : f32 to vector<1x128xf32>
    %9 = arith.addf %7, %8 : vector<1x128xf32>
    %10 = math.rsqrt %9 : vector<1x128xf32>
    %c0_5 = arith.constant 0 : index
    %c0_6 = arith.constant 0 : index
    %11 = vector.load %arg4[%c0_5, %c0_6] : memref<1x128xf32, #tpu.memory_space<vmem>>, vector<1x128xf32>
    %12 = arith.mulf %10, %11 : vector<1x128xf32>
    %c0_7 = arith.constant 0 : index
    %c0_8 = arith.constant 0 : index
    %13 = vector.load %arg5[%c0_7, %c0_8] : memref<1x128xf32, #tpu.memory_space<vmem>>, vector<1x128xf32>
    %14 = arith.mulf %2, %12 : vector<1x128xf32>
    %15 = arith.subf %13, %14 : vector<1x128xf32>
    %c0_9 = arith.constant 0 : index
    %c0_10 = arith.constant 0 : index
    %16 = vector.load %arg1[%c0_9, %c0_10] : memref<128x128xbf16, #tpu.memory_space<vmem>>, vector<128x128xbf16>
    %17 = arith.extf %16 : vector<128x128xbf16> to vector<128x128xf32>
    %18 = vector.broadcast %12 : vector<1x128xf32> to vector<128x128xf32>
    %19 = arith.mulf %17, %18 : vector<128x128xf32>
    %20 = vector.broadcast %15 : vector<1x128xf32> to vector<128x128xf32>
    %21 = arith.addf %19, %20 : vector<128x128xf32>
    %cst_11 = arith.constant 0.000000e+00 : f32
    %22 = vector.broadcast %cst_11 : f32 to vector<128x128xf32>
    %23 = arith.maximumf %21, %22 : vector<128x128xf32>
    %24 = arith.truncf %23 : vector<128x128xf32> to vector<128x128xbf16>
    %c0_12 = arith.constant 0 : index
    %c0_13 = arith.constant 0 : index
    %25 = vector.load %arg6[%c0_12, %c0_13] : memref<128x128xbf16, #tpu.memory_space<vmem>>, vector<128x128xbf16>
    tpu.vector_store %arg6[%c0_12, %c0_13], %24 {strides = array<i32>} : memref<128x128xbf16, #tpu.memory_space<vmem>>, vector<128x128xbf16>,
    return
  }
  func.func @transform_0(%arg0: i32) -> (i32, i32) {
    %c0_i32 = arith.constant 0 : i32
    %c0_i32_0 = arith.constant 0 : i32
    return %arg0, %c0_i32 : i32, i32
  }
  func.func @transform_1(%arg0: i32) -> (i32, i32) {
    %c0_i32 = arith.constant 0 : i32
    %c0_i32_0 = arith.constant 0 : i32
    %c0_i32_1 = arith.constant 0 : i32
    return %c0_i32, %c0_i32_0 : i32, i32
  }
  func.func @transform_2(%arg0: i32) -> (i32, i32) {
    %c0_i32 = arith.constant 0 : i32
    %c0_i32_0 = arith.constant 0 : i32
    %c0_i32_1 = arith.constant 0 : i32
    return %c0_i32, %c0_i32_0 : i32, i32
  }
  func.func @transform_3(%arg0: i32) -> (i32, i32) {
    %c0_i32 = arith.constant 0 : i32
    %c0_i32_0 = arith.constant 0 : i32
    %c0_i32_1 = arith.constant 0 : i32
    return %c0_i32, %c0_i32_0 : i32, i32
  }
  func.func @transform_4(%arg0: i32) -> (i32, i32) {
    %c0_i32 = arith.constant 0 : i32
    %c0_i32_0 = arith.constant 0 : i32
    %c0_i32_1 = arith.constant 0 : i32
    return %c0_i32, %c0_i32_0 : i32, i32
  }
  func.func @transform_5(%arg0: i32) -> (i32, i32) {
    %c0_i32 = arith.constant 0 : i32
    %c0_i32_0 = arith.constant 0 : i32
    return %arg0, %c0_i32 : i32, i32
  }
}

module attributes {stable_mosaic.version = 11 : i64} {
  func.func @_gemm_kernel(%arg0: i32, %arg1: i32, %arg2: i32, %arg3: memref<32x128xbf16, #tpu.memory_space<vmem>>, %arg4: memref<128x128xbf16, #tpu.memory_space<vmem>>, %arg5: memref<1x128xf32, #tpu.memory_space<vmem>>, %arg6: memref<32x128xbf16, #tpu.memory_space<vmem>>, %arg7: memref<32x128xf32, #tpu.memory_space<vmem>>) attributes {dimension_semantics = [#tpu.dimension_semantics<parallel>, #tpu.dimension_semantics<parallel>, #tpu.dimension_semantics<arbitrary>], iteration_bounds = array<i64: 1, 1, 1>, scalar_prefetch = 0 : i64, scratch_operands = 1 : i64, tpu.core_type = #tpu.core_type<tc>, window_params = [{transform_indices = @transform_0, window_bounds = array<i64: 32, 128>}, {transform_indices = @transform_1, window_bounds = array<i64: 128, 128>}, {transform_indices = @transform_2, window_bounds = array<i64: 1, 128>}, {transform_indices = @transform_3, window_bounds = array<i64: 32, 128>}]} {
    %c0_i32 = arith.constant 0 : i32
    %0 = arith.cmpi eq, %arg2, %c0_i32 : i32
    %1 = arith.extui %0 : i1 to i32
    %c0_i32_0 = arith.constant 0 : i32
    %2 = arith.cmpi ne, %1, %c0_i32_0 : i32
    scf.if %2 {
      %cst_10 = arith.constant 0.000000e+00 : f32
      %12 = vector.broadcast %cst_10 : f32 to vector<32x128xf32>
      %c0_11 = arith.constant 0 : index
      %c0_12 = arith.constant 0 : index
      %13 = vector.load %arg7[%c0_11, %c0_12] : memref<32x128xf32, #tpu.memory_space<vmem>>, vector<32x128xf32>
      tpu.vector_store %arg7[%c0_11, %c0_12], %12 {strides = array<i32>} : memref<32x128xf32, #tpu.memory_space<vmem>>, vector<32x128xf32>,
    } else {
    }
    %c0 = arith.constant 0 : index
    %c0_1 = arith.constant 0 : index
    %3 = vector.load %arg3[%c0, %c0_1] : memref<32x128xbf16, #tpu.memory_space<vmem>>, vector<32x128xbf16>
    %c0_2 = arith.constant 0 : index
    %c0_3 = arith.constant 0 : index
    %4 = vector.load %arg7[%c0_2, %c0_3] : memref<32x128xf32, #tpu.memory_space<vmem>>, vector<32x128xf32>
    %c0_4 = arith.constant 0 : index
    %c0_5 = arith.constant 0 : index
    %5 = vector.load %arg4[%c0_4, %c0_5] : memref<128x128xbf16, #tpu.memory_space<vmem>>, vector<128x128xbf16>
    %cst = arith.constant dense<0.000000e+00> : vector<32x128xf32>
    %6 = tpu.matmul %3, %5, %cst {dimension_numbers = #tpu.dot_dimension_numbers<[1], [0], [0], [1], [0, 0, 1, 1], [], []>} : vector<32x128xbf16>, vector<128x128xbf16>, vector<32x128xf32> -> vector<32x128xf32>
    %7 = arith.addf %4, %6 : vector<32x128xf32>
    %c0_6 = arith.constant 0 : index
    %c0_7 = arith.constant 0 : index
    %8 = vector.load %arg7[%c0_6, %c0_7] : memref<32x128xf32, #tpu.memory_space<vmem>>, vector<32x128xf32>
    tpu.vector_store %arg7[%c0_6, %c0_7], %7 {strides = array<i32>} : memref<32x128xf32, #tpu.memory_space<vmem>>, vector<32x128xf32>,
    %c0_i32_8 = arith.constant 0 : i32
    %9 = arith.cmpi eq, %arg2, %c0_i32_8 : i32
    %10 = arith.extui %9 : i1 to i32
    %c0_i32_9 = arith.constant 0 : i32
    %11 = arith.cmpi ne, %10, %c0_i32_9 : i32
    scf.if %11 {
      %c0_10 = arith.constant 0 : index
      %c0_11 = arith.constant 0 : index
      %12 = vector.load %arg7[%c0_10, %c0_11] : memref<32x128xf32, #tpu.memory_space<vmem>>, vector<32x128xf32>
      %c0_12 = arith.constant 0 : index
      %c0_13 = arith.constant 0 : index
      %13 = vector.load %arg5[%c0_12, %c0_13] : memref<1x128xf32, #tpu.memory_space<vmem>>, vector<1x128xf32>
      %14 = vector.broadcast %13 : vector<1x128xf32> to vector<32x128xf32>
      %15 = arith.addf %12, %14 : vector<32x128xf32>
      %cst_14 = arith.constant 0.000000e+00 : f32
      %16 = vector.broadcast %cst_14 : f32 to vector<32x128xf32>
      %17 = arith.maximumf %15, %16 : vector<32x128xf32>
      %18 = arith.truncf %17 : vector<32x128xf32> to vector<32x128xbf16>
      %c0_15 = arith.constant 0 : index
      %c0_16 = arith.constant 0 : index
      %19 = vector.load %arg6[%c0_15, %c0_16] : memref<32x128xbf16, #tpu.memory_space<vmem>>, vector<32x128xbf16>
      tpu.vector_store %arg6[%c0_15, %c0_16], %18 {strides = array<i32>} : memref<32x128xbf16, #tpu.memory_space<vmem>>, vector<32x128xbf16>,
    } else {
    }
    return
  }
  func.func @transform_0(%arg0: i32, %arg1: i32, %arg2: i32) -> (i32, i32) {
    %c0_i32 = arith.constant 0 : i32
    return %arg1, %arg2 : i32, i32
  }
  func.func @transform_1(%arg0: i32, %arg1: i32, %arg2: i32) -> (i32, i32) {
    %c0_i32 = arith.constant 0 : i32
    return %arg2, %arg0 : i32, i32
  }
  func.func @transform_2(%arg0: i32, %arg1: i32, %arg2: i32) -> (i32, i32) {
    %c0_i32 = arith.constant 0 : i32
    %c0_i32_0 = arith.constant 0 : i32
    return %c0_i32, %arg0 : i32, i32
  }
  func.func @transform_3(%arg0: i32, %arg1: i32, %arg2: i32) -> (i32, i32) {
    %c0_i32 = arith.constant 0 : i32
    return %arg1, %arg0 : i32, i32
  }
}

module attributes {stable_mosaic.version = 11 : i64} {
  func.func @_gemm_kernel(%arg0: i32, %arg1: i32, %arg2: i32, %arg3: memref<32x128xbf16, #tpu.memory_space<vmem>>, %arg4: memref<128x128xbf16, #tpu.memory_space<vmem>>, %arg5: memref<1x128xf32, #tpu.memory_space<vmem>>, %arg6: memref<32x128xbf16, #tpu.memory_space<vmem>>, %arg7: memref<1x128xf32, #tpu.memory_space<vmem>>, %arg8: memref<1x128xf32, #tpu.memory_space<vmem>>, %arg9: memref<32x128xf32, #tpu.memory_space<vmem>>) attributes {dimension_semantics = [#tpu.dimension_semantics<parallel>, #tpu.dimension_semantics<arbitrary>, #tpu.dimension_semantics<arbitrary>], iteration_bounds = array<i64: 1, 1, 1>, scalar_prefetch = 0 : i64, scratch_operands = 1 : i64, tpu.core_type = #tpu.core_type<tc>, window_params = [{transform_indices = @transform_0, window_bounds = array<i64: 32, 128>}, {transform_indices = @transform_1, window_bounds = array<i64: 128, 128>}, {transform_indices = @transform_2, window_bounds = array<i64: 1, 128>}, {transform_indices = @transform_3, window_bounds = array<i64: 32, 128>}, {transform_indices = @transform_4, window_bounds = array<i64: 1, 128>}, {transform_indices = @transform_5, window_bounds = array<i64: 1, 128>}]} {
    %c0_i32 = arith.constant 0 : i32
    %0 = arith.cmpi eq, %arg2, %c0_i32 : i32
    %1 = arith.extui %0 : i1 to i32
    %c0_i32_0 = arith.constant 0 : i32
    %2 = arith.cmpi ne, %1, %c0_i32_0 : i32
    scf.if %2 {
      %cst_14 = arith.constant 0.000000e+00 : f32
      %19 = vector.broadcast %cst_14 : f32 to vector<32x128xf32>
      %c0_15 = arith.constant 0 : index
      %c0_16 = arith.constant 0 : index
      %20 = vector.load %arg9[%c0_15, %c0_16] : memref<32x128xf32, #tpu.memory_space<vmem>>, vector<32x128xf32>
      tpu.vector_store %arg9[%c0_15, %c0_16], %19 {strides = array<i32>} : memref<32x128xf32, #tpu.memory_space<vmem>>, vector<32x128xf32>,
    } else {
    }
    %c0_i32_1 = arith.constant 0 : i32
    %3 = arith.cmpi eq, %arg1, %c0_i32_1 : i32
    %c0_i32_2 = arith.constant 0 : i32
    %4 = arith.cmpi eq, %arg2, %c0_i32_2 : i32
    %5 = arith.andi %3, %4 : i1
    %6 = arith.extui %5 : i1 to i32
    %c0_i32_3 = arith.constant 0 : i32
    %7 = arith.cmpi ne, %6, %c0_i32_3 : i32
    scf.if %7 {
      %cst_14 = arith.constant 0.000000e+00 : f32
      %19 = vector.broadcast %cst_14 : f32 to vector<1x128xf32>
      %c0_15 = arith.constant 0 : index
      %c0_16 = arith.constant 0 : index
      %20 = vector.load %arg7[%c0_15, %c0_16] : memref<1x128xf32, #tpu.memory_space<vmem>>, vector<1x128xf32>
      tpu.vector_store %arg7[%c0_15, %c0_16], %19 {strides = array<i32>} : memref<1x128xf32, #tpu.memory_space<vmem>>, vector<1x128xf32>,
      %cst_17 = arith.constant 0.000000e+00 : f32
      %21 = vector.broadcast %cst_17 : f32 to vector<1x128xf32>
      %c0_18 = arith.constant 0 : index
      %c0_19 = arith.constant 0 : index
      %22 = vector.load %arg8[%c0_18, %c0_19] : memref<1x128xf32, #tpu.memory_space<vmem>>, vector<1x128xf32>
      tpu.vector_store %arg8[%c0_18, %c0_19], %21 {strides = array<i32>} : memref<1x128xf32, #tpu.memory_space<vmem>>, vector<1x128xf32>,
    } else {
    }
    %c0 = arith.constant 0 : index
    %c0_4 = arith.constant 0 : index
    %8 = vector.load %arg3[%c0, %c0_4] : memref<32x128xbf16, #tpu.memory_space<vmem>>, vector<32x128xbf16>
    %cst = arith.constant 0.000000e+00 : bf16
    %9 = vector.broadcast %cst : bf16 to vector<32x128xbf16>
    %10 = arith.maximumf %8, %9 : vector<32x128xbf16>
    %c0_5 = arith.constant 0 : index
    %c0_6 = arith.constant 0 : index
    %11 = vector.load %arg9[%c0_5, %c0_6] : memref<32x128xf32, #tpu.memory_space<vmem>>, vector<32x128xf32>
    %c0_7 = arith.constant 0 : index
    %c0_8 = arith.constant 0 : index
    %12 = vector.load %arg4[%c0_7, %c0_8] : memref<128x128xbf16, #tpu.memory_space<vmem>>, vector<128x128xbf16>
    %cst_9 = arith.constant dense<0.000000e+00> : vector<32x128xf32>
    %13 = tpu.matmul %10, %12, %cst_9 {dimension_numbers = #tpu.dot_dimension_numbers<[1], [0], [0], [1], [0, 0, 1, 1], [], []>} : vector<32x128xbf16>, vector<128x128xbf16>, vector<32x128xf32> -> vector<32x128xf32>
    %14 = arith.addf %11, %13 : vector<32x128xf32>
    %c0_10 = arith.constant 0 : index
    %c0_11 = arith.constant 0 : index
    %15 = vector.load %arg9[%c0_10, %c0_11] : memref<32x128xf32, #tpu.memory_space<vmem>>, vector<32x128xf32>
    tpu.vector_store %arg9[%c0_10, %c0_11], %14 {strides = array<i32>} : memref<32x128xf32, #tpu.memory_space<vmem>>, vector<32x128xf32>,
    %c0_i32_12 = arith.constant 0 : i32
    %16 = arith.cmpi eq, %arg2, %c0_i32_12 : i32
    %17 = arith.extui %16 : i1 to i32
    %c0_i32_13 = arith.constant 0 : i32
    %18 = arith.cmpi ne, %17, %c0_i32_13 : i32
    scf.if %18 {
      %c0_14 = arith.constant 0 : index
      %c0_15 = arith.constant 0 : index
      %19 = vector.load %arg9[%c0_14, %c0_15] : memref<32x128xf32, #tpu.memory_space<vmem>>, vector<32x128xf32>
      %c0_16 = arith.constant 0 : index
      %c0_17 = arith.constant 0 : index
      %20 = vector.load %arg5[%c0_16, %c0_17] : memref<1x128xf32, #tpu.memory_space<vmem>>, vector<1x128xf32>
      %21 = vector.broadcast %20 : vector<1x128xf32> to vector<32x128xf32>
      %22 = arith.addf %19, %21 : vector<32x128xf32>
      %23 = arith.truncf %22 : vector<32x128xf32> to vector<32x128xbf16>
      %c0_18 = arith.constant 0 : index
      %c0_19 = arith.constant 0 : index
      %24 = vector.load %arg6[%c0_18, %c0_19] : memref<32x128xbf16, #tpu.memory_space<vmem>>, vector<32x128xbf16>
      tpu.vector_store %arg6[%c0_18, %c0_19], %23 {strides = array<i32>} : memref<32x128xbf16, #tpu.memory_space<vmem>>, vector<32x128xbf16>,
      %c0_20 = arith.constant 0 : index
      %c0_21 = arith.constant 0 : index
      %25 = vector.load %arg7[%c0_20, %c0_21] : memref<1x128xf32, #tpu.memory_space<vmem>>, vector<1x128xf32>
      %cst_22 = arith.constant dense<0.000000e+00> : vector<128xf32>
      %26 = vector.multi_reduction <add>, %22, %cst_22 [0] : vector<32x128xf32> to vector<128xf32>
      %27 = vector.shape_cast %26 : vector<128xf32> to vector<1x128xf32>
      %28 = arith.addf %25, %27 : vector<1x128xf32>
      %c0_23 = arith.constant 0 : index
      %c0_24 = arith.constant 0 : index
      %29 = vector.load %arg7[%c0_23, %c0_24] : memref<1x128xf32, #tpu.memory_space<vmem>>, vector<1x128xf32>
      tpu.vector_store %arg7[%c0_23, %c0_24], %28 {strides = array<i32>} : memref<1x128xf32, #tpu.memory_space<vmem>>, vector<1x128xf32>,
      %c0_25 = arith.constant 0 : index
      %c0_26 = arith.constant 0 : index
      %30 = vector.load %arg8[%c0_25, %c0_26] : memref<1x128xf32, #tpu.memory_space<vmem>>, vector<1x128xf32>
      %31 = arith.mulf %22, %22 : vector<32x128xf32>
      %cst_27 = arith.constant dense<0.000000e+00> : vector<128xf32>
      %32 = vector.multi_reduction <add>, %31, %cst_27 [0] : vector<32x128xf32> to vector<128xf32>
      %33 = vector.shape_cast %32 : vector<128xf32> to vector<1x128xf32>
      %34 = arith.addf %30, %33 : vector<1x128xf32>
      %c0_28 = arith.constant 0 : index
      %c0_29 = arith.constant 0 : index
      %35 = vector.load %arg8[%c0_28, %c0_29] : memref<1x128xf32, #tpu.memory_space<vmem>>, vector<1x128xf32>
      tpu.vector_store %arg8[%c0_28, %c0_29], %34 {strides = array<i32>} : memref<1x128xf32, #tpu.memory_space<vmem>>, vector<1x128xf32>,
    } else {
    }
    return
  }
  func.func @transform_0(%arg0: i32, %arg1: i32, %arg2: i32) -> (i32, i32) {
    %c0_i32 = arith.constant 0 : i32
    return %arg1, %arg2 : i32, i32
  }
  func.func @transform_1(%arg0: i32, %arg1: i32, %arg2: i32) -> (i32, i32) {
    %c0_i32 = arith.constant 0 : i32
    return %arg2, %arg0 : i32, i32
  }
  func.func @transform_2(%arg0: i32, %arg1: i32, %arg2: i32) -> (i32, i32) {
    %c0_i32 = arith.constant 0 : i32
    %c0_i32_0 = arith.constant 0 : i32
    return %c0_i32, %arg0 : i32, i32
  }
  func.func @transform_3(%arg0: i32, %arg1: i32, %arg2: i32) -> (i32, i32) {
    %c0_i32 = arith.constant 0 : i32
    return %arg1, %arg0 : i32, i32
  }
  func.func @transform_4(%arg0: i32, %arg1: i32, %arg2: i32) -> (i32, i32) {
    %c0_i32 = arith.constant 0 : i32
    %c0_i32_0 = arith.constant 0 : i32
    return %c0_i32, %arg0 : i32, i32
  }
  func.func @transform_5(%arg0: i32, %arg1: i32, %arg2: i32) -> (i32, i32) {
    %c0_i32 = arith.constant 0 : i32
    %c0_i32_0 = arith.constant 0 : i32
    return %c0_i32, %arg0 : i32, i32
  }
}

module attributes {stable_mosaic.version = 11 : i64} {
  func.func @_gemm_kernel(%arg0: i32, %arg1: i32, %arg2: i32, %arg3: memref<32x128xbf16, #tpu.memory_space<vmem>>, %arg4: memref<128x128xbf16, #tpu.memory_space<vmem>>, %arg5: memref<1x128xf32, #tpu.memory_space<vmem>>, %arg6: memref<32x128xbf16, #tpu.memory_space<vmem>>, %arg7: memref<32x128xf32, #tpu.memory_space<vmem>>) attributes {dimension_semantics = [#tpu.dimension_semantics<parallel>, #tpu.dimension_semantics<parallel>, #tpu.dimension_semantics<arbitrary>], iteration_bounds = array<i64: 1, 1, 1>, scalar_prefetch = 0 : i64, scratch_operands = 1 : i64, tpu.core_type = #tpu.core_type<tc>, window_params = [{transform_indices = @transform_0, window_bounds = array<i64: 32, 128>}, {transform_indices = @transform_1, window_bounds = array<i64: 128, 128>}, {transform_indices = @transform_2, window_bounds = array<i64: 1, 128>}, {transform_indices = @transform_3, window_bounds = array<i64: 32, 128>}]} {
    %c0_i32 = arith.constant 0 : i32
    %0 = arith.cmpi eq, %arg2, %c0_i32 : i32
    %1 = arith.extui %0 : i1 to i32
    %c0_i32_0 = arith.constant 0 : i32
    %2 = arith.cmpi ne, %1, %c0_i32_0 : i32
    scf.if %2 {
      %cst_10 = arith.constant 0.000000e+00 : f32
      %12 = vector.broadcast %cst_10 : f32 to vector<32x128xf32>
      %c0_11 = arith.constant 0 : index
      %c0_12 = arith.constant 0 : index
      %13 = vector.load %arg7[%c0_11, %c0_12] : memref<32x128xf32, #tpu.memory_space<vmem>>, vector<32x128xf32>
      tpu.vector_store %arg7[%c0_11, %c0_12], %12 {strides = array<i32>} : memref<32x128xf32, #tpu.memory_space<vmem>>, vector<32x128xf32>,
    } else {
    }
    %c0 = arith.constant 0 : index
    %c0_1 = arith.constant 0 : index
    %3 = vector.load %arg3[%c0, %c0_1] : memref<32x128xbf16, #tpu.memory_space<vmem>>, vector<32x128xbf16>
    %c0_2 = arith.constant 0 : index
    %c0_3 = arith.constant 0 : index
    %4 = vector.load %arg7[%c0_2, %c0_3] : memref<32x128xf32, #tpu.memory_space<vmem>>, vector<32x128xf32>
    %c0_4 = arith.constant 0 : index
    %c0_5 = arith.constant 0 : index
    %5 = vector.load %arg4[%c0_4, %c0_5] : memref<128x128xbf16, #tpu.memory_space<vmem>>, vector<128x128xbf16>
    %cst = arith.constant dense<0.000000e+00> : vector<32x128xf32>
    %6 = tpu.matmul %3, %5, %cst {dimension_numbers = #tpu.dot_dimension_numbers<[1], [0], [0], [1], [0, 0, 1, 1], [], []>} : vector<32x128xbf16>, vector<128x128xbf16>, vector<32x128xf32> -> vector<32x128xf32>
    %7 = arith.addf %4, %6 : vector<32x128xf32>
    %c0_6 = arith.constant 0 : index
    %c0_7 = arith.constant 0 : index
    %8 = vector.load %arg7[%c0_6, %c0_7] : memref<32x128xf32, #tpu.memory_space<vmem>>, vector<32x128xf32>
    tpu.vector_store %arg7[%c0_6, %c0_7], %7 {strides = array<i32>} : memref<32x128xf32, #tpu.memory_space<vmem>>, vector<32x128xf32>,
    %c0_i32_8 = arith.constant 0 : i32
    %9 = arith.cmpi eq, %arg2, %c0_i32_8 : i32
    %10 = arith.extui %9 : i1 to i32
    %c0_i32_9 = arith.constant 0 : i32
    %11 = arith.cmpi ne, %10, %c0_i32_9 : i32
    scf.if %11 {
      %c0_10 = arith.constant 0 : index
      %c0_11 = arith.constant 0 : index
      %12 = vector.load %arg7[%c0_10, %c0_11] : memref<32x128xf32, #tpu.memory_space<vmem>>, vector<32x128xf32>
      %c0_12 = arith.constant 0 : index
      %c0_13 = arith.constant 0 : index
      %13 = vector.load %arg5[%c0_12, %c0_13] : memref<1x128xf32, #tpu.memory_space<vmem>>, vector<1x128xf32>
      %14 = vector.broadcast %13 : vector<1x128xf32> to vector<32x128xf32>
      %15 = arith.addf %12, %14 : vector<32x128xf32>
      %16 = arith.truncf %15 : vector<32x128xf32> to vector<32x128xbf16>
      %c0_14 = arith.constant 0 : index
      %c0_15 = arith.constant 0 : index
      %17 = vector.load %arg6[%c0_14, %c0_15] : memref<32x128xbf16, #tpu.memory_space<vmem>>, vector<32x128xbf16>
      tpu.vector_store %arg6[%c0_14, %c0_15], %16 {strides = array<i32>} : memref<32x128xbf16, #tpu.memory_space<vmem>>, vector<32x128xbf16>,
    } else {
    }
    return
  }
  func.func @transform_0(%arg0: i32, %arg1: i32, %arg2: i32) -> (i32, i32) {
    %c0_i32 = arith.constant 0 : i32
    return %arg1, %arg2 : i32, i32
  }
  func.func @transform_1(%arg0: i32, %arg1: i32, %arg2: i32) -> (i32, i32) {
    %c0_i32 = arith.constant 0 : i32
    return %arg2, %arg0 : i32, i32
  }
  func.func @transform_2(%arg0: i32, %arg1: i32, %arg2: i32) -> (i32, i32) {
    %c0_i32 = arith.constant 0 : i32
    %c0_i32_0 = arith.constant 0 : i32
    return %c0_i32, %arg0 : i32, i32
  }
  func.func @transform_3(%arg0: i32, %arg1: i32, %arg2: i32) -> (i32, i32) {
    %c0_i32 = arith.constant 0 : i32
    return %arg1, %arg0 : i32, i32
  }
}

module attributes {stable_mosaic.version = 11 : i64} {
  func.func @_bn_apply_kernel(%arg0: i32, %arg1: memref<32x128xbf16, #tpu.memory_space<vmem>>, %arg2: memref<1x128xf32, #tpu.memory_space<vmem>>, %arg3: memref<1x128xf32, #tpu.memory_space<vmem>>, %arg4: memref<1x128xf32, #tpu.memory_space<vmem>>, %arg5: memref<1x128xf32, #tpu.memory_space<vmem>>, %arg6: memref<32x128xbf16, #tpu.memory_space<vmem>>) attributes {dimension_semantics = [#tpu.dimension_semantics<parallel>], iteration_bounds = array<i64: 1>, scalar_prefetch = 0 : i64, scratch_operands = 0 : i64, tpu.core_type = #tpu.core_type<tc>, window_params = [{transform_indices = @transform_0, window_bounds = array<i64: 32, 128>}, {pipeline_mode = #tpu.pipeline_mode<synchronous>, transform_indices = @transform_1, window_bounds = array<i64: 1, 128>}, {pipeline_mode = #tpu.pipeline_mode<synchronous>, transform_indices = @transform_2, window_bounds = array<i64: 1, 128>}, {pipeline_mode = #tpu.pipeline_mode<synchronous>, transform_indices = @transform_3, window_bounds = array<i64: 1, 128>}, {pipeline_mode = #tpu.pipeline_mode<synchronous>, transform_indices = @transform_4, window_bounds = array<i64: 1, 128>}, {transform_indices = @transform_5, window_bounds = array<i64: 32, 128>}]} {
    %c0 = arith.constant 0 : index
    %c0_0 = arith.constant 0 : index
    %0 = vector.load %arg2[%c0, %c0_0] : memref<1x128xf32, #tpu.memory_space<vmem>>, vector<1x128xf32>
    %cst = arith.constant 3.125000e-02 : f32
    %1 = vector.broadcast %cst : f32 to vector<1x128xf32>
    %2 = arith.mulf %0, %1 : vector<1x128xf32>
    %c0_1 = arith.constant 0 : index
    %c0_2 = arith.constant 0 : index
    %3 = vector.load %arg3[%c0_1, %c0_2] : memref<1x128xf32, #tpu.memory_space<vmem>>, vector<1x128xf32>
    %cst_3 = arith.constant 3.125000e-02 : f32
    %4 = vector.broadcast %cst_3 : f32 to vector<1x128xf32>
    %5 = arith.mulf %3, %4 : vector<1x128xf32>
    %6 = arith.mulf %2, %2 : vector<1x128xf32>
    %7 = arith.subf %5, %6 : vector<1x128xf32>
    %cst_4 = arith.constant 9.99999974E-6 : f32
    %8 = vector.broadcast %cst_4 : f32 to vector<1x128xf32>
    %9 = arith.addf %7, %8 : vector<1x128xf32>
    %10 = math.rsqrt %9 : vector<1x128xf32>
    %c0_5 = arith.constant 0 : index
    %c0_6 = arith.constant 0 : index
    %11 = vector.load %arg4[%c0_5, %c0_6] : memref<1x128xf32, #tpu.memory_space<vmem>>, vector<1x128xf32>
    %12 = arith.mulf %10, %11 : vector<1x128xf32>
    %c0_7 = arith.constant 0 : index
    %c0_8 = arith.constant 0 : index
    %13 = vector.load %arg5[%c0_7, %c0_8] : memref<1x128xf32, #tpu.memory_space<vmem>>, vector<1x128xf32>
    %14 = arith.mulf %2, %12 : vector<1x128xf32>
    %15 = arith.subf %13, %14 : vector<1x128xf32>
    %c0_9 = arith.constant 0 : index
    %c0_10 = arith.constant 0 : index
    %16 = vector.load %arg1[%c0_9, %c0_10] : memref<32x128xbf16, #tpu.memory_space<vmem>>, vector<32x128xbf16>
    %17 = arith.extf %16 : vector<32x128xbf16> to vector<32x128xf32>
    %18 = vector.broadcast %12 : vector<1x128xf32> to vector<32x128xf32>
    %19 = arith.mulf %17, %18 : vector<32x128xf32>
    %20 = vector.broadcast %15 : vector<1x128xf32> to vector<32x128xf32>
    %21 = arith.addf %19, %20 : vector<32x128xf32>
    %cst_11 = arith.constant 0.000000e+00 : f32
    %22 = vector.broadcast %cst_11 : f32 to vector<32x128xf32>
    %23 = arith.maximumf %21, %22 : vector<32x128xf32>
    %24 = arith.truncf %23 : vector<32x128xf32> to vector<32x128xbf16>
    %c0_12 = arith.constant 0 : index
    %c0_13 = arith.constant 0 : index
    %25 = vector.load %arg6[%c0_12, %c0_13] : memref<32x128xbf16, #tpu.memory_space<vmem>>, vector<32x128xbf16>
    tpu.vector_store %arg6[%c0_12, %c0_13], %24 {strides = array<i32>} : memref<32x128xbf16, #tpu.memory_space<vmem>>, vector<32x128xbf16>,
    return
  }
  func.func @transform_0(%arg0: i32) -> (i32, i32) {
    %c0_i32 = arith.constant 0 : i32
    %c0_i32_0 = arith.constant 0 : i32
    return %arg0, %c0_i32 : i32, i32
  }
  func.func @transform_1(%arg0: i32) -> (i32, i32) {
    %c0_i32 = arith.constant 0 : i32
    %c0_i32_0 = arith.constant 0 : i32
    %c0_i32_1 = arith.constant 0 : i32
    return %c0_i32, %c0_i32_0 : i32, i32
  }
  func.func @transform_2(%arg0: i32) -> (i32, i32) {
    %c0_i32 = arith.constant 0 : i32
    %c0_i32_0 = arith.constant 0 : i32
    %c0_i32_1 = arith.constant 0 : i32
    return %c0_i32, %c0_i32_0 : i32, i32
  }
  func.func @transform_3(%arg0: i32) -> (i32, i32) {
    %c0_i32 = arith.constant 0 : i32
    %c0_i32_0 = arith.constant 0 : i32
    %c0_i32_1 = arith.constant 0 : i32
    return %c0_i32, %c0_i32_0 : i32, i32
  }
  func.func @transform_4(%arg0: i32) -> (i32, i32) {
    %c0_i32 = arith.constant 0 : i32
    %c0_i32_0 = arith.constant 0 : i32
    %c0_i32_1 = arith.constant 0 : i32
    return %c0_i32, %c0_i32_0 : i32, i32
  }
  func.func @transform_5(%arg0: i32) -> (i32, i32) {
    %c0_i32 = arith.constant 0 : i32
    %c0_i32_0 = arith.constant 0 : i32
    return %arg0, %c0_i32 : i32, i32
  }
}

module attributes {stable_mosaic.version = 11 : i64} {
  func.func @_gemm_kernel(%arg0: i32, %arg1: i32, %arg2: i32, %arg3: memref<32x128xbf16, #tpu.memory_space<vmem>>, %arg4: memref<128x128xbf16, #tpu.memory_space<vmem>>, %arg5: memref<1x128xf32, #tpu.memory_space<vmem>>, %arg6: memref<32x128xbf16, #tpu.memory_space<vmem>>, %arg7: memref<1x128xf32, #tpu.memory_space<vmem>>, %arg8: memref<1x128xf32, #tpu.memory_space<vmem>>, %arg9: memref<32x128xf32, #tpu.memory_space<vmem>>) attributes {dimension_semantics = [#tpu.dimension_semantics<parallel>, #tpu.dimension_semantics<arbitrary>, #tpu.dimension_semantics<arbitrary>], iteration_bounds = array<i64: 1, 1, 1>, scalar_prefetch = 0 : i64, scratch_operands = 1 : i64, tpu.core_type = #tpu.core_type<tc>, window_params = [{transform_indices = @transform_0, window_bounds = array<i64: 32, 128>}, {transform_indices = @transform_1, window_bounds = array<i64: 128, 128>}, {transform_indices = @transform_2, window_bounds = array<i64: 1, 128>}, {transform_indices = @transform_3, window_bounds = array<i64: 32, 128>}, {transform_indices = @transform_4, window_bounds = array<i64: 1, 128>}, {transform_indices = @transform_5, window_bounds = array<i64: 1, 128>}]} {
    %c0_i32 = arith.constant 0 : i32
    %0 = arith.cmpi eq, %arg2, %c0_i32 : i32
    %1 = arith.extui %0 : i1 to i32
    %c0_i32_0 = arith.constant 0 : i32
    %2 = arith.cmpi ne, %1, %c0_i32_0 : i32
    scf.if %2 {
      %cst_13 = arith.constant 0.000000e+00 : f32
      %17 = vector.broadcast %cst_13 : f32 to vector<32x128xf32>
      %c0_14 = arith.constant 0 : index
      %c0_15 = arith.constant 0 : index
      %18 = vector.load %arg9[%c0_14, %c0_15] : memref<32x128xf32, #tpu.memory_space<vmem>>, vector<32x128xf32>
      tpu.vector_store %arg9[%c0_14, %c0_15], %17 {strides = array<i32>} : memref<32x128xf32, #tpu.memory_space<vmem>>, vector<32x128xf32>,
    } else {
    }
    %c0_i32_1 = arith.constant 0 : i32
    %3 = arith.cmpi eq, %arg1, %c0_i32_1 : i32
    %c0_i32_2 = arith.constant 0 : i32
    %4 = arith.cmpi eq, %arg2, %c0_i32_2 : i32
    %5 = arith.andi %3, %4 : i1
    %6 = arith.extui %5 : i1 to i32
    %c0_i32_3 = arith.constant 0 : i32
    %7 = arith.cmpi ne, %6, %c0_i32_3 : i32
    scf.if %7 {
      %cst_13 = arith.constant 0.000000e+00 : f32
      %17 = vector.broadcast %cst_13 : f32 to vector<1x128xf32>
      %c0_14 = arith.constant 0 : index
      %c0_15 = arith.constant 0 : index
      %18 = vector.load %arg7[%c0_14, %c0_15] : memref<1x128xf32, #tpu.memory_space<vmem>>, vector<1x128xf32>
      tpu.vector_store %arg7[%c0_14, %c0_15], %17 {strides = array<i32>} : memref<1x128xf32, #tpu.memory_space<vmem>>, vector<1x128xf32>,
      %cst_16 = arith.constant 0.000000e+00 : f32
      %19 = vector.broadcast %cst_16 : f32 to vector<1x128xf32>
      %c0_17 = arith.constant 0 : index
      %c0_18 = arith.constant 0 : index
      %20 = vector.load %arg8[%c0_17, %c0_18] : memref<1x128xf32, #tpu.memory_space<vmem>>, vector<1x128xf32>
      tpu.vector_store %arg8[%c0_17, %c0_18], %19 {strides = array<i32>} : memref<1x128xf32, #tpu.memory_space<vmem>>, vector<1x128xf32>,
    } else {
    }
    %c0 = arith.constant 0 : index
    %c0_4 = arith.constant 0 : index
    %8 = vector.load %arg3[%c0, %c0_4] : memref<32x128xbf16, #tpu.memory_space<vmem>>, vector<32x128xbf16>
    %c0_5 = arith.constant 0 : index
    %c0_6 = arith.constant 0 : index
    %9 = vector.load %arg9[%c0_5, %c0_6] : memref<32x128xf32, #tpu.memory_space<vmem>>, vector<32x128xf32>
    %c0_7 = arith.constant 0 : index
    %c0_8 = arith.constant 0 : index
    %10 = vector.load %arg4[%c0_7, %c0_8] : memref<128x128xbf16, #tpu.memory_space<vmem>>, vector<128x128xbf16>
    %cst = arith.constant dense<0.000000e+00> : vector<32x128xf32>
    %11 = tpu.matmul %8, %10, %cst {dimension_numbers = #tpu.dot_dimension_numbers<[1], [0], [0], [1], [0, 0, 1, 1], [], []>} : vector<32x128xbf16>, vector<128x128xbf16>, vector<32x128xf32> -> vector<32x128xf32>
    %12 = arith.addf %9, %11 : vector<32x128xf32>
    %c0_9 = arith.constant 0 : index
    %c0_10 = arith.constant 0 : index
    %13 = vector.load %arg9[%c0_9, %c0_10] : memref<32x128xf32, #tpu.memory_space<vmem>>, vector<32x128xf32>
    tpu.vector_store %arg9[%c0_9, %c0_10], %12 {strides = array<i32>} : memref<32x128xf32, #tpu.memory_space<vmem>>, vector<32x128xf32>,
    %c0_i32_11 = arith.constant 0 : i32
    %14 = arith.cmpi eq, %arg2, %c0_i32_11 : i32
    %15 = arith.extui %14 : i1 to i32
    %c0_i32_12 = arith.constant 0 : i32
    %16 = arith.cmpi ne, %15, %c0_i32_12 : i32
    scf.if %16 {
      %c0_13 = arith.constant 0 : index
      %c0_14 = arith.constant 0 : index
      %17 = vector.load %arg9[%c0_13, %c0_14] : memref<32x128xf32, #tpu.memory_space<vmem>>, vector<32x128xf32>
      %c0_15 = arith.constant 0 : index
      %c0_16 = arith.constant 0 : index
      %18 = vector.load %arg5[%c0_15, %c0_16] : memref<1x128xf32, #tpu.memory_space<vmem>>, vector<1x128xf32>
      %19 = vector.broadcast %18 : vector<1x128xf32> to vector<32x128xf32>
      %20 = arith.addf %17, %19 : vector<32x128xf32>
      %21 = arith.truncf %20 : vector<32x128xf32> to vector<32x128xbf16>
      %c0_17 = arith.constant 0 : index
      %c0_18 = arith.constant 0 : index
      %22 = vector.load %arg6[%c0_17, %c0_18] : memref<32x128xbf16, #tpu.memory_space<vmem>>, vector<32x128xbf16>
      tpu.vector_store %arg6[%c0_17, %c0_18], %21 {strides = array<i32>} : memref<32x128xbf16, #tpu.memory_space<vmem>>, vector<32x128xbf16>,
      %c0_19 = arith.constant 0 : index
      %c0_20 = arith.constant 0 : index
      %23 = vector.load %arg7[%c0_19, %c0_20] : memref<1x128xf32, #tpu.memory_space<vmem>>, vector<1x128xf32>
      %cst_21 = arith.constant dense<0.000000e+00> : vector<128xf32>
      %24 = vector.multi_reduction <add>, %20, %cst_21 [0] : vector<32x128xf32> to vector<128xf32>
      %25 = vector.shape_cast %24 : vector<128xf32> to vector<1x128xf32>
      %26 = arith.addf %23, %25 : vector<1x128xf32>
      %c0_22 = arith.constant 0 : index
      %c0_23 = arith.constant 0 : index
      %27 = vector.load %arg7[%c0_22, %c0_23] : memref<1x128xf32, #tpu.memory_space<vmem>>, vector<1x128xf32>
      tpu.vector_store %arg7[%c0_22, %c0_23], %26 {strides = array<i32>} : memref<1x128xf32, #tpu.memory_space<vmem>>, vector<1x128xf32>,
      %c0_24 = arith.constant 0 : index
      %c0_25 = arith.constant 0 : index
      %28 = vector.load %arg8[%c0_24, %c0_25] : memref<1x128xf32, #tpu.memory_space<vmem>>, vector<1x128xf32>
      %29 = arith.mulf %20, %20 : vector<32x128xf32>
      %cst_26 = arith.constant dense<0.000000e+00> : vector<128xf32>
      %30 = vector.multi_reduction <add>, %29, %cst_26 [0] : vector<32x128xf32> to vector<128xf32>
      %31 = vector.shape_cast %30 : vector<128xf32> to vector<1x128xf32>
      %32 = arith.addf %28, %31 : vector<1x128xf32>
      %c0_27 = arith.constant 0 : index
      %c0_28 = arith.constant 0 : index
      %33 = vector.load %arg8[%c0_27, %c0_28] : memref<1x128xf32, #tpu.memory_space<vmem>>, vector<1x128xf32>
      tpu.vector_store %arg8[%c0_27, %c0_28], %32 {strides = array<i32>} : memref<1x128xf32, #tpu.memory_space<vmem>>, vector<1x128xf32>,
    } else {
    }
    return
  }
  func.func @transform_0(%arg0: i32, %arg1: i32, %arg2: i32) -> (i32, i32) {
    %c0_i32 = arith.constant 0 : i32
    return %arg1, %arg2 : i32, i32
  }
  func.func @transform_1(%arg0: i32, %arg1: i32, %arg2: i32) -> (i32, i32) {
    %c0_i32 = arith.constant 0 : i32
    return %arg2, %arg0 : i32, i32
  }
  func.func @transform_2(%arg0: i32, %arg1: i32, %arg2: i32) -> (i32, i32) {
    %c0_i32 = arith.constant 0 : i32
    %c0_i32_0 = arith.constant 0 : i32
    return %c0_i32, %arg0 : i32, i32
  }
  func.func @transform_3(%arg0: i32, %arg1: i32, %arg2: i32) -> (i32, i32) {
    %c0_i32 = arith.constant 0 : i32
    return %arg1, %arg0 : i32, i32
  }
  func.func @transform_4(%arg0: i32, %arg1: i32, %arg2: i32) -> (i32, i32) {
    %c0_i32 = arith.constant 0 : i32
    %c0_i32_0 = arith.constant 0 : i32
    return %c0_i32, %arg0 : i32, i32
  }
  func.func @transform_5(%arg0: i32, %arg1: i32, %arg2: i32) -> (i32, i32) {
    %c0_i32 = arith.constant 0 : i32
    %c0_i32_0 = arith.constant 0 : i32
    return %c0_i32, %arg0 : i32, i32
  }
}

module attributes {stable_mosaic.version = 11 : i64} {
  func.func @_bn_apply_kernel(%arg0: i32, %arg1: memref<32x128xbf16, #tpu.memory_space<vmem>>, %arg2: memref<1x128xf32, #tpu.memory_space<vmem>>, %arg3: memref<1x128xf32, #tpu.memory_space<vmem>>, %arg4: memref<1x128xf32, #tpu.memory_space<vmem>>, %arg5: memref<1x128xf32, #tpu.memory_space<vmem>>, %arg6: memref<32x128xbf16, #tpu.memory_space<vmem>>, %arg7: memref<32x128xbf16, #tpu.memory_space<vmem>>) attributes {dimension_semantics = [#tpu.dimension_semantics<parallel>], iteration_bounds = array<i64: 1>, scalar_prefetch = 0 : i64, scratch_operands = 0 : i64, tpu.core_type = #tpu.core_type<tc>, window_params = [{transform_indices = @transform_0, window_bounds = array<i64: 32, 128>}, {pipeline_mode = #tpu.pipeline_mode<synchronous>, transform_indices = @transform_1, window_bounds = array<i64: 1, 128>}, {pipeline_mode = #tpu.pipeline_mode<synchronous>, transform_indices = @transform_2, window_bounds = array<i64: 1, 128>}, {pipeline_mode = #tpu.pipeline_mode<synchronous>, transform_indices = @transform_3, window_bounds = array<i64: 1, 128>}, {pipeline_mode = #tpu.pipeline_mode<synchronous>, transform_indices = @transform_4, window_bounds = array<i64: 1, 128>}, {transform_indices = @transform_5, window_bounds = array<i64: 32, 128>}, {transform_indices = @transform_6, window_bounds = array<i64: 32, 128>}]} {
    %c0 = arith.constant 0 : index
    %c0_0 = arith.constant 0 : index
    %0 = vector.load %arg2[%c0, %c0_0] : memref<1x128xf32, #tpu.memory_space<vmem>>, vector<1x128xf32>
    %cst = arith.constant 3.125000e-02 : f32
    %1 = vector.broadcast %cst : f32 to vector<1x128xf32>
    %2 = arith.mulf %0, %1 : vector<1x128xf32>
    %c0_1 = arith.constant 0 : index
    %c0_2 = arith.constant 0 : index
    %3 = vector.load %arg3[%c0_1, %c0_2] : memref<1x128xf32, #tpu.memory_space<vmem>>, vector<1x128xf32>
    %cst_3 = arith.constant 3.125000e-02 : f32
    %4 = vector.broadcast %cst_3 : f32 to vector<1x128xf32>
    %5 = arith.mulf %3, %4 : vector<1x128xf32>
    %6 = arith.mulf %2, %2 : vector<1x128xf32>
    %7 = arith.subf %5, %6 : vector<1x128xf32>
    %cst_4 = arith.constant 9.99999974E-6 : f32
    %8 = vector.broadcast %cst_4 : f32 to vector<1x128xf32>
    %9 = arith.addf %7, %8 : vector<1x128xf32>
    %10 = math.rsqrt %9 : vector<1x128xf32>
    %c0_5 = arith.constant 0 : index
    %c0_6 = arith.constant 0 : index
    %11 = vector.load %arg4[%c0_5, %c0_6] : memref<1x128xf32, #tpu.memory_space<vmem>>, vector<1x128xf32>
    %12 = arith.mulf %10, %11 : vector<1x128xf32>
    %c0_7 = arith.constant 0 : index
    %c0_8 = arith.constant 0 : index
    %13 = vector.load %arg5[%c0_7, %c0_8] : memref<1x128xf32, #tpu.memory_space<vmem>>, vector<1x128xf32>
    %14 = arith.mulf %2, %12 : vector<1x128xf32>
    %15 = arith.subf %13, %14 : vector<1x128xf32>
    %c0_9 = arith.constant 0 : index
    %c0_10 = arith.constant 0 : index
    %16 = vector.load %arg1[%c0_9, %c0_10] : memref<32x128xbf16, #tpu.memory_space<vmem>>, vector<32x128xbf16>
    %17 = arith.extf %16 : vector<32x128xbf16> to vector<32x128xf32>
    %18 = vector.broadcast %12 : vector<1x128xf32> to vector<32x128xf32>
    %19 = arith.mulf %17, %18 : vector<32x128xf32>
    %20 = vector.broadcast %15 : vector<1x128xf32> to vector<32x128xf32>
    %21 = arith.addf %19, %20 : vector<32x128xf32>
    %c0_11 = arith.constant 0 : index
    %c0_12 = arith.constant 0 : index
    %22 = vector.load %arg6[%c0_11, %c0_12] : memref<32x128xbf16, #tpu.memory_space<vmem>>, vector<32x128xbf16>
    %23 = arith.extf %22 : vector<32x128xbf16> to vector<32x128xf32>
    %24 = arith.addf %21, %23 : vector<32x128xf32>
    %25 = arith.truncf %24 : vector<32x128xf32> to vector<32x128xbf16>
    %c0_13 = arith.constant 0 : index
    %c0_14 = arith.constant 0 : index
    %26 = vector.load %arg7[%c0_13, %c0_14] : memref<32x128xbf16, #tpu.memory_space<vmem>>, vector<32x128xbf16>
    tpu.vector_store %arg7[%c0_13, %c0_14], %25 {strides = array<i32>} : memref<32x128xbf16, #tpu.memory_space<vmem>>, vector<32x128xbf16>,
    return
  }
  func.func @transform_0(%arg0: i32) -> (i32, i32) {
    %c0_i32 = arith.constant 0 : i32
    %c0_i32_0 = arith.constant 0 : i32
    return %arg0, %c0_i32 : i32, i32
  }
  func.func @transform_1(%arg0: i32) -> (i32, i32) {
    %c0_i32 = arith.constant 0 : i32
    %c0_i32_0 = arith.constant 0 : i32
    %c0_i32_1 = arith.constant 0 : i32
    return %c0_i32, %c0_i32_0 : i32, i32
  }
  func.func @transform_2(%arg0: i32) -> (i32, i32) {
    %c0_i32 = arith.constant 0 : i32
    %c0_i32_0 = arith.constant 0 : i32
    %c0_i32_1 = arith.constant 0 : i32
    return %c0_i32, %c0_i32_0 : i32, i32
  }
  func.func @transform_3(%arg0: i32) -> (i32, i32) {
    %c0_i32 = arith.constant 0 : i32
    %c0_i32_0 = arith.constant 0 : i32
    %c0_i32_1 = arith.constant 0 : i32
    return %c0_i32, %c0_i32_0 : i32, i32
  }
  func.func @transform_4(%arg0: i32) -> (i32, i32) {
    %c0_i32 = arith.constant 0 : i32
    %c0_i32_0 = arith.constant 0 : i32
    %c0_i32_1 = arith.constant 0 : i32
    return %c0_i32, %c0_i32_0 : i32, i32
  }
  func.func @transform_5(%arg0: i32) -> (i32, i32) {
    %c0_i32 = arith.constant 0 : i32
    %c0_i32_0 = arith.constant 0 : i32
    return %arg0, %c0_i32 : i32, i32
  }
  func.func @transform_6(%arg0: i32) -> (i32, i32) {
    %c0_i32 = arith.constant 0 : i32
    %c0_i32_0 = arith.constant 0 : i32
    return %arg0, %c0_i32 : i32, i32
  }
}

module attributes {stable_mosaic.version = 11 : i64} {
  func.func @_bn_apply_kernel(%arg0: i32, %arg1: memref<32x128xbf16, #tpu.memory_space<vmem>>, %arg2: memref<1x128xf32, #tpu.memory_space<vmem>>, %arg3: memref<1x128xf32, #tpu.memory_space<vmem>>, %arg4: memref<1x128xf32, #tpu.memory_space<vmem>>, %arg5: memref<1x128xf32, #tpu.memory_space<vmem>>, %arg6: memref<32x128xbf16, #tpu.memory_space<vmem>>, %arg7: memref<32x128xbf16, #tpu.memory_space<vmem>>) attributes {dimension_semantics = [#tpu.dimension_semantics<parallel>], iteration_bounds = array<i64: 1>, scalar_prefetch = 0 : i64, scratch_operands = 0 : i64, tpu.core_type = #tpu.core_type<tc>, window_params = [{transform_indices = @transform_0, window_bounds = array<i64: 32, 128>}, {pipeline_mode = #tpu.pipeline_mode<synchronous>, transform_indices = @transform_1, window_bounds = array<i64: 1, 128>}, {pipeline_mode = #tpu.pipeline_mode<synchronous>, transform_indices = @transform_2, window_bounds = array<i64: 1, 128>}, {pipeline_mode = #tpu.pipeline_mode<synchronous>, transform_indices = @transform_3, window_bounds = array<i64: 1, 128>}, {pipeline_mode = #tpu.pipeline_mode<synchronous>, transform_indices = @transform_4, window_bounds = array<i64: 1, 128>}, {transform_indices = @transform_5, window_bounds = array<i64: 32, 128>}, {transform_indices = @transform_6, window_bounds = array<i64: 32, 128>}]} {
    %c0 = arith.constant 0 : index
    %c0_0 = arith.constant 0 : index
    %0 = vector.load %arg2[%c0, %c0_0] : memref<1x128xf32, #tpu.memory_space<vmem>>, vector<1x128xf32>
    %cst = arith.constant 3.125000e-02 : f32
    %1 = vector.broadcast %cst : f32 to vector<1x128xf32>
    %2 = arith.mulf %0, %1 : vector<1x128xf32>
    %c0_1 = arith.constant 0 : index
    %c0_2 = arith.constant 0 : index
    %3 = vector.load %arg3[%c0_1, %c0_2] : memref<1x128xf32, #tpu.memory_space<vmem>>, vector<1x128xf32>
    %cst_3 = arith.constant 3.125000e-02 : f32
    %4 = vector.broadcast %cst_3 : f32 to vector<1x128xf32>
    %5 = arith.mulf %3, %4 : vector<1x128xf32>
    %6 = arith.mulf %2, %2 : vector<1x128xf32>
    %7 = arith.subf %5, %6 : vector<1x128xf32>
    %cst_4 = arith.constant 9.99999974E-6 : f32
    %8 = vector.broadcast %cst_4 : f32 to vector<1x128xf32>
    %9 = arith.addf %7, %8 : vector<1x128xf32>
    %10 = math.rsqrt %9 : vector<1x128xf32>
    %c0_5 = arith.constant 0 : index
    %c0_6 = arith.constant 0 : index
    %11 = vector.load %arg4[%c0_5, %c0_6] : memref<1x128xf32, #tpu.memory_space<vmem>>, vector<1x128xf32>
    %12 = arith.mulf %10, %11 : vector<1x128xf32>
    %c0_7 = arith.constant 0 : index
    %c0_8 = arith.constant 0 : index
    %13 = vector.load %arg5[%c0_7, %c0_8] : memref<1x128xf32, #tpu.memory_space<vmem>>, vector<1x128xf32>
    %14 = arith.mulf %2, %12 : vector<1x128xf32>
    %15 = arith.subf %13, %14 : vector<1x128xf32>
    %c0_9 = arith.constant 0 : index
    %c0_10 = arith.constant 0 : index
    %16 = vector.load %arg1[%c0_9, %c0_10] : memref<32x128xbf16, #tpu.memory_space<vmem>>, vector<32x128xbf16>
    %17 = arith.extf %16 : vector<32x128xbf16> to vector<32x128xf32>
    %18 = vector.broadcast %12 : vector<1x128xf32> to vector<32x128xf32>
    %19 = arith.mulf %17, %18 : vector<32x128xf32>
    %20 = vector.broadcast %15 : vector<1x128xf32> to vector<32x128xf32>
    %21 = arith.addf %19, %20 : vector<32x128xf32>
    %c0_11 = arith.constant 0 : index
    %c0_12 = arith.constant 0 : index
    %22 = vector.load %arg6[%c0_11, %c0_12] : memref<32x128xbf16, #tpu.memory_space<vmem>>, vector<32x128xbf16>
    %23 = arith.extf %22 : vector<32x128xbf16> to vector<32x128xf32>
    %24 = arith.addf %21, %23 : vector<32x128xf32>
    %cst_13 = arith.constant 0.000000e+00 : f32
    %25 = vector.broadcast %cst_13 : f32 to vector<32x128xf32>
    %26 = arith.maximumf %24, %25 : vector<32x128xf32>
    %27 = arith.truncf %26 : vector<32x128xf32> to vector<32x128xbf16>
    %c0_14 = arith.constant 0 : index
    %c0_15 = arith.constant 0 : index
    %28 = vector.load %arg7[%c0_14, %c0_15] : memref<32x128xbf16, #tpu.memory_space<vmem>>, vector<32x128xbf16>
    tpu.vector_store %arg7[%c0_14, %c0_15], %27 {strides = array<i32>} : memref<32x128xbf16, #tpu.memory_space<vmem>>, vector<32x128xbf16>,
    return
  }
  func.func @transform_0(%arg0: i32) -> (i32, i32) {
    %c0_i32 = arith.constant 0 : i32
    %c0_i32_0 = arith.constant 0 : i32
    return %arg0, %c0_i32 : i32, i32
  }
  func.func @transform_1(%arg0: i32) -> (i32, i32) {
    %c0_i32 = arith.constant 0 : i32
    %c0_i32_0 = arith.constant 0 : i32
    %c0_i32_1 = arith.constant 0 : i32
    return %c0_i32, %c0_i32_0 : i32, i32
  }
  func.func @transform_2(%arg0: i32) -> (i32, i32) {
    %c0_i32 = arith.constant 0 : i32
    %c0_i32_0 = arith.constant 0 : i32
    %c0_i32_1 = arith.constant 0 : i32
    return %c0_i32, %c0_i32_0 : i32, i32
  }
  func.func @transform_3(%arg0: i32) -> (i32, i32) {
    %c0_i32 = arith.constant 0 : i32
    %c0_i32_0 = arith.constant 0 : i32
    %c0_i32_1 = arith.constant 0 : i32
    return %c0_i32, %c0_i32_0 : i32, i32
  }
  func.func @transform_4(%arg0: i32) -> (i32, i32) {
    %c0_i32 = arith.constant 0 : i32
    %c0_i32_0 = arith.constant 0 : i32
    %c0_i32_1 = arith.constant 0 : i32
    return %c0_i32, %c0_i32_0 : i32, i32
  }
  func.func @transform_5(%arg0: i32) -> (i32, i32) {
    %c0_i32 = arith.constant 0 : i32
    %c0_i32_0 = arith.constant 0 : i32
    return %arg0, %c0_i32 : i32, i32
  }
  func.func @transform_6(%arg0: i32) -> (i32, i32) {
    %c0_i32 = arith.constant 0 : i32
    %c0_i32_0 = arith.constant 0 : i32
    return %arg0, %c0_i32 : i32, i32
  }
}

module attributes {stable_mosaic.version = 11 : i64} {
  func.func @_vq_kernel(%arg0: i32, %arg1: memref<32x128xbf16, #tpu.memory_space<vmem>>, %arg2: memref<128x512xbf16, #tpu.memory_space<vmem>>, %arg3: memref<1x512xf32, #tpu.memory_space<vmem>>, %arg4: memref<512x128xbf16, #tpu.memory_space<vmem>>, %arg5: memref<32x128xbf16, #tpu.memory_space<vmem>>, %arg6: memref<1x128xf32, #tpu.memory_space<vmem>>, %arg7: memref<1x128xf32, #tpu.memory_space<vmem>>) attributes {dimension_semantics = [#tpu.dimension_semantics<arbitrary>], iteration_bounds = array<i64: 1>, scalar_prefetch = 0 : i64, scratch_operands = 1 : i64, tpu.core_type = #tpu.core_type<tc>, window_params = [{transform_indices = @transform_0, window_bounds = array<i64: 32, 128>}, {pipeline_mode = #tpu.pipeline_mode<synchronous>, transform_indices = @transform_1, window_bounds = array<i64: 128, 512>}, {pipeline_mode = #tpu.pipeline_mode<synchronous>, transform_indices = @transform_2, window_bounds = array<i64: 1, 512>}, {pipeline_mode = #tpu.pipeline_mode<synchronous>, transform_indices = @transform_3, window_bounds = array<i64: 512, 128>}, {transform_indices = @transform_4, window_bounds = array<i64: 32, 128>}, {pipeline_mode = #tpu.pipeline_mode<synchronous>, transform_indices = @transform_5, window_bounds = array<i64: 1, 128>}]} {
    %c0_i32 = arith.constant 0 : i32
    %0 = arith.cmpi eq, %arg0, %c0_i32 : i32
    %1 = arith.extui %0 : i1 to i32
    %c0_i32_0 = arith.constant 0 : i32
    %2 = arith.cmpi ne, %1, %c0_i32_0 : i32
    scf.if %2 {
      %cst_26 = arith.constant 0.000000e+00 : f32
      %61 = vector.broadcast %cst_26 : f32 to vector<1x128xf32>
      %c0_27 = arith.constant 0 : index
      %c0_28 = arith.constant 0 : index
      %62 = vector.load %arg7[%c0_27, %c0_28] : memref<1x128xf32, #tpu.memory_space<vmem>>, vector<1x128xf32>
      tpu.vector_store %arg7[%c0_27, %c0_28], %61 {strides = array<i32>} : memref<1x128xf32, #tpu.memory_space<vmem>>, vector<1x128xf32>,
    } else {
    }
    %c0 = arith.constant 0 : index
    %c0_1 = arith.constant 0 : index
    %3 = vector.load %arg1[%c0, %c0_1] : memref<32x128xbf16, #tpu.memory_space<vmem>>, vector<32x128xbf16>
    %4 = arith.extf %3 : vector<32x128xbf16> to vector<32x128xf32>
    %5 = arith.mulf %4, %4 : vector<32x128xf32>
    %cst = arith.constant dense<0.000000e+00> : vector<32xf32>
    %6 = vector.multi_reduction <add>, %5, %cst [1] : vector<32x128xf32> to vector<32xf32>
    %7 = vector.shape_cast %6 : vector<32xf32> to vector<32x1xf32>
    %c0_2 = arith.constant 0 : index
    %c0_3 = arith.constant 0 : index
    %8 = vector.load %arg3[%c0_2, %c0_3] : memref<1x512xf32, #tpu.memory_space<vmem>>, vector<1x512xf32>
    %9 = vector.broadcast %7 : vector<32x1xf32> to vector<32x512xf32>
    %10 = vector.broadcast %8 : vector<1x512xf32> to vector<32x512xf32>
    %11 = arith.addf %9, %10 : vector<32x512xf32>
    %c0_4 = arith.constant 0 : index
    %c0_5 = arith.constant 0 : index
    %12 = vector.load %arg2[%c0_4, %c0_5] : memref<128x512xbf16, #tpu.memory_space<vmem>>, vector<128x512xbf16>
    %cst_6 = arith.constant dense<0.000000e+00> : vector<32x512xf32>
    %13 = tpu.matmul %3, %12, %cst_6 {dimension_numbers = #tpu.dot_dimension_numbers<[1], [0], [0], [1], [0, 0, 1, 1], [], []>} : vector<32x128xbf16>, vector<128x512xbf16>, vector<32x512xf32> -> vector<32x512xf32>
    %cst_7 = arith.constant 2.000000e+00 : f32
    %14 = vector.broadcast %cst_7 : f32 to vector<32x512xf32>
    %15 = arith.mulf %14, %13 : vector<32x512xf32>
    %16 = arith.subf %11, %15 : vector<32x512xf32>
    %17 = tpu.iota {dimensions = array<i32: 1>} : vector<32x512xi32>
    %cst_8 = arith.constant dense<0x7F800000> : vector<32xf32>
    %18 = vector.multi_reduction <minimumf>, %16, %cst_8 [1] : vector<32x512xf32> to vector<32xf32>
    %19 = vector.shape_cast %18 : vector<32xf32> to vector<32x1xf32>
    %20 = vector.broadcast %19 : vector<32x1xf32> to vector<32x512xf32>
    %21 = arith.cmpf oeq, %16, %20 : vector<32x512xf32>
    %c512_i32 = arith.constant 512 : i32
    %22 = vector.broadcast %c512_i32 : i32 to vector<32x512xi32>
    %23 = arith.select %21, %17, %22 : vector<32x512xi1>, vector<32x512xi32>
    %cst_9 = arith.constant dense<2147483647> : vector<32xi32>
    %24 = vector.multi_reduction <minsi>, %23, %cst_9 [1] : vector<32x512xi32> to vector<32xi32>
    %25 = vector.shape_cast %24 : vector<32xi32> to vector<32x1xi32>
    %26 = vector.broadcast %25 : vector<32x1xi32> to vector<32x512xi32>
    %27 = arith.cmpi eq, %17, %26 : vector<32x512xi32>
    %28 = arith.extui %27 : vector<32x512xi1> to vector<32x512xi32>
    %29 = arith.sitofp %28 : vector<32x512xi32> to vector<32x512xf32>
    %30 = arith.truncf %29 : vector<32x512xf32> to vector<32x512xbf16>
    %c0_10 = arith.constant 0 : index
    %c0_11 = arith.constant 0 : index
    %31 = vector.load %arg4[%c0_10, %c0_11] : memref<512x128xbf16, #tpu.memory_space<vmem>>, vector<512x128xbf16>
    %cst_12 = arith.constant dense<0.000000e+00> : vector<32x128xf32>
    %32 = tpu.matmul %30, %31, %cst_12 {dimension_numbers = #tpu.dot_dimension_numbers<[1], [0], [0], [1], [0, 0, 1, 1], [], []>} : vector<32x512xbf16>, vector<512x128xbf16>, vector<32x128xf32> -> vector<32x128xf32>
    %c32_i32 = arith.constant 32 : i32
    %33 = arith.muli %arg0, %c32_i32 : i32
    %34 = tpu.iota {dimensions = array<i32: 0>} : vector<32x1xi32>
    %35 = vector.broadcast %33 : i32 to vector<32x1xi32>
    %36 = arith.addi %35, %34 : vector<32x1xi32>
    %c32_i32_13 = arith.constant 32 : i32
    %37 = vector.broadcast %c32_i32_13 : i32 to vector<32x1xi32>
    %38 = arith.cmpi slt, %36, %37 : vector<32x1xi32>
    %cst_14 = arith.constant 0.000000e+00 : f32
    %39 = vector.shape_cast %38 : vector<32x1xi1> to vector<32x1xi1>
    %40 = vector.broadcast %39 : vector<32x1xi1> to vector<32x128xi1>
    %41 = vector.broadcast %cst_14 : f32 to vector<32x128xf32>
    %42 = arith.select %40, %32, %41 : vector<32x128xi1>, vector<32x128xf32>
    %43 = arith.truncf %42 : vector<32x128xf32> to vector<32x128xbf16>
    %c0_15 = arith.constant 0 : index
    %c0_16 = arith.constant 0 : index
    %44 = vector.load %arg5[%c0_15, %c0_16] : memref<32x128xbf16, #tpu.memory_space<vmem>>, vector<32x128xbf16>
    tpu.vector_store %arg5[%c0_15, %c0_16], %43 {strides = array<i32>} : memref<32x128xbf16, #tpu.memory_space<vmem>>, vector<32x128xbf16>,
    %c32_i32_17 = arith.constant 32 : i32
    %45 = vector.broadcast %c32_i32_17 : i32 to vector<32x1xi32>
    %46 = arith.cmpi slt, %36, %45 : vector<32x1xi32>
    %47 = arith.subf %42, %4 : vector<32x128xf32>
    %cst_18 = arith.constant 0.000000e+00 : f32
    %48 = vector.shape_cast %46 : vector<32x1xi1> to vector<32x1xi1>
    %49 = vector.broadcast %48 : vector<32x1xi1> to vector<32x128xi1>
    %50 = vector.broadcast %cst_18 : f32 to vector<32x128xf32>
    %51 = arith.select %49, %47, %50 : vector<32x128xi1>, vector<32x128xf32>
    %c0_19 = arith.constant 0 : index
    %c0_20 = arith.constant 0 : index
    %52 = vector.load %arg7[%c0_19, %c0_20] : memref<1x128xf32, #tpu.memory_space<vmem>>, vector<1x128xf32>
    %53 = arith.mulf %51, %51 : vector<32x128xf32>
    %cst_21 = arith.constant dense<0.000000e+00> : vector<128xf32>
    %54 = vector.multi_reduction <add>, %53, %cst_21 [0] : vector<32x128xf32> to vector<128xf32>
    %55 = vector.shape_cast %54 : vector<128xf32> to vector<1x128xf32>
    %56 = arith.addf %52, %55 : vector<1x128xf32>
    %c0_22 = arith.constant 0 : index
    %c0_23 = arith.constant 0 : index
    %57 = vector.load %arg7[%c0_22, %c0_23] : memref<1x128xf32, #tpu.memory_space<vmem>>, vector<1x128xf32>
    tpu.vector_store %arg7[%c0_22, %c0_23], %56 {strides = array<i32>} : memref<1x128xf32, #tpu.memory_space<vmem>>, vector<1x128xf32>,
    %c0_i32_24 = arith.constant 0 : i32
    %58 = arith.cmpi eq, %arg0, %c0_i32_24 : i32
    %59 = arith.extui %58 : i1 to i32
    %c0_i32_25 = arith.constant 0 : i32
    %60 = arith.cmpi ne, %59, %c0_i32_25 : i32
    scf.if %60 {
      %c0_26 = arith.constant 0 : index
      %c0_27 = arith.constant 0 : index
      %61 = vector.load %arg7[%c0_26, %c0_27] : memref<1x128xf32, #tpu.memory_space<vmem>>, vector<1x128xf32>
      %cst_28 = arith.constant dense<0.000000e+00> : vector<1xf32>
      %62 = vector.multi_reduction <add>, %61, %cst_28 [1] : vector<1x128xf32> to vector<1xf32>
      %63 = vector.shape_cast %62 : vector<1xf32> to vector<1x1xf32>
      %cst_29 = arith.constant 0.01953125 : f32
      %64 = vector.broadcast %cst_29 : f32 to vector<1x1xf32>
      %65 = arith.mulf %63, %64 : vector<1x1xf32>
      %66 = vector.shape_cast %65 : vector<1x1xf32> to vector<1x1xf32>
      %67 = vector.broadcast %66 : vector<1x1xf32> to vector<1x128xf32>
      %c0_30 = arith.constant 0 : index
      %c0_31 = arith.constant 0 : index
      %68 = vector.load %arg6[%c0_30, %c0_31] : memref<1x128xf32, #tpu.memory_space<vmem>>, vector<1x128xf32>
      tpu.vector_store %arg6[%c0_30, %c0_31], %67 {strides = array<i32>} : memref<1x128xf32, #tpu.memory_space<vmem>>, vector<1x128xf32>,
    } else {
    }
    return
  }
  func.func @transform_0(%arg0: i32) -> (i32, i32) {
    %c0_i32 = arith.constant 0 : i32
    %c0_i32_0 = arith.constant 0 : i32
    return %arg0, %c0_i32 : i32, i32
  }
  func.func @transform_1(%arg0: i32) -> (i32, i32) {
    %c0_i32 = arith.constant 0 : i32
    %c0_i32_0 = arith.constant 0 : i32
    %c0_i32_1 = arith.constant 0 : i32
    return %c0_i32, %c0_i32_0 : i32, i32
  }
  func.func @transform_2(%arg0: i32) -> (i32, i32) {
    %c0_i32 = arith.constant 0 : i32
    %c0_i32_0 = arith.constant 0 : i32
    %c0_i32_1 = arith.constant 0 : i32
    return %c0_i32, %c0_i32_0 : i32, i32
  }
  func.func @transform_3(%arg0: i32) -> (i32, i32) {
    %c0_i32 = arith.constant 0 : i32
    %c0_i32_0 = arith.constant 0 : i32
    %c0_i32_1 = arith.constant 0 : i32
    return %c0_i32, %c0_i32_0 : i32, i32
  }
  func.func @transform_4(%arg0: i32) -> (i32, i32) {
    %c0_i32 = arith.constant 0 : i32
    %c0_i32_0 = arith.constant 0 : i32
    return %arg0, %c0_i32 : i32, i32
  }
  func.func @transform_5(%arg0: i32) -> (i32, i32) {
    %c0_i32 = arith.constant 0 : i32
    %c0_i32_0 = arith.constant 0 : i32
    %c0_i32_1 = arith.constant 0 : i32
    return %c0_i32, %c0_i32_0 : i32, i32
  }
}

module attributes {stable_mosaic.version = 11 : i64} {
  func.func @_gemm_kernel(%arg0: i32, %arg1: i32, %arg2: i32, %arg3: memref<256x128xbf16, #tpu.memory_space<vmem>>, %arg4: memref<128x128xbf16, #tpu.memory_space<vmem>>, %arg5: memref<1x128xf32, #tpu.memory_space<vmem>>, %arg6: memref<256x128xbf16, #tpu.memory_space<vmem>>, %arg7: memref<256x128xf32, #tpu.memory_space<vmem>>) attributes {dimension_semantics = [#tpu.dimension_semantics<parallel>, #tpu.dimension_semantics<parallel>, #tpu.dimension_semantics<arbitrary>], iteration_bounds = array<i64: 1, 2, 1>, scalar_prefetch = 0 : i64, scratch_operands = 1 : i64, tpu.core_type = #tpu.core_type<tc>, window_params = [{transform_indices = @transform_0, window_bounds = array<i64: 256, 128>}, {transform_indices = @transform_1, window_bounds = array<i64: 128, 128>}, {transform_indices = @transform_2, window_bounds = array<i64: 1, 128>}, {transform_indices = @transform_3, window_bounds = array<i64: 256, 128>}]} {
    %c0_i32 = arith.constant 0 : i32
    %0 = arith.cmpi eq, %arg2, %c0_i32 : i32
    %1 = arith.extui %0 : i1 to i32
    %c0_i32_0 = arith.constant 0 : i32
    %2 = arith.cmpi ne, %1, %c0_i32_0 : i32
    scf.if %2 {
      %cst_10 = arith.constant 0.000000e+00 : f32
      %12 = vector.broadcast %cst_10 : f32 to vector<256x128xf32>
      %c0_11 = arith.constant 0 : index
      %c0_12 = arith.constant 0 : index
      %13 = vector.load %arg7[%c0_11, %c0_12] : memref<256x128xf32, #tpu.memory_space<vmem>>, vector<256x128xf32>
      tpu.vector_store %arg7[%c0_11, %c0_12], %12 {strides = array<i32>} : memref<256x128xf32, #tpu.memory_space<vmem>>, vector<256x128xf32>,
    } else {
    }
    %c0 = arith.constant 0 : index
    %c0_1 = arith.constant 0 : index
    %3 = vector.load %arg3[%c0, %c0_1] : memref<256x128xbf16, #tpu.memory_space<vmem>>, vector<256x128xbf16>
    %c0_2 = arith.constant 0 : index
    %c0_3 = arith.constant 0 : index
    %4 = vector.load %arg7[%c0_2, %c0_3] : memref<256x128xf32, #tpu.memory_space<vmem>>, vector<256x128xf32>
    %c0_4 = arith.constant 0 : index
    %c0_5 = arith.constant 0 : index
    %5 = vector.load %arg4[%c0_4, %c0_5] : memref<128x128xbf16, #tpu.memory_space<vmem>>, vector<128x128xbf16>
    %cst = arith.constant dense<0.000000e+00> : vector<256x128xf32>
    %6 = tpu.matmul %3, %5, %cst {dimension_numbers = #tpu.dot_dimension_numbers<[1], [0], [0], [1], [0, 0, 1, 1], [], []>} : vector<256x128xbf16>, vector<128x128xbf16>, vector<256x128xf32> -> vector<256x128xf32>
    %7 = arith.addf %4, %6 : vector<256x128xf32>
    %c0_6 = arith.constant 0 : index
    %c0_7 = arith.constant 0 : index
    %8 = vector.load %arg7[%c0_6, %c0_7] : memref<256x128xf32, #tpu.memory_space<vmem>>, vector<256x128xf32>
    tpu.vector_store %arg7[%c0_6, %c0_7], %7 {strides = array<i32>} : memref<256x128xf32, #tpu.memory_space<vmem>>, vector<256x128xf32>,
    %c0_i32_8 = arith.constant 0 : i32
    %9 = arith.cmpi eq, %arg2, %c0_i32_8 : i32
    %10 = arith.extui %9 : i1 to i32
    %c0_i32_9 = arith.constant 0 : i32
    %11 = arith.cmpi ne, %10, %c0_i32_9 : i32
    scf.if %11 {
      %c0_10 = arith.constant 0 : index
      %c0_11 = arith.constant 0 : index
      %12 = vector.load %arg7[%c0_10, %c0_11] : memref<256x128xf32, #tpu.memory_space<vmem>>, vector<256x128xf32>
      %c0_12 = arith.constant 0 : index
      %c0_13 = arith.constant 0 : index
      %13 = vector.load %arg5[%c0_12, %c0_13] : memref<1x128xf32, #tpu.memory_space<vmem>>, vector<1x128xf32>
      %14 = vector.broadcast %13 : vector<1x128xf32> to vector<256x128xf32>
      %15 = arith.addf %12, %14 : vector<256x128xf32>
      %16 = math.tanh %15 : vector<256x128xf32>
      %17 = arith.truncf %16 : vector<256x128xf32> to vector<256x128xbf16>
      %c0_14 = arith.constant 0 : index
      %c0_15 = arith.constant 0 : index
      %18 = vector.load %arg6[%c0_14, %c0_15] : memref<256x128xbf16, #tpu.memory_space<vmem>>, vector<256x128xbf16>
      tpu.vector_store %arg6[%c0_14, %c0_15], %17 {strides = array<i32>} : memref<256x128xbf16, #tpu.memory_space<vmem>>, vector<256x128xbf16>,
    } else {
    }
    return
  }
  func.func @transform_0(%arg0: i32, %arg1: i32, %arg2: i32) -> (i32, i32) {
    %c0_i32 = arith.constant 0 : i32
    return %arg1, %arg2 : i32, i32
  }
  func.func @transform_1(%arg0: i32, %arg1: i32, %arg2: i32) -> (i32, i32) {
    %c0_i32 = arith.constant 0 : i32
    return %arg2, %arg0 : i32, i32
  }
  func.func @transform_2(%arg0: i32, %arg1: i32, %arg2: i32) -> (i32, i32) {
    %c0_i32 = arith.constant 0 : i32
    %c0_i32_0 = arith.constant 0 : i32
    return %c0_i32, %arg0 : i32, i32
  }
  func.func @transform_3(%arg0: i32, %arg1: i32, %arg2: i32) -> (i32, i32) {
    %c0_i32 = arith.constant 0 : i32
    return %arg1, %arg0 : i32, i32
  }
}

</mosaic_0001>

<bundles_post_ra>
// kernel: vqvae_forward.28
= control target key start
LH: loop header
LB: loop body
LE: loop exit
PB: predicated region body
PF: predicated region fallthrough
CT: control target
= control target key end

     0   :  { %v66_v7 = vlaneseq  ;;  %s423_s1 = inlined_call_operand.vmem [shape: f32[1,128], index: 1, kind: input, shape index: {}]   ;;  %s424_s2 = inlined_call_operand.vmem [shape: f32[1,128], index: 2, kind: input, shape index: {}]   ;;  %s425_s0 = inlined_call_operand.vmem [shape: bf16[128,128], index: 0, kind: input, shape index: {}]   ;;  %s426_s3 = inlined_call_operand.vmem [shape: f32[1,128], index: 3, kind: input, shape index: {}]   ;;  %s427_s4 = inlined_call_operand.vmem [shape: f32[1,128], index: 4, kind: input, shape index: {}]   ;;  %s428_s5 = inlined_call_operand.vmem [shape: bf16[128,128], index: 5, kind: output, shape index: {}]  }
   0x1   :  { %v20_v0 = vld [vmem:[%s423_s1] sm:$0x1]  ;;  %v313_v10 = vld [vmem:[%s425_s0 + $0x8] sm:$0xff]   ;;  %v314_v12 = vld [vmem:[%s425_s0 + $0x10] sm:$0xff]  }
   0x2   :  { %v22_v1 = vld [vmem:[%s424_s2] sm:$0x1]  ;;  %v21_v2 = vmul.f32 0.0078125, %v20_v0  ;;  %v67_v8 = vshrl.u32 %v66_v7, 7  ;;  %v315_v14 = vld [vmem:[%s425_s0 + $0x18] sm:$0xff]   ;;  %v247_v19 = vunpack.c.l.bf16 %v313_v10  ;;  %v317_v20 = vld [vmem:[%s425_s0 + $0x28] sm:$0xff]   ;;  %v248_v22 = vunpack.c.h.bf16 %v313_v10 }
   0x3   :  { %v23_v3 = vmul.f32 0.0078125, %v22_v1  ;;  %v242_v9 = vld [vmem:[%s425_s0] sm:$0xff]   ;;  %v251_v23 = vunpack.c.l.bf16 %v314_v12  ;;  %v252_v24 = vunpack.c.h.bf16 %v314_v12  ;;  %v318_v25 = vld [vmem:[%s425_s0 + $0x30] sm:$0xff]   ;;  %v392_v26 = vld [vmem:[%s425_s0 + $0x38] sm:$0xff]   ;;  %v255_v28 = vunpack.c.l.bf16 %v315_v14 }
   0x4   :  { %v24_v4 = vmul.f32 %v21_v2, %v21_v2  ;;  %v28_v11 = vld [vmem:[%s426_s3] sm:$0x1]  ;;  %v68_v13 = vsub.s32 0, %v67_v8  ;;  %v243_v17 = vunpack.c.l.bf16 %v242_v9  ;;  %v244_v18 = vunpack.c.h.bf16 %v242_v9 }
   0x5   :  { %v316_v15 = vld [vmem:[%s425_s0 + $0x20] sm:$0xff]   ;;  %v256_v29 = vunpack.c.h.bf16 %v315_v14  ;;  %v263_v34 = vunpack.c.l.bf16 %v317_v20  ;;  %v264_v35 = vunpack.c.h.bf16 %v317_v20  ;;  %v267_v36 = vunpack.c.l.bf16 %v318_v25 }
   0x6   :  { %v25_v5 = vsub.f32 %v23_v3, %v24_v4  ;;  %v30_v27 = vld [vmem:[%s427_s4] sm:$0x1]  ;;  %v259_v30 = vunpack.c.l.bf16 %v316_v15  ;;  %v260_v31 = vunpack.c.h.bf16 %v316_v15  ;;  %v268_v37 = vunpack.c.h.bf16 %v318_v25 }
   0x7   :  { %v271_v38 = vunpack.c.l.bf16 %v392_v26  ;;  %v272_v39 = vunpack.c.h.bf16 %v392_v26 }
   0x8   :  { %v26_v6 = vadd.f32 1e-05, %v25_v5 }
   0xa   :  { %327 = vrsqrt.f32 %v26_v6 }
  0x14   :  { %v328_v16 = vpop.eup %327 }
  0x15   :  { %v29_v21 = vmul.f32 %v328_v16, %v28_v11 }
  0x17   :  { %v31_v32 = vmul.f32 %v29_v21, %v21_v2  ;;  %v69_v33 = vrot.slane %v29_v21, %v68_v13 }
  0x19   :  { %v32_v40 = vsub.f32 %v30_v27, %v31_v32  ;;  %v71_v41 = vmul.f32 %v243_v17, %v69_v33  ;;  %v72_v42 = vmul.f32 %v244_v18, %v69_v33  ;;  %v73_v43 = vmul.f32 %v247_v19, %v69_v33 }
  0x1a   :  { %v74_v44 = vmul.f32 %v248_v22, %v69_v33  ;;  %v75_v45 = vmul.f32 %v251_v23, %v69_v33  ;;  %v76_v46 = vmul.f32 %v252_v24, %v69_v33  ;;  %v77_v47 = vmul.f32 %v255_v28, %v69_v33 }
  0x1b   :  { %v91_v48 = vrot.slane %v32_v40, %v68_v13  ;;  %v78_v49 = vmul.f32 %v256_v29, %v69_v33  ;;  %v79_v50 = vmul.f32 %v259_v30, %v69_v33  ;;  %v80_v51 = vmul.f32 %v260_v31, %v69_v33 }
  0x1c   :  { %v81_v52 = vmul.f32 %v263_v34, %v69_v33  ;;  %v82_v53 = vmul.f32 %v264_v35, %v69_v33  ;;  %v83_v54 = vmul.f32 %v267_v36, %v69_v33  ;;  %v84_v55 = vmul.f32 %v268_v37, %v69_v33 }
  0x1d   :  { %v93_v56 = vadd.f32 %v91_v48, %v71_v41  ;;  %v94_v57 = vadd.f32 %v91_v48, %v72_v42  ;;  %v95_v58 = vadd.f32 %v91_v48, %v73_v43  ;;  %v96_v59 = vadd.f32 %v91_v48, %v74_v44 }
  0x1e   :  { %v97_v60 = vadd.f32 %v91_v48, %v75_v45  ;;  %v98_v61 = vadd.f32 %v91_v48, %v76_v46  ;;  %v99_v62 = vadd.f32 %v91_v48, %v77_v47  ;;  %v100_v63 = vadd.f32 %v91_v48, %v78_v49 }
  0x1f   :  { %v109_v0 = vmax.f32 %v93_v56, 0.0  ;;  %v110_v1 = vmax.f32 %v94_v57, 0.0  ;;  %v111_v2 = vmax.f32 %v95_v58, 0.0  ;;  %v112_v3 = vmax.f32 %v96_v59, 0.0 }
  0x20   :  { %v113_v4 = vmax.f32 %v97_v60, 0.0  ;;  %v114_v5 = vmax.f32 %v98_v61, 0.0  ;;  %v115_v6 = vmax.f32 %v99_v62, 0.0  ;;  %v116_v7 = vmax.f32 %v100_v63, 0.0 }
  0x21   :  { %v276_v8 = vpack.c.bf16 %v110_v1, %v109_v0  ;;  %v281_v9 = vpack.c.bf16 %v112_v3, %v111_v2  ;;  %v101_v10 = vadd.f32 %v91_v48, %v79_v50  ;;  %v102_v11 = vadd.f32 %v91_v48, %v80_v51 }
  0x22   :  { %v286_v12 = vpack.c.bf16 %v114_v5, %v113_v4  ;;  %v291_v13 = vpack.c.bf16 %v116_v7, %v115_v6  ;;  %v103_v14 = vadd.f32 %v91_v48, %v81_v52  ;;  %v104_v15 = vadd.f32 %v91_v48, %v82_v53 }
  0x23   :  { %277 = vst [vmem:[%s428_s5] sm:$0xff] %v276_v8   ;;  %320 = vst [vmem:[%s428_s5 + $0x8] sm:$0xff] %v281_v9   ;;  %v117_v16 = vmax.f32 %v101_v10, 0.0  ;;  %v118_v17 = vmax.f32 %v102_v11, 0.0  ;;  %v105_v18 = vadd.f32 %v91_v48, %v83_v54  ;;  %v106_v19 = vadd.f32 %v91_v48, %v84_v55 }
  0x24   :  { %321 = vst [vmem:[%s428_s5 + $0x10] sm:$0xff] %v286_v12   ;;  %322 = vst [vmem:[%s428_s5 + $0x18] sm:$0xff] %v291_v13   ;;  %v119_v20 = vmax.f32 %v103_v14, 0.0  ;;  %v120_v21 = vmax.f32 %v104_v15, 0.0  ;;  %v85_v22 = vmul.f32 %v271_v38, %v69_v33  ;;  %v86_v23 = vmul.f32 %v272_v39, %v69_v33 }
  0x25   :  { %v296_v24 = vpack.c.bf16 %v118_v17, %v117_v16  ;;  %v121_v25 = vmax.f32 %v105_v18, 0.0  ;;  %v122_v26 = vmax.f32 %v106_v19, 0.0 }
  0x26   :  { %v301_v27 = vpack.c.bf16 %v120_v21, %v119_v20  ;;  %v107_v28 = vadd.f32 %v91_v48, %v85_v22  ;;  %v108_v29 = vadd.f32 %v91_v48, %v86_v23 }
  0x27   :  { %323 = vst [vmem:[%s428_s5 + $0x20] sm:$0xff] %v296_v24   ;;  %v306_v30 = vpack.c.bf16 %v122_v26, %v121_v25 }
  0x28   :  { %324 = vst [vmem:[%s428_s5 + $0x28] sm:$0xff] %v301_v27   ;;  %v123_v31 = vmax.f32 %v107_v28, 0.0  ;;  %v124_v32 = vmax.f32 %v108_v29, 0.0 }
  0x29   :  { %325 = vst [vmem:[%s428_s5 + $0x30] sm:$0xff] %v306_v30  }
  0x2a   :  { %v311_v33 = vpack.c.bf16 %v124_v32, %v123_v31 }
  0x2c   :  { %326 = vst [vmem:[%s428_s5 + $0x38] sm:$0xff] %v311_v33  }

// kernel: vqvae_forward.27
= control target key start
LH: loop header
LB: loop body
LE: loop exit
PB: predicated region body
PF: predicated region fallthrough
CT: control target
= control target key end

     0   :  { %v693_v16 = vmov 0.0   ;;  %s835_s1 = inlined_call_operand.vmem [shape: bf16[128,128], index: 1, kind: input, shape index: {}]   ;;  %s836_s0 = inlined_call_operand.vmem [shape: bf16[128,128], index: 0, kind: input, shape index: {}]   ;;  %s837_s4 = inlined_call_operand.vmem [shape: f32[1,128], index: 4, kind: output, shape index: {1}]   ;;  %s838_s5 = inlined_call_operand.vmem [shape: f32[1,128], index: 5, kind: output, shape index: {2}]   ;;  %s839_s2 = inlined_call_operand.vmem [shape: f32[1,128], index: 2, kind: input, shape index: {}]   ;;  %s840_s3 = inlined_call_operand.vmem [shape: bf16[128,128], index: 3, kind: output, shape index: {0}]  }
   0x1   :  { %v677_v0 = vld [vmem:[%s835_s1] sm:$0xff]   ;;  %v678_v1 = vld [vmem:[%s835_s1 + $0x8] sm:$0xff]   ;;  %v679_v2 = vld [vmem:[%s835_s1 + $0x10] sm:$0xff]   ;;  %43 = vst [vmem:[%s837_s4] sm:$0x1] %v693_v16 }
   0x2   :  { %628 = vmatprep.subr.bf16.mxu0 %v677_v0  ;;  %660 = vmatprep.subr.bf16.mxu1 %v677_v0  ;;  %v680_v3 = vld [vmem:[%s835_s1 + $0x18] sm:$0xff]   ;;  %v685_v4 = vld [vmem:[%s836_s0] sm:$0xff]   ;;  %v682_v7 = vld [vmem:[%s835_s1 + $0x28] sm:$0xff]   ;;  %44 = vst [vmem:[%s838_s5] sm:$0x1] %v693_v16 }
   0x3   :  { %629 = vmatpush3.bf16.msra.mxu0 %v677_v0  ;;  %668 = vmatpush3.bf16.msra.mxu1 %v677_v0  ;;  %v681_v5 = vld [vmem:[%s835_s1 + $0x20] sm:$0xff]   ;;  %v683_v8 = vld [vmem:[%s835_s1 + $0x30] sm:$0xff]   ;;  %v684_v9 = vld [vmem:[%s835_s1 + $0x38] sm:$0xff]  }
   0x4   :  { %630 = vmatprep.subr.bf16.mxu0 %v678_v1  ;;  %661 = vmatprep.subr.bf16.mxu1 %v678_v1  ;;  %v689_v6 = vld [vmem:[%s836_s0 + $0x20] sm:$0xff]   ;;  %v686_v10 = vld [vmem:[%s836_s0 + $0x8] sm:$0xff]   ;;  %v687_v12 = vld [vmem:[%s836_s0 + $0x10] sm:$0xff]  }
   0x5   :  { %644 = vmatprep.mubr.bf16.mxu0 %v685_v4  ;;  %652 = vmatprep.mubr.bf16.mxu1 %v689_v6  ;;  %v690_v11 = vld [vmem:[%s836_s0 + $0x28] sm:$0xff]   ;;  %v691_v13 = vld [vmem:[%s836_s0 + $0x30] sm:$0xff]   ;;  %v688_v14 = vld [vmem:[%s836_s0 + $0x18] sm:$0xff]  }
   0x6   :  { %v692_v15 = vld [vmem:[%s836_s0 + $0x38] sm:$0xff]   ;;  %v532_v17 = vld [vmem:[%s839_s2] ss:$0 sm:$0xff] }
   0x7   :  { %631 = vmatpush3.bf16.msra.mxu0 %v678_v1  ;;  %669 = vmatpush3.bf16.msra.mxu1 %v678_v1 }
   0x8   :  { %632 = vmatprep.subr.bf16.mxu0 %v679_v2  ;;  %662 = vmatprep.subr.bf16.mxu1 %v679_v2 }
   0xb   :  { %633 = vmatpush3.bf16.msra.mxu0 %v679_v2  ;;  %670 = vmatpush3.bf16.msra.mxu1 %v679_v2 }
   0xc   :  { %634 = vmatprep.subr.bf16.mxu0 %v680_v3  ;;  %663 = vmatprep.subr.bf16.mxu1 %v680_v3 }
   0xf   :  { %635 = vmatpush3.bf16.msra.mxu0 %v680_v3  ;;  %671 = vmatpush3.bf16.msra.mxu1 %v680_v3 }
  0x10   :  { %636 = vmatprep.subr.bf16.mxu0 %v681_v5  ;;  %664 = vmatprep.subr.bf16.mxu1 %v681_v5 }
  0x13   :  { %637 = vmatpush3.bf16.msra.mxu0 %v681_v5  ;;  %672 = vmatpush3.bf16.msra.mxu1 %v681_v5 }
  0x14   :  { %638 = vmatprep.subr.bf16.mxu0 %v682_v7  ;;  %665 = vmatprep.subr.bf16.mxu1 %v682_v7 }
  0x17   :  { %639 = vmatpush3.bf16.msra.mxu0 %v682_v7  ;;  %673 = vmatpush3.bf16.msra.mxu1 %v682_v7 }
  0x18   :  { %640 = vmatprep.subr.bf16.mxu0 %v683_v8  ;;  %666 = vmatprep.subr.bf16.mxu1 %v683_v8 }
  0x1b   :  { %641 = vmatpush3.bf16.msra.mxu0 %v683_v8  ;;  %674 = vmatpush3.bf16.msra.mxu1 %v683_v8 }
  0x1c   :  { %642 = vmatprep.subr.bf16.mxu0 %v684_v9  ;;  %667 = vmatprep.subr.bf16.mxu1 %v684_v9 }
  0x1f   :  { %643 = vmatpush3.bf16.msra.mxu0 %v684_v9  ;;  %675 = vmatpush3.bf16.msra.mxu1 %v684_v9 }
  0x22   :  { %645 = vmatmul.mubr.bf16.vlgmr.msra.gmra.mrb[0].mxu0 %v686_v10  ;;  %653 = vmatmul.mubr.bf16.vlgmr.msra.gmra.mrb[0].mxu1 %v690_v11 }
  0x23   :  { %648 = vmatprep.mubr.bf16.mxu0 %v687_v12  ;;  %656 = vmatprep.mubr.bf16.mxu1 %v691_v13 }
  0x2a   :  { %649 = vmatmul.mubr.bf16.gmra.mrb[4].mxu0 %v688_v14  ;;  %657 = vmatmul.mubr.bf16.gmra.mrb[4].mxu1 %v692_v15 }
  0xf5   :  { %v646_v18 = vpop.f32.mrb[0].mxu0  ;;  %v654_v19 = vpop.f32.mrb[0].mxu1 }
  0xf6   :  { %v223_v20 = vpop.f32.mrb[1].mxu0  ;;  %v781_v21 = vadd.f32 %v654_v19, %v532_v17  ;;  %v255_v22 = vpop.f32.mrb[1].mxu1  ;;  %v346_v27 = vadd.f32 %v646_v18, %v532_v17 }
  0xf7   :  { %v344_v23 = vadd.f32 %v532_v17, %v223_v20  ;;  %v647_v24 = vpop.f32.mrb[2].mxu0  ;;  %v783_v25 = vadd.f32 %v532_v17, %v255_v22  ;;  %v655_v26 = vpop.f32.mrb[2].mxu1 }
  0xf8   :  { %v347_v28 = vadd.f32 %v647_v24, %v532_v17  ;;  %v226_v29 = vpop.f32.mrb[3].mxu0  ;;  %v785_v30 = vadd.f32 %v655_v26, %v532_v17  ;;  %v258_v31 = vpop.f32.mrb[3].mxu1  ;;  %v467_v41 = vmul.f32 %v346_v27, %v346_v27  ;;  %v475_v22 = vmul.f32 %v781_v21, %v781_v21 }
  0xf9   :  { %v345_v32 = vadd.f32 %v532_v17, %v226_v29  ;;  %v353_v33 = vadd.f32 %v532_v17, %v258_v31  ;;  %v465_v34 = vmul.f32 %v344_v23, %v344_v23  ;;  %v473_v15 = vmul.f32 %v783_v25, %v783_v25 }
  0xfa   :  { %v573_v35 = vpack.c.bf16 %v347_v28, %v346_v27  ;;  %v593_v36 = vpack.c.bf16 %v785_v30, %v781_v21  ;;  %v468_v49 = vmul.f32 %v347_v28, %v347_v28  ;;  %v476_v26 = vmul.f32 %v785_v30, %v785_v30 }
  0xfb   :  { %v568_v37 = vpack.c.bf16 %v345_v32, %v344_v23  ;;  %v441_v38 = vadd.f32 %v345_v32, %v344_v23  ;;  %v466_v39 = vmul.f32 %v345_v32, %v345_v32  ;;  %v588_v40 = vpack.c.bf16 %v353_v33, %v783_v25 }
  0xfc   :  { %605 = vst [vmem:[%s840_s3 + $0x8] sm:$0xff] %v573_v35   ;;  %609 = vst [vmem:[%s840_s3 + $0x28] sm:$0xff] %v593_v36   ;;  %v474_v20 = vmul.f32 %v353_v33, %v353_v33 }
  0xfd   :  { %569 = vst [vmem:[%s840_s3] sm:$0xff] %v568_v37   ;;  %v442_v42 = vadd.f32 %v441_v38, %v346_v27  ;;  %v481_v43 = vadd.f32 %v466_v39, %v465_v34  ;;  %v650_v44 = vpop.f32.mrb[4].mxu0  ;;  %608 = vst [vmem:[%s840_s3 + $0x20] sm:$0xff] %v588_v40   ;;  %v658_v45 = vpop.f32.mrb[4].mxu1 }
  0xfe   :  { %v239_v46 = vpop.f32.mrb[5].mxu0  ;;  %v358_v47 = vadd.f32 %v658_v45, %v532_v17  ;;  %v271_v48 = vpop.f32.mrb[5].mxu1  ;;  %v350_v55 = vadd.f32 %v650_v44, %v532_v17 }
  0xff   :  { %v482_v50 = vadd.f32 %v481_v43, %v467_v41  ;;  %v348_v51 = vadd.f32 %v532_v17, %v239_v46  ;;  %v443_v52 = vadd.f32 %v442_v42, %v347_v28  ;;  %v651_v53 = vpop.f32.mrb[6].mxu0  ;;  %v659_v54 = vpop.f32.mrb[6].mxu1  ;;  %v356_v1 = vadd.f32 %v532_v17, %v271_v48 }
 0x100   :  { %v351_v56 = vadd.f32 %v651_v53, %v532_v17  ;;  %v242_v57 = vpop.f32.mrb[7].mxu0  ;;  %v359_v58 = vadd.f32 %v659_v54, %v532_v17  ;;  %v274_v59 = vpop.f32.mrb[7].mxu1  ;;  %v471_v8 = vmul.f32 %v350_v55, %v350_v55  ;;  %v479_v36 = vmul.f32 %v358_v47, %v358_v47 }
 0x101   :  { %v444_v60 = vadd.f32 %v443_v52, %v348_v51  ;;  %v469_v61 = vmul.f32 %v348_v51, %v348_v51  ;;  %v483_v62 = vadd.f32 %v482_v50, %v468_v49  ;;  %v349_v63 = vadd.f32 %v532_v17, %v242_v57  ;;  %v440_v50 = vld [vmem:[%s837_s4] sm:$0x1] }
 0x102   :  { %v583_v0 = vpack.c.bf16 %v351_v56, %v350_v55  ;;  %v603_v2 = vpack.c.bf16 %v359_v58, %v358_v47  ;;  %v357_v7 = vadd.f32 %v532_v17, %v274_v59  ;;  %v472_v12 = vmul.f32 %v351_v56, %v351_v56  ;;  %v464_v52 = vld [vmem:[%s838_s5] sm:$0x1] }
 0x103   :  { %v484_v3 = vadd.f32 %v483_v62, %v469_v61  ;;  %v578_v4 = vpack.c.bf16 %v349_v63, %v348_v51  ;;  %v445_v5 = vadd.f32 %v444_v60, %v349_v63  ;;  %v470_v6 = vmul.f32 %v349_v63, %v349_v63 }
 0x104   :  { %607 = vst [vmem:[%s840_s3 + $0x18] sm:$0xff] %v583_v0   ;;  %611 = vst [vmem:[%s840_s3 + $0x38] sm:$0xff] %v603_v2   ;;  %v598_v11 = vpack.c.bf16 %v357_v7, %v356_v1  ;;  %v477_v29 = vmul.f32 %v356_v1, %v356_v1  ;;  %v478_v35 = vmul.f32 %v357_v7, %v357_v7 }
 0x105   :  { %606 = vst [vmem:[%s840_s3 + $0x10] sm:$0xff] %v578_v4   ;;  %v446_v9 = vadd.f32 %v445_v5, %v350_v55  ;;  %v485_v10 = vadd.f32 %v484_v3, %v470_v6  ;;  %v480_v38 = vmul.f32 %v359_v58, %v359_v58 }
 0x106   :  { %610 = vst [vmem:[%s840_s3 + $0x30] sm:$0xff] %v598_v11  }
 0x107   :  { %v486_v13 = vadd.f32 %v485_v10, %v471_v8  ;;  %v447_v14 = vadd.f32 %v446_v9, %v351_v56 }
 0x109   :  { %v448_v16 = vadd.f32 %v447_v14, %v783_v25  ;;  %v487_v17 = vadd.f32 %v486_v13, %v472_v12 }
 0x10b   :  { %v488_v18 = vadd.f32 %v487_v17, %v473_v15  ;;  %v449_v19 = vadd.f32 %v448_v16, %v353_v33 }
 0x10d   :  { %v450_v23 = vadd.f32 %v449_v19, %v781_v21  ;;  %v489_v24 = vadd.f32 %v488_v18, %v474_v20 }
 0x10f   :  { %v490_v27 = vadd.f32 %v489_v24, %v475_v22  ;;  %v451_v28 = vadd.f32 %v450_v23, %v785_v30 }
 0x111   :  { %v452_v31 = vadd.f32 %v451_v28, %v356_v1  ;;  %v491_v32 = vadd.f32 %v490_v27, %v476_v26 }
 0x113   :  { %v492_v25 = vadd.f32 %v491_v32, %v477_v29  ;;  %v453_v34 = vadd.f32 %v452_v31, %v357_v7 }
 0x115   :  { %v454_v33 = vadd.f32 %v453_v34, %v358_v47  ;;  %v493_v37 = vadd.f32 %v492_v25, %v478_v35 }
 0x117   :  { %v455_v39 = vadd.f32 %v454_v33, %v359_v58  ;;  %v494_v40 = vadd.f32 %v493_v37, %v479_v36 }
 0x119   :  { %v456_v21 = vrot.slane %v455_v39, 4  ;;  %v495_v41 = vadd.f32 %v494_v40, %v480_v38 }
 0x11b   :  { %v457_v42 = vadd.f32 %v456_v21, %v455_v39  ;;  %v496_v43 = vrot.slane %v495_v41, 4 }
 0x11d   :  { %v458_v44 = vrot.slane %v457_v42, 2  ;;  %v497_v45 = vadd.f32 %v496_v43, %v495_v41 }
 0x11f   :  { %v459_v46 = vadd.f32 %v458_v44, %v457_v42  ;;  %v498_v30 = vrot.slane %v497_v45, 2 }
 0x121   :  { %v460_v48 = vrot.slane %v459_v46, 1  ;;  %v499_v49 = vadd.f32 %v498_v30, %v497_v45 }
 0x123   :  { %v461_v51 = vadd.f32 %v460_v48, %v459_v46  ;;  %v500_v47 = vrot.slane %v499_v49, 1 }
 0x125   :  { %v462_v53 = vadd.f32 %v461_v51, %v440_v50  ;;  %v501_v54 = vadd.f32 %v500_v47, %v499_v49 }
 0x127   :  { %463 = vst [vmem:[%s837_s4] sm:$0x1] %v462_v53  ;;  %v502_v55 = vadd.f32 %v501_v54, %v464_v52 }
 0x129   :  { %503 = vst [vmem:[%s838_s5] sm:$0x1] %v502_v55 }

// kernel: vqvae_forward.29
= control target key start
LH: loop header
LB: loop body
LE: loop exit
PB: predicated region body
PF: predicated region fallthrough
CT: control target
= control target key end

     0   :  { %s339_s1 = inlined_call_operand.vmem [shape: bf16[128,128], index: 1, kind: input, shape index: {}]   ;;  %s340_s0 = inlined_call_operand.vmem [shape: bf16[32,128], index: 0, kind: input, shape index: {}]   ;;  %s341_s2 = inlined_call_operand.vmem [shape: f32[1,128], index: 2, kind: input, shape index: {}]   ;;  %s342_s3 = inlined_call_operand.vmem [shape: bf16[32,128], index: 3, kind: output, shape index: {}]  }
   0x1   :  { %v270_v0 = vld [vmem:[%s339_s1] sm:$0xff]   ;;  %v271_v1 = vld [vmem:[%s339_s1 + $0x8] sm:$0xff]   ;;  %v272_v2 = vld [vmem:[%s339_s1 + $0x10] sm:$0xff]  }
   0x2   :  { %250 = vmatprep.subr.bf16.mxu0 %v270_v0  ;;  %v273_v3 = vld [vmem:[%s339_s1 + $0x18] sm:$0xff]   ;;  %v278_v4 = vld [vmem:[%s340_s0] sm:$0xff]   ;;  %v275_v6 = vld [vmem:[%s339_s1 + $0x28] sm:$0xff]  }
   0x3   :  { %251 = vmatpush3.bf16.msra.mxu0 %v270_v0  ;;  %266 = vmatprep.mubr.bf16.mxu0 %v278_v4  ;;  %v274_v5 = vld [vmem:[%s339_s1 + $0x20] sm:$0xff]   ;;  %v276_v7 = vld [vmem:[%s339_s1 + $0x30] sm:$0xff]   ;;  %v277_v8 = vld [vmem:[%s339_s1 + $0x38] sm:$0xff]  }
   0x4   :  { %252 = vmatprep.subr.bf16.mxu0 %v271_v1  ;;  %v279_v9 = vld [vmem:[%s340_s0 + $0x8] sm:$0xff]   ;;  %v220_v10 = vld [vmem:[%s341_s2] ss:$0 sm:$0xff] }
   0x7   :  { %253 = vmatpush3.bf16.msra.mxu0 %v271_v1 }
   0x8   :  { %254 = vmatprep.subr.bf16.mxu0 %v272_v2 }
   0xb   :  { %255 = vmatpush3.bf16.msra.mxu0 %v272_v2 }
   0xc   :  { %256 = vmatprep.subr.bf16.mxu0 %v273_v3 }
   0xf   :  { %257 = vmatpush3.bf16.msra.mxu0 %v273_v3 }
  0x10   :  { %258 = vmatprep.subr.bf16.mxu0 %v274_v5 }
  0x13   :  { %259 = vmatpush3.bf16.msra.mxu0 %v274_v5 }
  0x14   :  { %260 = vmatprep.subr.bf16.mxu0 %v275_v6 }
  0x17   :  { %261 = vmatpush3.bf16.msra.mxu0 %v275_v6 }
  0x18   :  { %262 = vmatprep.subr.bf16.mxu0 %v276_v7 }
  0x1b   :  { %263 = vmatpush3.bf16.msra.mxu0 %v276_v7 }
  0x1c   :  { %264 = vmatprep.subr.bf16.mxu0 %v277_v8 }
  0x1f   :  { %265 = vmatpush3.bf16.msra.mxu0 %v277_v8 }
  0x22   :  { %267 = vmatmul.mubr.bf16.vlgmr.msra.gmra.mrb[0].mxu0 %v279_v9 }
  0xf5   :  { %v268_v11 = vpop.f32.mrb[0].mxu0 }
  0xf6   :  { %v180_v12 = vadd.f32 %v268_v11, %v220_v10  ;;  %v141_v13 = vpop.f32.mrb[1].mxu0 }
  0xf7   :  { %v178_v14 = vadd.f32 %v220_v10, %v141_v13  ;;  %v269_v15 = vpop.f32.mrb[2].mxu0 }
  0xf8   :  { %v181_v16 = vadd.f32 %v269_v15, %v220_v10  ;;  %v144_v17 = vpop.f32.mrb[3].mxu0  ;;  %v184_v19 = vmax.f32 %v180_v12, 0.0 }
  0xf9   :  { %v179_v18 = vadd.f32 %v220_v10, %v144_v17  ;;  %v182_v21 = vmax.f32 %v178_v14, 0.0 }
  0xfa   :  { %v185_v20 = vmax.f32 %v181_v16, 0.0 }
  0xfb   :  { %v183_v22 = vmax.f32 %v179_v18, 0.0 }
  0xfc   :  { %v237_v23 = vpack.c.bf16 %v185_v20, %v184_v19 }
  0xfd   :  { %v232_v24 = vpack.c.bf16 %v183_v22, %v182_v21 }
  0xfe   :  { %239 = vst [vmem:[%s342_s3 + $0x8] sm:$0xff] %v237_v23  }
  0xff   :  { %233 = vst [vmem:[%s342_s3] sm:$0xff] %v232_v24  }

// kernel: vqvae_forward.31
= control target key start
LH: loop header
LB: loop body
LE: loop exit
PB: predicated region body
PF: predicated region fallthrough
CT: control target
= control target key end

     0   :  { %v326_v6 = vmov 0   ;;  %v327_v19 = vmov 0.0   ;;  %s421_s1 = inlined_call_operand.vmem [shape: bf16[128,128], index: 1, kind: input, shape index: {}]   ;;  %s422_s0 = inlined_call_operand.vmem [shape: bf16[32,128], index: 0, kind: input, shape index: {}]   ;;  %s423_s4 = inlined_call_operand.vmem [shape: f32[1,128], index: 4, kind: output, shape index: {1}]   ;;  %s424_s5 = inlined_call_operand.vmem [shape: f32[1,128], index: 5, kind: output, shape index: {2}]   ;;  %s425_s2 = inlined_call_operand.vmem [shape: f32[1,128], index: 2, kind: input, shape index: {}]   ;;  %s426_s3 = inlined_call_operand.vmem [shape: bf16[32,128], index: 3, kind: output, shape index: {0}]  }
   0x1   :  { %v318_v0 = vld [vmem:[%s421_s1] sm:$0xff]   ;;  %v319_v1 = vld [vmem:[%s421_s1 + $0x8] sm:$0xff]   ;;  %v320_v2 = vld [vmem:[%s421_s1 + $0x10] sm:$0xff]   ;;  %31 = vst [vmem:[%s423_s4] sm:$0x1] %v327_v19 }
   0x2   :  { %296 = vmatprep.subr.bf16.mxu0 %v318_v0  ;;  %v321_v3 = vld [vmem:[%s421_s1 + $0x18] sm:$0xff]   ;;  %v33_v4 = vld [vmem:[%s422_s0] sm:$0xf]  ;;  %v34_v5 = vld [vmem:[%s422_s0 + $0x4] sm:$0xf]  ;;  %32 = vst [vmem:[%s424_s5] sm:$0x1] %v327_v19 }
   0x3   :  { %297 = vmatpush3.bf16.msra.mxu0 %v318_v0  ;;  %v37_v7 = vmax.bf16 %v326_v6, %v33_v4  ;;  %v38_v8 = vmax.bf16 %v326_v6, %v34_v5  ;;  %v322_v10 = vld [vmem:[%s421_s1 + $0x20] sm:$0xff]   ;;  %v323_v11 = vld [vmem:[%s421_s1 + $0x28] sm:$0xff]   ;;  %v324_v12 = vld [vmem:[%s421_s1 + $0x30] sm:$0xff]  }
   0x4   :  { %298 = vmatprep.subr.bf16.mxu0 %v319_v1  ;;  %v35_v13 = vld [vmem:[%s422_s0 + $0x8] sm:$0xf]  ;;  %v36_v14 = vld [vmem:[%s422_s0 + $0xc] sm:$0xf]  ;;  %v325_v15 = vld [vmem:[%s421_s1 + $0x38] sm:$0xff]  }
   0x5   :  { %v256_v9 = vcombine.low %v37_v7, %v38_v8  ;;  %v39_v16 = vmax.bf16 %v326_v6, %v35_v13  ;;  %v40_v17 = vmax.bf16 %v326_v6, %v36_v14  ;;  %v266_v20 = vld [vmem:[%s425_s2] ss:$0 sm:$0xff] }
   0x7   :  { %299 = vmatpush3.bf16.msra.mxu0 %v319_v1  ;;  %312 = vmatprep.mubr.bf16.mxu0 %v256_v9  ;;  %v257_v18 = vcombine.low %v39_v16, %v40_v17 }
   0x8   :  { %300 = vmatprep.subr.bf16.mxu0 %v320_v2  ;;  %v216_v50 = vld [vmem:[%s423_s4] sm:$0x1] }
   0x9   :  { %v228_v53 = vld [vmem:[%s424_s5] sm:$0x1] }
   0xb   :  { %301 = vmatpush3.bf16.msra.mxu0 %v320_v2 }
   0xc   :  { %302 = vmatprep.subr.bf16.mxu0 %v321_v3 }
   0xf   :  { %303 = vmatpush3.bf16.msra.mxu0 %v321_v3 }
  0x10   :  { %304 = vmatprep.subr.bf16.mxu0 %v322_v10 }
  0x13   :  { %305 = vmatpush3.bf16.msra.mxu0 %v322_v10 }
  0x14   :  { %306 = vmatprep.subr.bf16.mxu0 %v323_v11 }
  0x17   :  { %307 = vmatpush3.bf16.msra.mxu0 %v323_v11 }
  0x18   :  { %308 = vmatprep.subr.bf16.mxu0 %v324_v12 }
  0x1b   :  { %309 = vmatpush3.bf16.msra.mxu0 %v324_v12 }
  0x1c   :  { %310 = vmatprep.subr.bf16.mxu0 %v325_v15 }
  0x1f   :  { %311 = vmatpush3.bf16.msra.mxu0 %v325_v15 }
  0x22   :  { %313 = vmatmul.mubr.bf16.vlgmr.msra.gmra.mrb[0].mxu0 %v257_v18 }
  0xf5   :  { %v314_v21 = vpop.f32.mrb[0].mxu0 }
  0xf6   :  { %v155_v22 = vpop.f32.mrb[1].mxu0  ;;  %v194_v25 = vadd.f32 %v314_v21, %v266_v20 }
  0xf7   :  { %v192_v23 = vadd.f32 %v266_v20, %v155_v22  ;;  %v315_v24 = vpop.f32.mrb[2].mxu0 }
  0xf8   :  { %v195_v26 = vadd.f32 %v315_v24, %v266_v20  ;;  %v158_v27 = vpop.f32.mrb[3].mxu0  ;;  %v231_v34 = vmul.f32 %v194_v25, %v194_v25 }
  0xf9   :  { %v193_v28 = vadd.f32 %v266_v20, %v158_v27  ;;  %v229_v30 = vmul.f32 %v192_v23, %v192_v23 }
  0xfa   :  { %v283_v29 = vpack.c.bf16 %v195_v26, %v194_v25  ;;  %v232_v37 = vmul.f32 %v195_v26, %v195_v26 }
  0xfb   :  { %v278_v31 = vpack.c.bf16 %v193_v28, %v192_v23  ;;  %v217_v32 = vadd.f32 %v193_v28, %v192_v23  ;;  %v230_v33 = vmul.f32 %v193_v28, %v193_v28 }
  0xfc   :  { %285 = vst [vmem:[%s426_s3 + $0x8] sm:$0xff] %v283_v29  }
  0xfd   :  { %279 = vst [vmem:[%s426_s3] sm:$0xff] %v278_v31   ;;  %v218_v35 = vadd.f32 %v217_v32, %v194_v25  ;;  %v233_v36 = vadd.f32 %v230_v33, %v229_v30 }
  0xff   :  { %v219_v38 = vadd.f32 %v218_v35, %v195_v26  ;;  %v234_v39 = vadd.f32 %v233_v36, %v231_v34 }
 0x101   :  { %v220_v40 = vrot.slane %v219_v38, 4  ;;  %v235_v41 = vadd.f32 %v234_v39, %v232_v37 }
 0x103   :  { %v221_v42 = vadd.f32 %v220_v40, %v219_v38  ;;  %v236_v43 = vrot.slane %v235_v41, 4 }
 0x105   :  { %v222_v44 = vrot.slane %v221_v42, 2  ;;  %v237_v45 = vadd.f32 %v236_v43, %v235_v41 }
 0x107   :  { %v223_v46 = vadd.f32 %v222_v44, %v221_v42  ;;  %v238_v47 = vrot.slane %v237_v45, 2 }
 0x109   :  { %v224_v48 = vrot.slane %v223_v46, 1  ;;  %v239_v49 = vadd.f32 %v238_v47, %v237_v45 }
 0x10b   :  { %v225_v51 = vadd.f32 %v224_v48, %v223_v46  ;;  %v240_v52 = vrot.slane %v239_v49, 1 }
 0x10d   :  { %v226_v54 = vadd.f32 %v225_v51, %v216_v50  ;;  %v241_v55 = vadd.f32 %v240_v52, %v239_v49 }
 0x10f   :  { %227 = vst [vmem:[%s423_s4] sm:$0x1] %v226_v54  ;;  %v242_v56 = vadd.f32 %v241_v55, %v228_v53 }
 0x111   :  { %243 = vst [vmem:[%s424_s5] sm:$0x1] %v242_v56 }

// kernel: vqvae_forward.30
= control target key start
LH: loop header
LB: loop body
LE: loop exit
PB: predicated region body
PF: predicated region fallthrough
CT: control target
= control target key end

     0   :  { %s335_s1 = inlined_call_operand.vmem [shape: bf16[128,128], index: 1, kind: input, shape index: {}]   ;;  %s336_s0 = inlined_call_operand.vmem [shape: bf16[32,128], index: 0, kind: input, shape index: {}]   ;;  %s337_s2 = inlined_call_operand.vmem [shape: f32[1,128], index: 2, kind: input, shape index: {}]   ;;  %s338_s3 = inlined_call_operand.vmem [shape: bf16[32,128], index: 3, kind: output, shape index: {}]  }
   0x1   :  { %v266_v0 = vld [vmem:[%s335_s1] sm:$0xff]   ;;  %v267_v1 = vld [vmem:[%s335_s1 + $0x8] sm:$0xff]   ;;  %v268_v2 = vld [vmem:[%s335_s1 + $0x10] sm:$0xff]  }
   0x2   :  { %246 = vmatprep.subr.bf16.mxu0 %v266_v0  ;;  %v269_v3 = vld [vmem:[%s335_s1 + $0x18] sm:$0xff]   ;;  %v274_v4 = vld [vmem:[%s336_s0] sm:$0xff]   ;;  %v271_v6 = vld [vmem:[%s335_s1 + $0x28] sm:$0xff]  }
   0x3   :  { %247 = vmatpush3.bf16.msra.mxu0 %v266_v0  ;;  %262 = vmatprep.mubr.bf16.mxu0 %v274_v4  ;;  %v270_v5 = vld [vmem:[%s335_s1 + $0x20] sm:$0xff]   ;;  %v272_v7 = vld [vmem:[%s335_s1 + $0x30] sm:$0xff]   ;;  %v273_v8 = vld [vmem:[%s335_s1 + $0x38] sm:$0xff]  }
   0x4   :  { %248 = vmatprep.subr.bf16.mxu0 %v267_v1  ;;  %v275_v9 = vld [vmem:[%s336_s0 + $0x8] sm:$0xff]   ;;  %v216_v11 = vld [vmem:[%s337_s2] ss:$0 sm:$0xff] }
   0x7   :  { %249 = vmatpush3.bf16.msra.mxu0 %v267_v1 }
   0x8   :  { %250 = vmatprep.subr.bf16.mxu0 %v268_v2 }
   0xb   :  { %251 = vmatpush3.bf16.msra.mxu0 %v268_v2 }
   0xc   :  { %252 = vmatprep.subr.bf16.mxu0 %v269_v3 }
   0xf   :  { %253 = vmatpush3.bf16.msra.mxu0 %v269_v3 }
  0x10   :  { %254 = vmatprep.subr.bf16.mxu0 %v270_v5 }
  0x13   :  { %255 = vmatpush3.bf16.msra.mxu0 %v270_v5 }
  0x14   :  { %256 = vmatprep.subr.bf16.mxu0 %v271_v6 }
  0x17   :  { %257 = vmatpush3.bf16.msra.mxu0 %v271_v6 }
  0x18   :  { %258 = vmatprep.subr.bf16.mxu0 %v272_v7 }
  0x1b   :  { %259 = vmatpush3.bf16.msra.mxu0 %v272_v7 }
  0x1c   :  { %260 = vmatprep.subr.bf16.mxu0 %v273_v8 }
  0x1f   :  { %261 = vmatpush3.bf16.msra.mxu0 %v273_v8 }
  0x22   :  { %263 = vmatmul.mubr.bf16.vlgmr.msra.gmra.mrb[0].mxu0 %v275_v9 }
  0xf5   :  { %v264_v10 = vpop.f32.mrb[0].mxu0 }
  0xf6   :  { %v141_v12 = vpop.f32.mrb[1].mxu0  ;;  %v180_v14 = vadd.f32 %v264_v10, %v216_v11 }
  0xf7   :  { %v265_v13 = vpop.f32.mrb[2].mxu0  ;;  %v178_v17 = vadd.f32 %v216_v11, %v141_v12 }
  0xf8   :  { %v181_v15 = vadd.f32 %v265_v13, %v216_v11  ;;  %v144_v16 = vpop.f32.mrb[3].mxu0 }
  0xf9   :  { %v179_v18 = vadd.f32 %v216_v11, %v144_v16 }
  0xfa   :  { %v233_v19 = vpack.c.bf16 %v181_v15, %v180_v14 }
  0xfb   :  { %v228_v20 = vpack.c.bf16 %v179_v18, %v178_v17 }
  0xfc   :  { %235 = vst [vmem:[%s338_s3 + $0x8] sm:$0xff] %v233_v19  }
  0xfd   :  { %229 = vst [vmem:[%s338_s3] sm:$0xff] %v228_v20  }

// kernel: vqvae_forward.32
= control target key start
LH: loop header
LB: loop body
LE: loop exit
PB: predicated region body
PF: predicated region fallthrough
CT: control target
= control target key end

     0   :  { %v42_v7 = vlaneseq  ;;  %s173_s1 = inlined_call_operand.vmem [shape: f32[1,128], index: 1, kind: input, shape index: {}]   ;;  %s174_s2 = inlined_call_operand.vmem [shape: f32[1,128], index: 2, kind: input, shape index: {}]   ;;  %s175_s0 = inlined_call_operand.vmem [shape: bf16[32,128], index: 0, kind: input, shape index: {}]   ;;  %s176_s3 = inlined_call_operand.vmem [shape: f32[1,128], index: 3, kind: input, shape index: {}]   ;;  %s177_s4 = inlined_call_operand.vmem [shape: f32[1,128], index: 4, kind: input, shape index: {}]   ;;  %s178_s5 = inlined_call_operand.vmem [shape: bf16[32,128], index: 5, kind: output, shape index: {}]  }
   0x1   :  { %v20_v0 = vld [vmem:[%s173_s1] sm:$0x1]  ;;  %v115_v11 = vld [vmem:[%s175_s0 + $0x8] sm:$0xff]  }
   0x2   :  { %v22_v1 = vld [vmem:[%s174_s2] sm:$0x1]  ;;  %v21_v2 = vmul.f32 0.03125, %v20_v0  ;;  %v43_v8 = vshrl.u32 %v42_v7, 7  ;;  %v103_v17 = vunpack.c.l.bf16 %v115_v11  ;;  %v104_v19 = vunpack.c.h.bf16 %v115_v11 }
   0x3   :  { %v23_v3 = vmul.f32 0.03125, %v22_v1  ;;  %v28_v9 = vld [vmem:[%s176_s3] sm:$0x1] }
   0x4   :  { %v24_v4 = vmul.f32 %v21_v2, %v21_v2  ;;  %v98_v10 = vld [vmem:[%s175_s0] sm:$0xff]   ;;  %v44_v12 = vsub.s32 0, %v43_v8 }
   0x5   :  { %v99_v15 = vunpack.c.l.bf16 %v98_v10  ;;  %v100_v16 = vunpack.c.h.bf16 %v98_v10  ;;  %v30_v18 = vld [vmem:[%s177_s4] sm:$0x1] }
   0x6   :  { %v25_v5 = vsub.f32 %v23_v3, %v24_v4 }
   0x8   :  { %v26_v6 = vadd.f32 1e-05, %v25_v5 }
   0xa   :  { %117 = vrsqrt.f32 %v26_v6 }
  0x14   :  { %v118_v13 = vpop.eup %117 }
  0x15   :  { %v29_v14 = vmul.f32 %v118_v13, %v28_v9 }
  0x17   :  { %v31_v20 = vmul.f32 %v29_v14, %v21_v2  ;;  %v45_v21 = vrot.slane %v29_v14, %v44_v12 }
  0x19   :  { %v32_v22 = vsub.f32 %v30_v18, %v31_v20  ;;  %v47_v23 = vmul.f32 %v99_v15, %v45_v21  ;;  %v48_v24 = vmul.f32 %v100_v16, %v45_v21  ;;  %v49_v25 = vmul.f32 %v103_v17, %v45_v21 }
  0x1a   :  { %v50_v26 = vmul.f32 %v104_v19, %v45_v21 }
  0x1b   :  { %v55_v27 = vrot.slane %v32_v22, %v44_v12 }
  0x1d   :  { %v57_v28 = vadd.f32 %v55_v27, %v47_v23  ;;  %v58_v29 = vadd.f32 %v55_v27, %v48_v24  ;;  %v59_v30 = vadd.f32 %v55_v27, %v49_v25  ;;  %v60_v31 = vadd.f32 %v55_v27, %v50_v26 }
  0x1f   :  { %v61_v32 = vmax.f32 %v57_v28, 0.0  ;;  %v62_v33 = vmax.f32 %v58_v29, 0.0  ;;  %v63_v34 = vmax.f32 %v59_v30, 0.0  ;;  %v64_v35 = vmax.f32 %v60_v31, 0.0 }
  0x21   :  { %v108_v36 = vpack.c.bf16 %v62_v33, %v61_v32  ;;  %v113_v37 = vpack.c.bf16 %v64_v35, %v63_v34 }
  0x23   :  { %109 = vst [vmem:[%s178_s5] sm:$0xff] %v108_v36   ;;  %116 = vst [vmem:[%s178_s5 + $0x8] sm:$0xff] %v113_v37  }

// kernel: vqvae_forward.33
= control target key start
LH: loop header
LB: loop body
LE: loop exit
PB: predicated region body
PF: predicated region fallthrough
CT: control target
= control target key end

     0   :  { %v323_v10 = vmov 0.0   ;;  %s411_s1 = inlined_call_operand.vmem [shape: bf16[128,128], index: 1, kind: input, shape index: {}]   ;;  %s412_s0 = inlined_call_operand.vmem [shape: bf16[32,128], index: 0, kind: input, shape index: {}]   ;;  %s413_s4 = inlined_call_operand.vmem [shape: f32[1,128], index: 4, kind: output, shape index: {1}]   ;;  %s414_s5 = inlined_call_operand.vmem [shape: f32[1,128], index: 5, kind: output, shape index: {2}]   ;;  %s415_s2 = inlined_call_operand.vmem [shape: f32[1,128], index: 2, kind: input, shape index: {}]   ;;  %s416_s3 = inlined_call_operand.vmem [shape: bf16[32,128], index: 3, kind: output, shape index: {0}]  }
   0x1   :  { %v313_v0 = vld [vmem:[%s411_s1] sm:$0xff]   ;;  %v314_v1 = vld [vmem:[%s411_s1 + $0x8] sm:$0xff]   ;;  %v315_v2 = vld [vmem:[%s411_s1 + $0x10] sm:$0xff]   ;;  %31 = vst [vmem:[%s413_s4] sm:$0x1] %v323_v10 }
   0x2   :  { %292 = vmatprep.subr.bf16.mxu0 %v313_v0  ;;  %v316_v3 = vld [vmem:[%s411_s1 + $0x18] sm:$0xff]   ;;  %v321_v4 = vld [vmem:[%s412_s0] sm:$0xff]   ;;  %v318_v6 = vld [vmem:[%s411_s1 + $0x28] sm:$0xff]   ;;  %32 = vst [vmem:[%s414_s5] sm:$0x1] %v323_v10 }
   0x3   :  { %293 = vmatpush3.bf16.msra.mxu0 %v313_v0  ;;  %308 = vmatprep.mubr.bf16.mxu0 %v321_v4  ;;  %v317_v5 = vld [vmem:[%s411_s1 + $0x20] sm:$0xff]   ;;  %v319_v7 = vld [vmem:[%s411_s1 + $0x30] sm:$0xff]   ;;  %v320_v8 = vld [vmem:[%s411_s1 + $0x38] sm:$0xff]  }
   0x4   :  { %294 = vmatprep.subr.bf16.mxu0 %v314_v1  ;;  %v322_v9 = vld [vmem:[%s412_s0 + $0x8] sm:$0xff]   ;;  %v262_v11 = vld [vmem:[%s415_s2] ss:$0 sm:$0xff] }
   0x7   :  { %295 = vmatpush3.bf16.msra.mxu0 %v314_v1 }
   0x8   :  { %296 = vmatprep.subr.bf16.mxu0 %v315_v2  ;;  %v212_v41 = vld [vmem:[%s413_s4] sm:$0x1] }
   0x9   :  { %v224_v44 = vld [vmem:[%s414_s5] sm:$0x1] }
   0xb   :  { %297 = vmatpush3.bf16.msra.mxu0 %v315_v2 }
   0xc   :  { %298 = vmatprep.subr.bf16.mxu0 %v316_v3 }
   0xf   :  { %299 = vmatpush3.bf16.msra.mxu0 %v316_v3 }
  0x10   :  { %300 = vmatprep.subr.bf16.mxu0 %v317_v5 }
  0x13   :  { %301 = vmatpush3.bf16.msra.mxu0 %v317_v5 }
  0x14   :  { %302 = vmatprep.subr.bf16.mxu0 %v318_v6 }
  0x17   :  { %303 = vmatpush3.bf16.msra.mxu0 %v318_v6 }
  0x18   :  { %304 = vmatprep.subr.bf16.mxu0 %v319_v7 }
  0x1b   :  { %305 = vmatpush3.bf16.msra.mxu0 %v319_v7 }
  0x1c   :  { %306 = vmatprep.subr.bf16.mxu0 %v320_v8 }
  0x1f   :  { %307 = vmatpush3.bf16.msra.mxu0 %v320_v8 }
  0x22   :  { %309 = vmatmul.mubr.bf16.vlgmr.msra.gmra.mrb[0].mxu0 %v322_v9 }
  0xf5   :  { %v310_v12 = vpop.f32.mrb[0].mxu0 }
  0xf6   :  { %v151_v13 = vpop.f32.mrb[1].mxu0  ;;  %v190_v16 = vadd.f32 %v310_v12, %v262_v11 }
  0xf7   :  { %v188_v14 = vadd.f32 %v262_v11, %v151_v13  ;;  %v311_v15 = vpop.f32.mrb[2].mxu0 }
  0xf8   :  { %v191_v17 = vadd.f32 %v311_v15, %v262_v11  ;;  %v154_v18 = vpop.f32.mrb[3].mxu0  ;;  %v227_v25 = vmul.f32 %v190_v16, %v190_v16 }
  0xf9   :  { %v189_v19 = vadd.f32 %v262_v11, %v154_v18  ;;  %v225_v21 = vmul.f32 %v188_v14, %v188_v14 }
  0xfa   :  { %v279_v20 = vpack.c.bf16 %v191_v17, %v190_v16  ;;  %v228_v28 = vmul.f32 %v191_v17, %v191_v17 }
  0xfb   :  { %v274_v22 = vpack.c.bf16 %v189_v19, %v188_v14  ;;  %v213_v23 = vadd.f32 %v189_v19, %v188_v14  ;;  %v226_v24 = vmul.f32 %v189_v19, %v189_v19 }
  0xfc   :  { %281 = vst [vmem:[%s416_s3 + $0x8] sm:$0xff] %v279_v20  }
  0xfd   :  { %275 = vst [vmem:[%s416_s3] sm:$0xff] %v274_v22   ;;  %v214_v26 = vadd.f32 %v213_v23, %v190_v16  ;;  %v229_v27 = vadd.f32 %v226_v24, %v225_v21 }
  0xff   :  { %v215_v29 = vadd.f32 %v214_v26, %v191_v17  ;;  %v230_v30 = vadd.f32 %v229_v27, %v227_v25 }
 0x101   :  { %v216_v31 = vrot.slane %v215_v29, 4  ;;  %v231_v32 = vadd.f32 %v230_v30, %v228_v28 }
 0x103   :  { %v217_v33 = vadd.f32 %v216_v31, %v215_v29  ;;  %v232_v34 = vrot.slane %v231_v32, 4 }
 0x105   :  { %v218_v35 = vrot.slane %v217_v33, 2  ;;  %v233_v36 = vadd.f32 %v232_v34, %v231_v32 }
 0x107   :  { %v219_v37 = vadd.f32 %v218_v35, %v217_v33  ;;  %v234_v38 = vrot.slane %v233_v36, 2 }
 0x109   :  { %v220_v39 = vrot.slane %v219_v37, 1  ;;  %v235_v40 = vadd.f32 %v234_v38, %v233_v36 }
 0x10b   :  { %v221_v42 = vadd.f32 %v220_v39, %v219_v37  ;;  %v236_v43 = vrot.slane %v235_v40, 1 }
 0x10d   :  { %v222_v45 = vadd.f32 %v221_v42, %v212_v41  ;;  %v237_v46 = vadd.f32 %v236_v43, %v235_v40 }
 0x10f   :  { %223 = vst [vmem:[%s413_s4] sm:$0x1] %v222_v45  ;;  %v238_v47 = vadd.f32 %v237_v46, %v224_v44 }
 0x111   :  { %239 = vst [vmem:[%s414_s5] sm:$0x1] %v238_v47 }

// kernel: vqvae_forward.34
= control target key start
LH: loop header
LB: loop body
LE: loop exit
PB: predicated region body
PF: predicated region fallthrough
CT: control target
= control target key end

     0   :  { %v45_v7 = vlaneseq  ;;  %s204_s1 = inlined_call_operand.vmem [shape: f32[1,128], index: 1, kind: input, shape index: {}]   ;;  %s205_s2 = inlined_call_operand.vmem [shape: f32[1,128], index: 2, kind: input, shape index: {}]   ;;  %s206_s0 = inlined_call_operand.vmem [shape: bf16[32,128], index: 0, kind: input, shape index: {}]   ;;  %s207_s3 = inlined_call_operand.vmem [shape: f32[1,128], index: 3, kind: input, shape index: {}]   ;;  %s208_s4 = inlined_call_operand.vmem [shape: f32[1,128], index: 4, kind: input, shape index: {}]   ;;  %s209_s5 = inlined_call_operand.vmem [shape: bf16[32,128], index: 5, kind: input, shape index: {}]   ;;  %s210_s6 = inlined_call_operand.vmem [shape: bf16[32,128], index: 6, kind: output, shape index: {}]  }
   0x1   :  { %v23_v0 = vld [vmem:[%s204_s1] sm:$0x1]  ;;  %v134_v11 = vld [vmem:[%s206_s0 + $0x8] sm:$0xff]  }
   0x2   :  { %v25_v1 = vld [vmem:[%s205_s2] sm:$0x1]  ;;  %v24_v2 = vmul.f32 0.03125, %v23_v0  ;;  %v46_v8 = vshrl.u32 %v45_v7, 7  ;;  %v114_v17 = vunpack.c.l.bf16 %v134_v11  ;;  %v115_v19 = vunpack.c.h.bf16 %v134_v11  ;;  %v135_v23 = vld [vmem:[%s209_s5 + $0x8] sm:$0xff]  }
   0x3   :  { %v26_v3 = vmul.f32 0.03125, %v25_v1  ;;  %v31_v9 = vld [vmem:[%s207_s3] sm:$0x1]  ;;  %v122_v32 = vunpack.c.l.bf16 %v135_v23  ;;  %v123_v33 = vunpack.c.h.bf16 %v135_v23 }
   0x4   :  { %v27_v4 = vmul.f32 %v24_v2, %v24_v2  ;;  %v109_v10 = vld [vmem:[%s206_s0] sm:$0xff]   ;;  %v47_v12 = vsub.s32 0, %v46_v8 }
   0x5   :  { %v110_v15 = vunpack.c.l.bf16 %v109_v10  ;;  %v111_v16 = vunpack.c.h.bf16 %v109_v10  ;;  %v33_v18 = vld [vmem:[%s208_s4] sm:$0x1] }
   0x6   :  { %v28_v5 = vsub.f32 %v26_v3, %v27_v4  ;;  %v117_v22 = vld [vmem:[%s209_s5] sm:$0xff]  }
   0x7   :  { %v118_v28 = vunpack.c.l.bf16 %v117_v22  ;;  %v119_v31 = vunpack.c.h.bf16 %v117_v22 }
   0x8   :  { %v29_v6 = vadd.f32 1e-05, %v28_v5 }
   0xa   :  { %137 = vrsqrt.f32 %v29_v6 }
  0x14   :  { %v138_v13 = vpop.eup %137 }
  0x15   :  { %v32_v14 = vmul.f32 %v138_v13, %v31_v9 }
  0x17   :  { %v34_v20 = vmul.f32 %v32_v14, %v24_v2  ;;  %v48_v21 = vrot.slane %v32_v14, %v47_v12 }
  0x19   :  { %v35_v24 = vsub.f32 %v33_v18, %v34_v20  ;;  %v50_v25 = vmul.f32 %v110_v15, %v48_v21  ;;  %v51_v26 = vmul.f32 %v111_v16, %v48_v21  ;;  %v52_v27 = vmul.f32 %v114_v17, %v48_v21 }
  0x1a   :  { %v53_v29 = vmul.f32 %v115_v19, %v48_v21 }
  0x1b   :  { %v58_v30 = vrot.slane %v35_v24, %v47_v12 }
  0x1d   :  { %v60_v34 = vadd.f32 %v58_v30, %v50_v25  ;;  %v61_v35 = vadd.f32 %v58_v30, %v51_v26  ;;  %v62_v36 = vadd.f32 %v58_v30, %v52_v27  ;;  %v63_v37 = vadd.f32 %v58_v30, %v53_v29 }
  0x1f   :  { %v72_v38 = vadd.f32 %v118_v28, %v60_v34  ;;  %v73_v39 = vadd.f32 %v119_v31, %v61_v35  ;;  %v74_v40 = vadd.f32 %v122_v32, %v62_v36  ;;  %v75_v41 = vadd.f32 %v123_v33, %v63_v37 }
  0x21   :  { %v127_v42 = vpack.c.bf16 %v73_v39, %v72_v38  ;;  %v132_v43 = vpack.c.bf16 %v75_v41, %v74_v40 }
  0x23   :  { %128 = vst [vmem:[%s210_s6] sm:$0xff] %v127_v42   ;;  %136 = vst [vmem:[%s210_s6 + $0x8] sm:$0xff] %v132_v43  }

// kernel: vqvae_forward.38
= control target key start
LH: loop header
LB: loop body
LE: loop exit
PB: predicated region body
PF: predicated region fallthrough
CT: control target
= control target key end

     0   :  { %v45_v7 = vlaneseq  ;;  %s208_s1 = inlined_call_operand.vmem [shape: f32[1,128], index: 1, kind: input, shape index: {}]   ;;  %s209_s2 = inlined_call_operand.vmem [shape: f32[1,128], index: 2, kind: input, shape index: {}]   ;;  %s210_s0 = inlined_call_operand.vmem [shape: bf16[32,128], index: 0, kind: input, shape index: {}]   ;;  %s211_s3 = inlined_call_operand.vmem [shape: f32[1,128], index: 3, kind: input, shape index: {}]   ;;  %s212_s4 = inlined_call_operand.vmem [shape: f32[1,128], index: 4, kind: input, shape index: {}]   ;;  %s213_s5 = inlined_call_operand.vmem [shape: bf16[32,128], index: 5, kind: input, shape index: {}]   ;;  %s214_s6 = inlined_call_operand.vmem [shape: bf16[32,128], index: 6, kind: output, shape index: {}]  }
   0x1   :  { %v23_v0 = vld [vmem:[%s208_s1] sm:$0x1]  ;;  %v138_v11 = vld [vmem:[%s210_s0 + $0x8] sm:$0xff]  }
   0x2   :  { %v25_v1 = vld [vmem:[%s209_s2] sm:$0x1]  ;;  %v24_v2 = vmul.f32 0.03125, %v23_v0  ;;  %v46_v8 = vshrl.u32 %v45_v7, 7  ;;  %v118_v17 = vunpack.c.l.bf16 %v138_v11  ;;  %v119_v19 = vunpack.c.h.bf16 %v138_v11  ;;  %v139_v23 = vld [vmem:[%s213_s5 + $0x8] sm:$0xff]  }
   0x3   :  { %v26_v3 = vmul.f32 0.03125, %v25_v1  ;;  %v31_v9 = vld [vmem:[%s211_s3] sm:$0x1]  ;;  %v126_v32 = vunpack.c.l.bf16 %v139_v23  ;;  %v127_v33 = vunpack.c.h.bf16 %v139_v23 }
   0x4   :  { %v27_v4 = vmul.f32 %v24_v2, %v24_v2  ;;  %v113_v10 = vld [vmem:[%s210_s0] sm:$0xff]   ;;  %v47_v12 = vsub.s32 0, %v46_v8 }
   0x5   :  { %v114_v15 = vunpack.c.l.bf16 %v113_v10  ;;  %v115_v16 = vunpack.c.h.bf16 %v113_v10  ;;  %v33_v18 = vld [vmem:[%s212_s4] sm:$0x1] }
   0x6   :  { %v28_v5 = vsub.f32 %v26_v3, %v27_v4  ;;  %v121_v22 = vld [vmem:[%s213_s5] sm:$0xff]  }
   0x7   :  { %v122_v28 = vunpack.c.l.bf16 %v121_v22  ;;  %v123_v31 = vunpack.c.h.bf16 %v121_v22 }
   0x8   :  { %v29_v6 = vadd.f32 1e-05, %v28_v5 }
   0xa   :  { %141 = vrsqrt.f32 %v29_v6 }
  0x14   :  { %v142_v13 = vpop.eup %141 }
  0x15   :  { %v32_v14 = vmul.f32 %v142_v13, %v31_v9 }
  0x17   :  { %v34_v20 = vmul.f32 %v32_v14, %v24_v2  ;;  %v48_v21 = vrot.slane %v32_v14, %v47_v12 }
  0x19   :  { %v35_v24 = vsub.f32 %v33_v18, %v34_v20  ;;  %v50_v25 = vmul.f32 %v114_v15, %v48_v21  ;;  %v51_v26 = vmul.f32 %v115_v16, %v48_v21  ;;  %v52_v27 = vmul.f32 %v118_v17, %v48_v21 }
  0x1a   :  { %v53_v29 = vmul.f32 %v119_v19, %v48_v21 }
  0x1b   :  { %v58_v30 = vrot.slane %v35_v24, %v47_v12 }
  0x1d   :  { %v60_v34 = vadd.f32 %v58_v30, %v50_v25  ;;  %v61_v35 = vadd.f32 %v58_v30, %v51_v26  ;;  %v62_v36 = vadd.f32 %v58_v30, %v52_v27  ;;  %v63_v37 = vadd.f32 %v58_v30, %v53_v29 }
  0x1f   :  { %v72_v38 = vadd.f32 %v122_v28, %v60_v34  ;;  %v73_v39 = vadd.f32 %v123_v31, %v61_v35  ;;  %v74_v40 = vadd.f32 %v126_v32, %v62_v36  ;;  %v75_v41 = vadd.f32 %v127_v33, %v63_v37 }
  0x21   :  { %v76_v42 = vmax.f32 %v72_v38, 0.0  ;;  %v77_v43 = vmax.f32 %v73_v39, 0.0  ;;  %v78_v44 = vmax.f32 %v74_v40, 0.0  ;;  %v79_v45 = vmax.f32 %v75_v41, 0.0 }
  0x23   :  { %v131_v46 = vpack.c.bf16 %v77_v43, %v76_v42  ;;  %v136_v47 = vpack.c.bf16 %v79_v45, %v78_v44 }
  0x25   :  { %132 = vst [vmem:[%s214_s6] sm:$0xff] %v131_v46   ;;  %140 = vst [vmem:[%s214_s6 + $0x8] sm:$0xff] %v136_v47  }

// kernel: vqvae_forward.40
= control target key start
LH: loop header
LB: loop body
LE: loop exit
PB: predicated region body
PF: predicated region fallthrough
CT: control target
= control target key end

     0   :  { %v1357_v2 = vmov 0   ;;  %s1766_s0 = inlined_call_operand.vmem [shape: bf16[32,128], index: 0, kind: input, shape index: {}]   ;;  %s1767_s1 = inlined_call_operand.vmem [shape: bf16[128,512], index: 1, kind: input, shape index: {}]   ;;  %s1768_s2 = inlined_call_operand.vmem [shape: f32[1,512], index: 2, kind: input, shape index: {}]   ;;  %s1769_s3 = inlined_call_operand.vmem [shape: bf16[512,128], index: 3, kind: input, shape index: {}]   ;;  %s1770_s4 = inlined_call_operand.vmem [shape: bf16[32,128], index: 4, kind: output, shape index: {0}]   ;;  %s1771_s5 = inlined_call_operand.hbm [shape: f32[1,128], index: 5, kind: output, shape index: {1}]  }
   0x1   :  { %v1249_v0 = vld [vmem:[%s1767_s1 + $0x4] ss:$16 sps:$4 sm:$0xff]   ;;  %v1251_v1 = vld [vmem:[%s1767_s1 + $0xc] ss:$16 sps:$4 sm:$0xff]   ;;  %320 = vmatprep.mubr.bf16.mxu0 %v1357_v2  ;;  %373 = vmatprep.mubr.bf16.mxu1 %v1357_v2  ;;  %v1253_v3 = vld [vmem:[%s1767_s1] ss:$16 sps:$4 sm:$0xff]  }
   0x2   :  { %288 = vmatprep.subr.bf16.mxu0 %v1249_v0  ;;  %v1254_v4 = vld [vmem:[%s1767_s1 + $0x8] ss:$16 sps:$4 sm:$0xff]   ;;  %341 = vmatprep.subr.bf16.mxu1 %v1251_v1  ;;  %v1255_v5 = vld [vmem:[%s1767_s1 + $0x24] ss:$16 sps:$4 sm:$0xff]   ;;  %v1257_v6 = vld [vmem:[%s1767_s1 + $0x2c] ss:$16 sps:$4 sm:$0xff]  }
   0x3   :  { %289 = vmatpush1.bf16.msra.mxu0 %v1253_v3  ;;  %342 = vmatpush1.bf16.msra.mxu1 %v1254_v4  ;;  %v1259_v7 = vld [vmem:[%s1767_s1 + $0x20] ss:$16 sps:$4 sm:$0xff]   ;;  %v1260_v8 = vld [vmem:[%s1767_s1 + $0x28] ss:$16 sps:$4 sm:$0xff]   ;;  %v1261_v9 = vld [vmem:[%s1767_s1 + $0x44] ss:$16 sps:$4 sm:$0xff]  }
   0x4   :  { %290 = vmatprep.subr.bf16.mxu0 %v1255_v5  ;;  %343 = vmatprep.subr.bf16.mxu1 %v1257_v6  ;;  %v1263_v10 = vld [vmem:[%s1767_s1 + $0x4c] ss:$16 sps:$4 sm:$0xff]   ;;  %v1265_v11 = vld [vmem:[%s1767_s1 + $0x40] ss:$16 sps:$4 sm:$0xff]   ;;  %v1266_v12 = vld [vmem:[%s1767_s1 + $0x48] ss:$16 sps:$4 sm:$0xff]  }
   0x5   :  { %v1267_v13 = vld [vmem:[%s1767_s1 + $0x64] ss:$16 sps:$4 sm:$0xff]   ;;  %v1269_v14 = vld [vmem:[%s1767_s1 + $0x6c] ss:$16 sps:$4 sm:$0xff]   ;;  %v1271_v15 = vld [vmem:[%s1767_s1 + $0x60] ss:$16 sps:$4 sm:$0xff]  }
   0x6   :  { %v1272_v16 = vld [vmem:[%s1767_s1 + $0x68] ss:$16 sps:$4 sm:$0xff]   ;;  %v1273_v17 = vld [vmem:[%s1767_s1 + $0x84] ss:$16 sps:$4 sm:$0xff]   ;;  %v1275_v18 = vld [vmem:[%s1767_s1 + $0x8c] ss:$16 sps:$4 sm:$0xff]  }
   0x7   :  { %291 = vmatpush1.bf16.msra.mxu0 %v1259_v7  ;;  %344 = vmatpush1.bf16.msra.mxu1 %v1260_v8  ;;  %v1277_v19 = vld [vmem:[%s1767_s1 + $0x80] ss:$16 sps:$4 sm:$0xff]   ;;  %v1278_v20 = vld [vmem:[%s1767_s1 + $0x88] ss:$16 sps:$4 sm:$0xff]   ;;  %v1279_v21 = vld [vmem:[%s1767_s1 + $0xa4] ss:$16 sps:$4 sm:$0xff]  }
   0x8   :  { %292 = vmatprep.subr.bf16.mxu0 %v1261_v9  ;;  %345 = vmatprep.subr.bf16.mxu1 %v1263_v10  ;;  %v1281_v22 = vld [vmem:[%s1767_s1 + $0xac] ss:$16 sps:$4 sm:$0xff]   ;;  %v1283_v23 = vld [vmem:[%s1767_s1 + $0xa0] ss:$16 sps:$4 sm:$0xff]   ;;  %v1284_v24 = vld [vmem:[%s1767_s1 + $0xa8] ss:$16 sps:$4 sm:$0xff]  }
   0x9   :  { %v1285_v25 = vld [vmem:[%s1767_s1 + $0xc4] ss:$16 sps:$4 sm:$0xff]   ;;  %v1287_v26 = vld [vmem:[%s1767_s1 + $0xcc] ss:$16 sps:$4 sm:$0xff]   ;;  %v1289_v29 = vld [vmem:[%s1767_s1 + $0xc0] ss:$16 sps:$4 sm:$0xff]  }
   0xa   :  { %v26_v27 = vld [vmem:[%s1766_s0] sm:$0xff]   ;;  %v28_v28 = vld [vmem:[%s1766_s0 + $0x8] sm:$0xff]  }
   0xb   :  { %293 = vmatpush1.bf16.msra.mxu0 %v1265_v11  ;;  %346 = vmatpush1.bf16.msra.mxu1 %v1266_v12  ;;  %v1290_v30 = vld [vmem:[%s1767_s1 + $0xc8] ss:$16 sps:$4 sm:$0xff]   ;;  %v1483_v31 = vunpack.c.l.bf16 %v26_v27  ;;  %v1485_v32 = vunpack.c.h.bf16 %v26_v27  ;;  %v1291_v33 = vld [vmem:[%s1767_s1 + $0xe4] ss:$16 sps:$4 sm:$0xff]   ;;  %v1293_v34 = vld [vmem:[%s1767_s1 + $0xec] ss:$16 sps:$4 sm:$0xff]   ;;  %v1493_v35 = vunpack.c.l.bf16 %v28_v28  ;;  %v1495_v36 = vunpack.c.h.bf16 %v28_v28 }
   0xc   :  { %294 = vmatprep.subr.bf16.mxu0 %v1267_v13  ;;  %347 = vmatprep.subr.bf16.mxu1 %v1269_v14  ;;  %v1295_v39 = vld [vmem:[%s1767_s1 + $0xe0] ss:$16 sps:$4 sm:$0xff]   ;;  %v1296_v40 = vld [vmem:[%s1767_s1 + $0xe8] ss:$16 sps:$4 sm:$0xff]  }
   0xd   :  { %v34_v37 = vmul.f32 %v1483_v31, %v1483_v31  ;;  %v36_v38 = vmul.f32 %v1493_v35, %v1493_v35  ;;  %v35_v41 = vmul.f32 %v1485_v32, %v1485_v32  ;;  %v37_v42 = vmul.f32 %v1495_v36, %v1495_v36 }
   0xf   :  { %295 = vmatpush1.bf16.msra.mxu0 %v1271_v15  ;;  %348 = vmatpush1.bf16.msra.mxu1 %v1272_v16 }
  0x10   :  { %296 = vmatprep.subr.bf16.mxu0 %v1273_v17  ;;  %349 = vmatprep.subr.bf16.mxu1 %v1275_v18 }
  0x11   :  { %38 = vadd.xlane.f32.xlu0 %v34_v37  ;;  %42 = vadd.xlane.f32.xlu1 %v36_v38 }
  0x13   :  { %297 = vmatpush1.bf16.msra.mxu0 %v1277_v19  ;;  %350 = vmatpush1.bf16.msra.mxu1 %v1278_v20 }
  0x14   :  { %298 = vmatprep.subr.bf16.mxu0 %v1279_v21  ;;  %351 = vmatprep.subr.bf16.mxu1 %v1281_v22 }
  0x15   :  { %40 = vadd.xlane.f32.xlu0 %v35_v41  ;;  %44 = vadd.xlane.f32.xlu1 %v37_v42 }
  0x17   :  { %299 = vmatpush1.bf16.msra.mxu0 %v1283_v23  ;;  %352 = vmatpush1.bf16.msra.mxu1 %v1284_v24 }
  0x18   :  { %300 = vmatprep.subr.bf16.mxu0 %v1285_v25  ;;  %353 = vmatprep.subr.bf16.mxu1 %v1287_v26 }
  0x1b   :  { %301 = vmatpush1.bf16.msra.mxu0 %v1289_v29  ;;  %354 = vmatpush1.bf16.msra.mxu1 %v1290_v30 }
  0x1c   :  { %302 = vmatprep.subr.bf16.mxu0 %v1291_v33  ;;  %355 = vmatprep.subr.bf16.mxu1 %v1293_v34 }
  0x1f   :  { %303 = vmatpush1.bf16.msra.mxu0 %v1295_v39  ;;  %356 = vmatpush1.bf16.msra.mxu1 %v1296_v40 }
  0x22   :  { %321 = vmatmul.mubr.bf16.vlgmr.msra.gmra.mrb[0].mxu0 %v26_v27  ;;  %374 = vmatmul.mubr.bf16.vlgmr.msra.gmra.mrb[0].mxu1 %v26_v27 }
  0x23   :  { %330 = vmatprep.mubr.bf16.mxu0 %v1357_v2  ;;  %383 = vmatprep.mubr.bf16.mxu1 %v1357_v2 }
  0x2a   :  { %331 = vmatmul.mubr.bf16.gmra.mrb[4].mxu0 %v28_v28  ;;  %384 = vmatmul.mubr.bf16.gmra.mrb[4].mxu1 %v28_v28 }
  0x2b   :  { %11 = vsyncpa [#allocation4], 0  ;;  %v48_v43 = vlaneseq  ;;  %v46_v47 = vld [vmem:[%s1768_s2] sm:$0xf]  ;;  %s1360_s21 = smov [#allocation3]  }
  0x2c   :  { %s1062_s22 = sshll.u32 %s1360_s21, 4  ;;  %s1063_s22 = int_to_ptr.vmem [resolvable:$true] %s1062_s22 }
  0x2d   :  { %v49_v44 = vshrl.u32 %v48_v43, 7  ;;  %s1337_s23 = scalar_lea.vmem %s1063_s22, 32  ;;  %p1338_p1 = scmp.lt.s32.totalorder %s1063_s22, %s1063_s22 }
  0x2f   :  { %v50_v45 = vsub.s32 0, %v49_v44  ;;  %v58_v48 = vsub.s32 2, %v49_v44  ;;  %v54_v49 = vsub.s32 1, %v49_v44  ;;  %v62_v52 = vsub.s32 3, %v49_v44 }
  0x31   :  { %v51_v50 = vrot.slane %v46_v47, %v50_v45  ;;  %v59_v51 = vrot.slane %v46_v47, %v58_v48  ;;  %v55_v53 = vrot.slane %v46_v47, %v54_v49  ;;  %v63_v62 = vrot.slane %v46_v47, %v62_v52 }
  0x9e   :  { %v39_v46 = vpop.xlane.xlu0 %38  ;;  %v1517_v56 = vpop.xlane.xlu1 %42 }
  0x9f   :  { %v68_v55 = vadd.f32 %v51_v50, %v39_v46  ;;  %v70_v60 = vadd.f32 %v59_v51, %v39_v46  ;;  %v69_v2 = vadd.f32 %v55_v53, %v39_v46  ;;  %v71_v19 = vadd.f32 %v63_v62, %v39_v46 }
  0xa0   :  { %v76_v24 = vadd.f32 %v51_v50, %v1517_v56  ;;  %v78_v25 = vadd.f32 %v59_v51, %v1517_v56  ;;  %v77_v37 = vadd.f32 %v55_v53, %v1517_v56 }
  0xa2   :  { %v41_v54 = vpop.xlane.xlu0 %40  ;;  %v45_v21 = vpop.xlane.xlu1 %44 }
  0xa3   :  { %v72_v0 = vadd.f32 %v51_v50, %v41_v54  ;;  %v73_v6 = vadd.f32 %v55_v53, %v41_v54  ;;  %v74_v9 = vadd.f32 %v59_v51, %v41_v54  ;;  %v75_v22 = vadd.f32 %v63_v62, %v41_v54 }
  0xa4   :  { %v80_v40 = vadd.f32 %v51_v50, %v45_v21  ;;  %v81_v41 = vadd.f32 %v55_v53, %v45_v21  ;;  %v79_v53 = vadd.f32 %v63_v62, %v1517_v56 }
  0xf5   :  { %v322_v57 = vpop.f32.mrb[0].mxu0  ;;  %v375_v58 = vpop.f32.mrb[0].mxu1 }
  0xf6   :  { %v394_v59 = vmul.f32 2.0, %v322_v57  ;;  %v324_v61 = vpop.f32.mrb[1].mxu0  ;;  %v377_v63 = vpop.f32.mrb[1].mxu1  ;;  %v396_v1 = vmul.f32 2.0, %v375_v58 }
  0xf7   :  { %v395_v3 = vmul.f32 2.0, %v324_v61  ;;  %v326_v4 = vpop.f32.mrb[2].mxu0  ;;  %v379_v5 = vpop.f32.mrb[2].mxu1  ;;  %v397_v13 = vmul.f32 2.0, %v377_v63 }
  0xf8   :  { %v1519_v7 = vsub.f32 %v68_v55, %v394_v59  ;;  %v398_v8 = vmul.f32 2.0, %v326_v4  ;;  %v328_v10 = vpop.f32.mrb[3].mxu0  ;;  %v381_v11 = vpop.f32.mrb[3].mxu1  ;;  %v400_v14 = vmul.f32 2.0, %v379_v5  ;;  %v1525_v17 = vsub.f32 %v70_v60, %v396_v1 }
  0xf9   :  { %v1521_v12 = vsub.f32 %v69_v2, %v395_v3  ;;  %v399_v15 = vmul.f32 2.0, %v328_v10  ;;  %v401_v23 = vmul.f32 2.0, %v381_v11  ;;  %v1533_v26 = vsub.f32 %v71_v19, %v397_v13 }
  0xfa   :  { %v1523_v16 = vsub.f32 %v72_v0, %v398_v8  ;;  %v1538_v33 = vsub.f32 %v74_v9, %v400_v14  ;;  %v82_v55 = vadd.f32 %v59_v51, %v45_v21  ;;  %v83_v0 = vadd.f32 %v63_v62, %v45_v21 }
  0xfb   :  { %v431_v18 = vmin.f32 %v1519_v7, %v1521_v12  ;;  %v1529_v20 = vsub.f32 %v73_v6, %v399_v15  ;;  %v417_v49 = vsub.f32 %v75_v22, %v401_v23  ;;  %v1557_v13 = vand.u32 127, %v48_v43 }
  0xfd   :  { %v436_v27 = vmin.f32 %v1523_v16, %v1529_v20  ;;  %v332_v28 = vpop.f32.mrb[4].mxu0  ;;  %v385_v29 = vpop.f32.mrb[4].mxu1  ;;  %v432_v30 = vmin.f32 %v431_v18, %v1525_v17  ;;  %v1560_v14 = vadd.s32 128, %v1557_v13  ;;  %v1563_v15 = vadd.s32 256, %v1557_v13 }
  0xfe   :  { %v402_v34 = vmul.f32 2.0, %v332_v28  ;;  %v334_v38 = vpop.f32.mrb[5].mxu0  ;;  %v387_v39 = vpop.f32.mrb[5].mxu1  ;;  %v404_v42 = vmul.f32 2.0, %v385_v29  ;;  %v1572_v22 = vadd.s32 384, %v1557_v13 }
  0xff   :  { %v403_v44 = vmul.f32 2.0, %v334_v38  ;;  %v336_v45 = vpop.f32.mrb[6].mxu0  ;;  %v389_v46 = vpop.f32.mrb[6].mxu1  ;;  %v433_v47 = vmin.f32 %v432_v30, %v1533_v26  ;;  %v437_v48 = vmin.f32 %v436_v27, %v1538_v33  ;;  %v405_v60 = vmul.f32 2.0, %v387_v39 }
 0x100   :  { %v1543_v52 = vsub.f32 %v76_v24, %v402_v34  ;;  %v406_v54 = vmul.f32 2.0, %v336_v45  ;;  %v338_v57 = vpop.f32.mrb[7].mxu0  ;;  %v391_v58 = vpop.f32.mrb[7].mxu1  ;;  %v408_v61 = vmul.f32 2.0, %v389_v46  ;;  %v420_v2 = vsub.f32 %v78_v25, %v404_v42 }
 0x101   :  { %v419_v59 = vsub.f32 %v77_v37, %v403_v44  ;;  %v407_v50 = vmul.f32 2.0, %v338_v57  ;;  %434 = vmin.xlane.f32.xlu0 %v433_v47  ;;  %v438_v1 = vmin.f32 %v437_v48, %v417_v49  ;;  %v409_v5 = vmul.f32 2.0, %v391_v58 }
 0x102   :  { %v1546_v63 = vsub.f32 %v80_v40, %v406_v54  ;;  %v1549_v51 = vsub.f32 %v79_v53, %v405_v60  ;;  %v424_v6 = vsub.f32 %v82_v55, %v408_v61  ;;  %v1299_v53 = vld [vmem:[%s1769_s3 + $0x40] sm:$0xff]  }
 0x103   :  { %v441_v3 = vmin.f32 %v1543_v52, %v419_v59  ;;  %v423_v4 = vsub.f32 %v81_v41, %v407_v50  ;;  %439 = vmin.xlane.f32.xlu1 %v438_v1  ;;  %v1552_v10 = vsub.f32 %v83_v0, %v409_v5  ;;  %v1301_v0 = vld [vmem:[%s1769_s3] sm:$0xff]   ;;  %1189 = vmatprep.subr.bf16.mxu0 %v1299_v53  ;;  %v1306_v5 = vld [vmem:[%s1769_s3 + $0x88] sm:$0xff]  }
 0x104   :  { %v1302_v1 = vld [vmem:[%s1769_s3 + $0x80] sm:$0xff]   ;;  %1190 = vmatpush3.bf16.msra.mxu0 %v1301_v0 }
 0x105   :  { %v446_v8 = vmin.f32 %v1546_v63, %v423_v4  ;;  %v442_v9 = vmin.f32 %v441_v3, %v420_v2  ;;  %v1304_v3 = vld [vmem:[%s1769_s3 + $0xc8] sm:$0xff]  }
 0x107   :  { %v443_v56 = vmin.f32 %v442_v9, %v1549_v51  ;;  %v447_v11 = vmin.f32 %v446_v8, %v424_v6  ;;  %v1309_v8 = vld [vmem:[%s1769_s3 + $0x10] sm:$0xff]  }
 0x108   :  { %v1310_v9 = vld [vmem:[%s1769_s3 + $0x90] sm:$0xff]  }
 0x109   :  { %444 = vmin.xlane.f32.xlu0 %v443_v56  ;;  %v448_v62 = vmin.f32 %v447_v11, %v1552_v10  ;;  %v1312_v56 = vld [vmem:[%s1769_s3 + $0xd8] sm:$0xff]  }
 0x10a   :  { %v1313_v11 = vld [vmem:[%s1769_s3 + $0x18] sm:$0xff]  }
 0x10b   :  { %449 = vmin.xlane.f32.xlu1 %v448_v62  ;;  %v1314_v62 = vld [vmem:[%s1769_s3 + $0x98] sm:$0xff]  }
 0x18e   :  { %v435_v18 = vpop.xlane.xlu0 %434 }
 0x18f   :  { %vm451_vm0 = vcmp.eq.f32.partialorder %v1519_v7, %v435_v18  ;;  %vm452_vm1 = vcmp.eq.f32.partialorder %v1521_v12, %v435_v18  ;;  %vm453_vm2 = vcmp.eq.f32.partialorder %v1525_v17, %v435_v18  ;;  %vm454_vm3 = vcmp.eq.f32.partialorder %v1533_v26, %v435_v18  ;;  %v1315_v18 = vld [vmem:[%s1769_s3 + $0x60] sm:$0xff]  }
 0x190   :  { %v467_v19 = vsel %vm451_vm0, %v1557_v13, 512  ;;  %v468_v21 = vsel %vm452_vm1, %v1560_v14, 512  ;;  %v440_v43 = vpop.xlane.xlu1 %439  ;;  %v469_v23 = vsel %vm453_vm2, %v1563_v15, 512  ;;  %v470_v24 = vsel %vm454_vm3, %v1572_v22, 512 }
 0x191   :  { %vm483_vm4 = vcmp.lt.s32.totalorder %v467_v19, %v468_v21  ;;  %vm455_vm5 = vcmp.eq.f32.partialorder %v1523_v16, %v440_v43  ;;  %vm456_vm6 = vcmp.eq.f32.partialorder %v1529_v20, %v440_v43  ;;  %vm457_vm7 = vcmp.eq.f32.partialorder %v1538_v33, %v440_v43 }
 0x192   :  { %vm458_vm8 = vcmp.eq.f32.partialorder %v417_v49, %v440_v43  ;;  %v471_v7 = vsel %vm455_vm5, %v1557_v13, 512  ;;  %v472_v12 = vsel %vm456_vm6, %v1560_v14, 512  ;;  %v484_v17 = vsel %vm483_vm4, %v467_v19, %v468_v21  ;;  %v1316_v19 = vld [vmem:[%s1769_s3 + $0xe0] sm:$0xff]  }
 0x193   :  { %vm503_vm9 = vcmp.lt.s32.totalorder %v471_v7, %v472_v12  ;;  %vm485_vm10 = vcmp.lt.s32.totalorder %v484_v17, %v469_v23  ;;  %v473_v27 = vsel %vm457_vm7, %v1563_v15, 512  ;;  %v474_v16 = vsel %vm458_vm8, %v1572_v22, 512  ;;  %v1317_v21 = vld [vmem:[%s1769_s3 + $0x20] sm:$0xff]  }
 0x194   :  { %v486_v25 = vsel %vm485_vm10, %v484_v17, %v469_v23  ;;  %v504_v26 = vsel %vm503_vm9, %v471_v7, %v472_v12  ;;  %v1318_v43 = vld [vmem:[%s1769_s3 + $0xa0] sm:$0xff]   ;;  %v1319_v23 = vld [vmem:[%s1769_s3 + $0x68] sm:$0xff]  }
 0x195   :  { %vm487_vm11 = vcmp.lt.s32.totalorder %v486_v25, %v470_v24  ;;  %vm505_vm15 = vcmp.lt.s32.totalorder %v504_v26, %v473_v27  ;;  %v1320_v7 = vld [vmem:[%s1769_s3 + $0xe8] sm:$0xff]  }
 0x196   :  { %v445_v28 = vpop.xlane.xlu0 %444  ;;  %v1587_v33 = vsel %vm487_vm11, %v486_v25, %v470_v24  ;;  %v506_v41 = vsel %vm505_vm15, %v504_v26, %v473_v27  ;;  %v1321_v12 = vld [vmem:[%s1769_s3 + $0x28] sm:$0xff]  }
 0x197   :  { %vm459_vm12 = vcmp.eq.f32.partialorder %v1543_v52, %v445_v28  ;;  %vm460_vm13 = vcmp.eq.f32.partialorder %v419_v59, %v445_v28  ;;  %vm461_vm14 = vcmp.eq.f32.partialorder %v420_v2, %v445_v28  ;;  %vm462_vm0 = vcmp.eq.f32.partialorder %v1549_v51, %v445_v28  ;;  %v1303_v2 = vld [vmem:[%s1769_s3 + $0x48] sm:$0xff]   ;;  %v1307_v51 = vld [vmem:[%s1769_s3 + $0x50] sm:$0xff]  }
 0x198   :  { %v475_v20 = vsel %vm459_vm12, %v1557_v13, 512  ;;  %v476_v29 = vsel %vm460_vm13, %v1560_v14, 512  ;;  %v450_v30 = vpop.xlane.xlu1 %449  ;;  %v477_v34 = vsel %vm461_vm14, %v1563_v15, 512  ;;  %v490_v40 = vshra.s32 %v1587_v33, 16  ;;  %1191 = vmatprep.subr.bf16.mxu0 %v1303_v2  ;;  %v1322_v17 = vld [vmem:[%s1769_s3 + $0xa8] sm:$0xff]  }
 0x199   :  { %vm523_vm1 = vcmp.lt.s32.totalorder %v475_v20, %v476_v29  ;;  %vm463_vm2 = vcmp.eq.f32.partialorder %v1546_v63, %v450_v30  ;;  %vm464_vm3 = vcmp.eq.f32.partialorder %v423_v4, %v450_v30  ;;  %vm465_vm4 = vcmp.eq.f32.partialorder %v424_v6, %v450_v30  ;;  %v1300_v63 = vld [vmem:[%s1769_s3 + $0xc0] sm:$0xff]   ;;  %v1305_v4 = vld [vmem:[%s1769_s3 + $0x8] sm:$0xff]   ;;  %v1308_v6 = vld [vmem:[%s1769_s3 + $0xd0] sm:$0xff]  }
 0x19a   :  { %vm466_vm5 = vcmp.eq.f32.partialorder %v1552_v10, %v450_v30  ;;  %v479_v37 = vsel %vm463_vm2, %v1557_v13, 512  ;;  %v480_v38 = vsel %vm464_vm3, %v1560_v14, 512  ;;  %v481_v39 = vsel %vm465_vm4, %v1563_v15, 512  ;;  %1217 = vmatprep.subr.bf16.mxu1 %v1300_v63  ;;  %1192 = vmatpush3.bf16.msra.mxu0 %v1305_v4  ;;  %v1311_v10 = vld [vmem:[%s1769_s3 + $0x58] sm:$0xff]  }
 0x19b   :  { %vm543_vm6 = vcmp.lt.s32.totalorder %v479_v37, %v480_v38  ;;  %vm507_vm7 = vcmp.lt.s32.totalorder %v506_v41, %v474_v16  ;;  %v478_v42 = vsel %vm462_vm0, %v1572_v22, 512  ;;  %v524_v44 = vsel %vm523_vm1, %v475_v20, %v476_v29  ;;  %1218 = vmatpush3.bf16.msra.mxu1 %v1302_v1  ;;  %1193 = vmatprep.subr.bf16.mxu0 %v1307_v51 }
 0x19c   :  { %v544_v45 = vsel %vm543_vm6, %v479_v37, %v480_v38  ;;  %v1600_v46 = vcvt.s32.f32 %v490_v40  ;;  %v1602_v47 = vsel %vm507_vm7, %v506_v41, %v474_v16  ;;  %vm525_vm8 = vcmp.lt.s32.totalorder %v524_v44, %v477_v34  ;;  %1219 = vmatprep.subr.bf16.mxu1 %v1304_v3 }
 0x19d   :  { %vm545_vm9 = vcmp.lt.s32.totalorder %v544_v45, %v481_v39  ;;  %v510_v48 = vshra.s32 %v1602_v47, 16  ;;  %v526_v49 = vsel %vm525_vm8, %v524_v44, %v477_v34  ;;  %v482_v52 = vsel %vm466_vm5, %v1572_v22, 512  ;;  %v1324_v44 = vld [vmem:[%s1769_s3 + $0xf0] sm:$0xff]  }
 0x19e   :  { %v546_v54 = vsel %vm545_vm9, %v544_v45, %v481_v39  ;;  %493 = vmin.xlane.f32.xlu0 %v1600_v46  ;;  %vm527_vm10 = vcmp.lt.s32.totalorder %v526_v49, %v478_v42  ;;  %1194 = vmatpush3.bf16.msra.mxu0 %v1309_v8  ;;  %v489_v24 = vand.u32 65535, %v1587_v33  ;;  %v509_v25 = vand.u32 65535, %v1602_v47  ;;  %v1325_v45 = vld [vmem:[%s1769_s3 + $0x30] sm:$0xff]   ;;  %v1327_v47 = vld [vmem:[%s1769_s3 + $0x78] sm:$0xff]  }
 0x19f   :  { %vm547_vm11 = vcmp.lt.s32.totalorder %v546_v54, %v482_v52  ;;  %v1609_v55 = vcvt.s32.f32 %v510_v48  ;;  %v1611_v57 = vsel %vm527_vm10, %v526_v49, %v478_v42  ;;  %1220 = vmatpush3.bf16.msra.mxu1 %v1306_v5  ;;  %1195 = vmatprep.subr.bf16.mxu0 %v1311_v10  ;;  %v1323_v42 = vld [vmem:[%s1769_s3 + $0x70] sm:$0xff]   ;;  %v1328_v48 = vld [vmem:[%s1769_s3 + $0xf8] sm:$0xff]  }
 0x1a0   :  { %v1613_v58 = vsel %vm547_vm11, %v546_v54, %v482_v52  ;;  %v530_v59 = vshra.s32 %v1611_v57, 16  ;;  %1221 = vmatprep.subr.bf16.mxu1 %v1308_v6  ;;  %v491_v27 = vcvt.s32.f32 %v489_v24  ;;  %v529_v16 = vand.u32 65535, %v1611_v57  ;;  %v1329_v49 = vld [vmem:[%s1769_s3 + $0x38] sm:$0xff]  }
 0x1a1   :  { %v550_v60 = vshra.s32 %v1613_v58, 16  ;;  %513 = vmin.xlane.f32.xlu1 %v1609_v55  ;;  %v511_v29 = vcvt.s32.f32 %v509_v25  ;;  %v549_v30 = vand.u32 65535, %v1613_v58  ;;  %v1330_v52 = vld [vmem:[%s1769_s3 + $0xb8] sm:$0xff]  }
 0x1a2   :  { %v1618_v61 = vcvt.s32.f32 %v530_v59  ;;  %1196 = vmatpush3.bf16.msra.mxu0 %v1313_v11  ;;  %v531_v33 = vcvt.s32.f32 %v529_v16 }
 0x1a3   :  { %v1620_v50 = vcvt.s32.f32 %v550_v60  ;;  %1222 = vmatpush3.bf16.msra.mxu1 %v1310_v9  ;;  %1197 = vmatprep.subr.bf16.mxu0 %v1315_v18  ;;  %v551_v39 = vcvt.s32.f32 %v549_v30  ;;  %v1358_v9 = vmov 1.0|1.0  }
 0x1a4   :  { %533 = vmin.xlane.f32.xlu0 %v1618_v61  ;;  %1223 = vmatprep.subr.bf16.mxu1 %v1312_v56 }
 0x1a5   :  { %553 = vmin.xlane.f32.xlu1 %v1620_v50 }
 0x1a6   :  { %1198 = vmatpush3.bf16.msra.mxu0 %v1317_v21 }
 0x1a7   :  { %1224 = vmatpush3.bf16.msra.mxu1 %v1314_v62  ;;  %1199 = vmatprep.subr.bf16.mxu0 %v1319_v23 }
 0x1a8   :  { %1225 = vmatprep.subr.bf16.mxu1 %v1316_v19 }
 0x1aa   :  { %1200 = vmatpush3.bf16.msra.mxu0 %v1321_v12 }
 0x1ab   :  { %1226 = vmatpush3.bf16.msra.mxu1 %v1318_v43  ;;  %1201 = vmatprep.subr.bf16.mxu0 %v1323_v42 }
 0x1ac   :  { %1227 = vmatprep.subr.bf16.mxu1 %v1320_v7 }
 0x1ae   :  { %1202 = vmatpush3.bf16.msra.mxu0 %v1325_v45 }
 0x1af   :  { %1228 = vmatpush3.bf16.msra.mxu1 %v1322_v17  ;;  %1203 = vmatprep.subr.bf16.mxu0 %v1327_v47 }
 0x1b0   :  { %1229 = vmatprep.subr.bf16.mxu1 %v1324_v44 }
 0x1b2   :  { %1204 = vmatpush3.bf16.msra.mxu0 %v1329_v49 }
 0x22b   :  { %v494_v26 = vpop.xlane.xlu0 %493 }
 0x22c   :  { %vm495_vm12 = vcmp.eq.f32.partialorder %v1600_v46, %v494_v26  ;;  %v1326_v46 = vld [vmem:[%s1769_s3 + $0xb0] sm:$0xff]   ;;  %v500_v54 = vcvt.f32.s32 %v494_v26 }
 0x22d   :  { %v496_v28 = vsel %vm495_vm12, %v491_v27, inf  ;;  %1230 = vmatpush3.bf16.msra.mxu1 %v1326_v46 }
 0x22e   :  { %v514_v20 = vpop.xlane.xlu1 %513  ;;  %497 = vmin.xlane.f32.xlu0 %v496_v28  ;;  %1231 = vmatprep.subr.bf16.mxu1 %v1328_v48  ;;  %v501_v58 = vshll.u32 %v500_v54, 16 }
 0x22f   :  { %vm515_vm13 = vcmp.eq.f32.partialorder %v1609_v55, %v514_v20  ;;  %v520_v55 = vcvt.f32.s32 %v514_v20 }
 0x230   :  { %v516_v34 = vsel %vm515_vm13, %v511_v29, inf }
 0x231   :  { %517 = vmin.xlane.f32.xlu1 %v516_v34  ;;  %v534_v37 = vpop.xlane.xlu0 %533  ;;  %1232 = vmatpush3.bf16.msra.mxu1 %v1330_v52  ;;  %v521_v63 = vshll.u32 %v520_v55, 16 }
 0x232   :  { %v554_v38 = vpop.xlane.xlu1 %553  ;;  %vm535_vm14 = vcmp.eq.f32.partialorder %v1618_v61, %v534_v37  ;;  %v540_v60 = vcvt.f32.s32 %v534_v37 }
 0x233   :  { %v536_v40 = vsel %vm535_vm14, %v531_v33, inf  ;;  %vm555_vm15 = vcmp.eq.f32.partialorder %v1620_v50, %v554_v38  ;;  %v560_v61 = vcvt.f32.s32 %v554_v38 }
 0x234   :  { %537 = vmin.xlane.f32.xlu0 %v536_v40  ;;  %v556_v41 = vsel %vm555_vm15, %v551_v39, inf  ;;  %v541_v1 = vshll.u32 %v540_v60, 16 }
 0x235   :  { %557 = vmin.xlane.f32.xlu1 %v556_v41  ;;  %v561_v4 = vshll.u32 %v560_v61, 16 }
 0x2bb   :  { %v498_v57 = vpop.xlane.xlu0 %497 }
 0x2bc   :  { %v499_v59 = vcvt.f32.s32 %v498_v57 }
 0x2be   :  { %v502_v50 = vadd.s32 %v501_v58, %v499_v59  ;;  %v518_v53 = vpop.xlane.xlu1 %517 }
 0x2bf   :  { %v519_v0 = vcvt.f32.s32 %v518_v53 }
 0x2c0   :  { %vm564_vm0 = vcmp.eq.s32.totalorder %v1560_v14, %v502_v50  ;;  %vm566_vm5 = vcmp.eq.s32.totalorder %v1572_v22, %v502_v50  ;;  %vm563_vm8 = vcmp.eq.s32.totalorder %v1557_v13, %v502_v50  ;;  %vm565_vm10 = vcmp.eq.s32.totalorder %v1563_v15, %v502_v50 }
 0x2c1   :  { %v522_v2 = vadd.s32 %v521_v63, %v519_v0  ;;  %v538_v3 = vpop.xlane.xlu0 %537 }
 0x2c2   :  { %v539_v5 = vcvt.f32.s32 %v538_v3  ;;  %v558_v51 = vpop.xlane.xlu1 %557 }
 0x2c3   :  { %vm568_vm1 = vcmp.eq.s32.totalorder %v1560_v14, %v522_v2  ;;  %vm570_vm2 = vcmp.eq.s32.totalorder %v1572_v22, %v522_v2  ;;  %v559_v6 = vcvt.f32.s32 %v558_v51  ;;  %vm567_vm3 = vcmp.eq.s32.totalorder %v1557_v13, %v522_v2 }
 0x2c4   :  { %v542_v8 = vadd.s32 %v541_v1, %v539_v5  ;;  %vm1154_vm4 = vmpackc.low %vm568_vm1, %vm564_vm0  ;;  %vm569_vm6 = vcmp.eq.s32.totalorder %v1563_v15, %v522_v2 }
 0x2c5   :  { %1155 = vmatprep.mubr.msk.bf16.mxu0 %vm1154_vm4, %v1358_v9  ;;  %vm1162_vm7 = vmpackc.low %vm570_vm2, %vm566_vm5  ;;  %v562_v10 = vadd.s32 %v561_v4, %v559_v6 }
 0x2c6   :  { %1163 = vmatprep.mubr.msk.bf16.mxu1 %vm1162_vm7, %v1358_v9  ;;  %vm1156_vm9 = vmpackc.low %vm567_vm3, %vm563_vm8  ;;  %vm572_vm12 = vcmp.eq.s32.totalorder %v1560_v14, %v542_v8  ;;  %vm574_vm0 = vcmp.eq.s32.totalorder %v1572_v22, %v542_v8  ;;  %vm571_vm4 = vcmp.eq.s32.totalorder %v1557_v13, %v542_v8  ;;  %vm1048_vm8 = vcmask 1040384  }
 0x2c7   :  { %1157 = vmatmul.mubr.msk.bf16.vlgmr.msra.gmra.mrb[8].mxu0 %vm1156_vm9, %v1358_v9  ;;  %vm1164_vm11 = vmpackc.low %vm569_vm6, %vm565_vm10  ;;  %vm576_vm13 = vcmp.eq.s32.totalorder %v1560_v14, %v562_v10  ;;  %vm578_vm14 = vcmp.eq.s32.totalorder %v1572_v22, %v562_v10  ;;  %vm575_vm2 = vcmp.eq.s32.totalorder %v1557_v13, %v562_v10  ;;  %vm577_vm3 = vcmp.eq.s32.totalorder %v1563_v15, %v562_v10 }
 0x2c8   :  { %1165 = vmatmul.mubr.msk.bf16.vlgmr.msra.gmra.mrb[8].mxu1 %vm1164_vm11, %v1358_v9  ;;  %vm1158_vm15 = vmpackc.low %vm576_vm13, %vm572_vm12  ;;  %vm573_vm6 = vcmp.eq.s32.totalorder %v1563_v15, %v542_v8  ;;  %v1359_v14 = vmov 0.0  }
 0x2c9   :  { %1159 = vmatprep.mubr.msk.bf16.mxu0 %vm1158_vm15, %v1358_v9  ;;  %vm1166_vm1 = vmpackc.low %vm578_vm14, %vm574_vm0  ;;  %25 = vst [vmem:[#allocation2] sm:$0x1] %v1359_v14 }
 0x2ca   :  { %1167 = vmatprep.mubr.msk.bf16.mxu1 %vm1166_vm1, %v1358_v9  ;;  %vm1160_vm5 = vmpackc.low %vm575_vm2, %vm571_vm4 }
 0x2cb   :  { %vm1168_vm7 = vmpackc.low %vm577_vm3, %vm573_vm6 }
 0x2cf   :  { %1161 = vmatmul.mubr.msk.bf16.gmra.mrb[12].mxu0 %vm1160_vm5, %v1358_v9 }
 0x2d0   :  { %1169 = vmatmul.mubr.msk.bf16.gmra.mrb[12].mxu1 %vm1168_vm7, %v1358_v9  ;;  %v1028_v61 = vld [vmem:[#allocation2] sm:$0x1] }
 0x39a   :  { %v1205_v56 = vpop.f32.mrb[8].mxu0 }
 0x39b   :  { %v1233_v11 = vpop.f32.mrb[8].mxu1  ;;  %v1206_v22 = vpop.f32.mrb[9].mxu0 }
 0x39c   :  { %v1207_v62 = vadd.f32 %v1206_v22, %v1205_v56  ;;  %v1234_v18 = vpop.f32.mrb[9].mxu1  ;;  %v1208_v19 = vpop.f32.mrb[10].mxu0 }
 0x39d   :  { %v1235_v21 = vadd.f32 %v1234_v18, %v1233_v11  ;;  %v1236_v43 = vpop.f32.mrb[10].mxu1  ;;  %v1209_v23 = vpop.f32.mrb[11].mxu0 }
 0x39e   :  { %v1210_v7 = vadd.f32 %v1209_v23, %v1208_v19  ;;  %v1237_v12 = vpop.f32.mrb[11].mxu1 }
 0x39f   :  { %v959_v13 = vadd.f32 %v1235_v21, %v1207_v62  ;;  %v1238_v17 = vadd.f32 %v1237_v12, %v1236_v43 }
 0x3a1   :  { %v1020_v15 = vsub.f32 %v959_v13, %v1483_v31  ;;  %v962_v24 = vadd.f32 %v1238_v17, %v1210_v7 }
 0x3a2   :  { %v1211_v25 = vpop.f32.mrb[12].mxu0 }
 0x3a3   :  { %v1181_v26 = vpack.c.bf16 %v962_v24, %v959_v13  ;;  %v1021_v27 = vsub.f32 %v962_v24, %v1485_v32  ;;  %v1239_v28 = vpop.f32.mrb[12].mxu1  ;;  %v1212_v16 = vpop.f32.mrb[13].mxu0  ;;  %v1029_v34 = vmul.f32 %v1020_v15, %v1020_v15 }
 0x3a4   :  { %v1213_v20 = vadd.f32 %v1212_v16, %v1211_v25  ;;  %v1240_v29 = vpop.f32.mrb[13].mxu1  ;;  %v1214_v30 = vpop.f32.mrb[14].mxu0 }
 0x3a5   :  { %1182 = vst [vmem:[%s1770_s4] sm:$0xff] %v1181_v26   ;;  %v1030_v37 = vmul.f32 %v1021_v27, %v1021_v27  ;;  %v1241_v33 = vadd.f32 %v1240_v29, %v1239_v28  ;;  %v1242_v38 = vpop.f32.mrb[14].mxu1  ;;  %v1215_v39 = vpop.f32.mrb[15].mxu0 }
 0x3a6   :  { %v1216_v31 = vadd.f32 %v1215_v39, %v1214_v30  ;;  %v1243_v40 = vpop.f32.mrb[15].mxu1 }
 0x3a7   :  { %v1033_v41 = vadd.f32 %v1030_v37, %v1029_v34  ;;  %v967_v42 = vadd.f32 %v1241_v33, %v1213_v20  ;;  %v1244_v44 = vadd.f32 %v1243_v40, %v1242_v38 }
 0x3a9   :  { %v1022_v32 = vsub.f32 %v967_v42, %v1493_v35  ;;  %v970_v45 = vadd.f32 %v1244_v44, %v1216_v31 }
 0x3ab   :  { %v1031_v46 = vmul.f32 %v1022_v32, %v1022_v32  ;;  %v1186_v47 = vpack.c.bf16 %v970_v45, %v967_v42  ;;  %v1023_v48 = vsub.f32 %v970_v45, %v1495_v36 }
 0x3ad   :  { %v1034_v49 = vadd.f32 %v1033_v41, %v1031_v46  ;;  %1188 = vst [vmem:[%s1770_s4 + $0x8] sm:$0xff] %v1186_v47   ;;  %v1032_v52 = vmul.f32 %v1023_v48, %v1023_v48  ;;  %s1333_s4 = scalar_lea.vmem %s1063_s22, 16 }
 0x3ae   :  { %p1334_p0 = scmp.ne.s32.totalorder %s1063_s22, %s1333_s4  ;;  %p1339_p2 = scmp.lt.s32.totalorder %s1337_s23, %s1333_s4 }
 0x3af   :  { %v1035_v54 = vadd.f32 %v1034_v49, %v1032_v52 }
 0x3b0   :  { %p1340_p3 = por %p1339_p2, %p1338_p1 }
 0x3b1   :  { %v1036_v55 = vrot.slane %v1035_v54, 4 }
 0x3b2   :  { %p1341_p4 = pnand %p1340_p3, %p1334_p0 }
 0x3b3   :  { %v1037_v57 = vadd.f32 %v1036_v55, %v1035_v54 }
 0x3b5   :  { %v1038_v58 = vrot.slane %v1037_v57, 2 }
 0x3b7   :  { %v1039_v59 = vadd.f32 %v1038_v58, %v1037_v57 }
 0x3b9   :  { %v1040_v60 = vrot.slane %v1039_v59, 1 }
 0x3bb   :  { %v1041_v50 = vadd.f32 %v1040_v60, %v1039_v59 }
 0x3bd   :  { %v1042_v35 = vadd.f32 %v1041_v50, %v1028_v61 }
 0x3bf   :  { %1043 = vst [vmem:[#allocation2] sm:$0x1] %v1042_v35 }
 0x3c6   :  { %v1047_v53 = vld [vmem:[#allocation2] sm:$0x1] }
 0x3c7   :  { %v1049_v63 = vsel %vm1048_vm8, %v1047_v53, 0.0 }
 0x3c8   :  { %1050 = vadd.xlane.f32.xlu0 %v1049_v63 }
 0x455   :  { %v1051_v36 = vpop.xlane.xlu0 %1050 }
 0x456   :  { %v1052_v0 = vmul.f32 0.01953125, %v1051_v36 }
 0x458   :  { %1053 = vst [vmem:[#allocation3] sm:$0x1] %v1052_v0 }
 0x459   :  { %1344 = shalt.err (!%p1341_p4)
}
 0x45a   :  { %s1345_s26 = scalar_lea.hbm %s1771_s5, 16 }
 0x45b   :  { %p1346_p5 = scmp.ne.s32.totalorder %s1771_s5, %s1345_s26  ;;  %p1349_p6 = scmp.lt.u32.totalorder %s1345_s26, %s1771_s5 }
 0x45d   :  { %p1351_p7 = pnand %p1349_p6, %p1346_p5 }
 0x45f   :  { %1354 = shalt.err (!%p1351_p7)
}
 0x460   :  { %1065 = dma.vmem_to_hbm [thread:$0]  %s1063_s22, 16, %s1771_s5, [#allocation4]  }
 0x461   :  { %1355 = dma.done.wait [#allocation4], 16  }
 0x462   :  { %1356 = vsyncadd [#allocation4], 4294967280 }
 0x463   :  { %1071 = vsyncpa [#allocation4], 1 }

// kernel: vqvae_forward.53
= control target key start
LH: loop header
LB: loop body
LE: loop exit
PB: predicated region body
PF: predicated region fallthrough
CT: control target
= control target key end

     0   :  { %s1563_s12 = smov 0   ;;  %s1565_s13 = smov 0   ;;  %s1700_s0 = inlined_call_operand.vmem [shape: bf16[512,128], index: 0, kind: input, shape index: {}]   ;;  %s1701_s1 = inlined_call_operand.vmem [shape: bf16[128,128], index: 1, kind: input, shape index: {}]   ;;  %s1702_s2 = inlined_call_operand.vmem [shape: f32[1,128], index: 2, kind: input, shape index: {}]   ;;  %s1703_s3 = inlined_call_operand.vmem [shape: bf16[512,128], index: 3, kind: output, shape index: {}]  }
   0x1   :  { %s1567_s14 = smov 0  }
   0x2 LB: > { %s28_s15 = sadd.s32 1, %s1537_s13  ;;  %p1128_p0 = scmp.ge.s32.totalorder %s1541_s14, 1  ;;  %s1541_s14 = sphi %s1567_s14, %s13_s14   ;;  %s1537_s13 = sphi %s1565_s13, %s1705_s13   ;;  %s1533_s12 = sphi %s1563_s12, %s1704_s12  }
   0x3   : > { %p30_p1 = scmp.ge.s32.totalorder %s28_s15, 2  ;;  %p188_p2 = scmp.lt.s32.totalorder %s1541_s14, 3 }
   0x5   : > { %s1707_s15 = smov (%p30_p1, %s28_s15), 0  ;;  %p189_p3 = pnand %p1128_p0, %p188_p2 }
   0x6   : > { %v1431_v0 = vld [vmem:[%s1701_s1] sm:$0xff] (!%p189_p3)   ;;  %s1129_s18 = sshll.u32 (!%p189_p3), %s1533_s12, 5  ;;  %v1432_v1 = vld [vmem:[%s1701_s1 + $0x8] sm:$0xff] (!%p189_p3)   ;;  %v1433_v2 = vld [vmem:[%s1701_s1 + $0x10] sm:$0xff] (!%p189_p3)  }
   0x7   : > { %192 = sbr.rel (%p189_p3) target bundleno = 301 (0x12d), region = 32  ;;  %p230_p4 = scmp.lt.s32.totalorder (!%p189_p3), %s1129_s18, 63  ;;  %1343 = vmatprep.subr.bf16.mxu0 (!%p189_p3), %v1431_v0  ;;  %1391 = vmatprep.subr.bf16.mxu1 (!%p189_p3), %v1431_v0  ;;  %v1434_v3 = vld [vmem:[%s1701_s1 + $0x18] sm:$0xff] (!%p189_p3)   ;;  %v1435_v6 = vld [vmem:[%s1701_s1 + $0x20] sm:$0xff] (!%p189_p3)   ;;  %v1436_v7 = vld [vmem:[%s1701_s1 + $0x28] sm:$0xff] (!%p189_p3)  }
   0x8   : > { %1344 = vmatpush3.bf16.msra.mxu0 (!%p189_p3), %v1431_v0  ;;  %1399 = vmatpush3.bf16.msra.mxu1 (!%p189_p3), %v1431_v0  ;;  %v1437_v8 = vld [vmem:[%s1701_s1 + $0x30] sm:$0xff] (!%p189_p3)   ;;  %v1438_v9 = vld [vmem:[%s1701_s1 + $0x38] sm:$0xff] (!%p189_p3)   ;;  %v1634_v24 = vld [vmem:[%s1702_s2] ss:$0 sm:$0xff] (!%p189_p3) }
   0x9   : > { %1345 = vmatprep.subr.bf16.mxu0 (!%p189_p3), %v1432_v1  ;;  %1392 = vmatprep.subr.bf16.mxu1 (!%p189_p3), %v1432_v1 }
   0xc   : > { %1346 = vmatpush3.bf16.msra.mxu0 (!%p189_p3), %v1432_v1  ;;  %1400 = vmatpush3.bf16.msra.mxu1 (!%p189_p3), %v1432_v1 }
   0xd   : > { %1347 = vmatprep.subr.bf16.mxu0 (!%p189_p3), %v1433_v2  ;;  %1393 = vmatprep.subr.bf16.mxu1 (!%p189_p3), %v1433_v2 }
   0xe   : > { %s1709_s18 = smov (!%p230_p4, %s1129_s18), 63 }
   0xf   : > { %s1130_s23 = sshll.u32 %s1709_s18, 2 }
  0x10   : > { %s1598_s26 = scalar_lea.vmem %s1700_s0, %s1130_s23  ;;  %1348 = vmatpush3.bf16.msra.mxu0 %v1433_v2  ;;  %1401 = vmatpush3.bf16.msra.mxu1 %v1433_v2  ;;  %s1657_s17 = scalar_lea.vmem %s1703_s3, %s1130_s23 }
  0x11   : > { %v1439_v4 = vld [vmem:[%s1598_s26] sm:$0xff]   ;;  %1349 = vmatprep.subr.bf16.mxu0 %v1434_v3  ;;  %1394 = vmatprep.subr.bf16.mxu1 %v1434_v3  ;;  %v1441_v10 = vld [vmem:[%s1598_s26 + $0x8] sm:$0xff]   ;;  %v1443_v12 = vld [vmem:[%s1598_s26 + $0x10] sm:$0xff]  }
  0x12   : > { %v1440_v5 = vld [vmem:[%s1598_s26 + $0x40] sm:$0xff]   ;;  %1359 = vmatprep.mubr.bf16.mxu0 %v1439_v4  ;;  %v1442_v11 = vld [vmem:[%s1598_s26 + $0x48] sm:$0xff]   ;;  %v1444_v13 = vld [vmem:[%s1598_s26 + $0x50] sm:$0xff]  }
  0x13   : > { %1375 = vmatprep.mubr.bf16.mxu1 %v1440_v5  ;;  %v1445_v14 = vld [vmem:[%s1598_s26 + $0x18] sm:$0xff]   ;;  %v1447_v16 = vld [vmem:[%s1598_s26 + $0x20] sm:$0xff]   ;;  %v1449_v18 = vld [vmem:[%s1598_s26 + $0x28] sm:$0xff]  }
  0x14   : > { %1350 = vmatpush3.bf16.msra.mxu0 %v1434_v3  ;;  %1402 = vmatpush3.bf16.msra.mxu1 %v1434_v3  ;;  %v1446_v15 = vld [vmem:[%s1598_s26 + $0x58] sm:$0xff]   ;;  %v1448_v17 = vld [vmem:[%s1598_s26 + $0x60] sm:$0xff]   ;;  %v1450_v19 = vld [vmem:[%s1598_s26 + $0x68] sm:$0xff]  }
  0x15   : > { %1351 = vmatprep.subr.bf16.mxu0 %v1435_v6  ;;  %1395 = vmatprep.subr.bf16.mxu1 %v1435_v6  ;;  %v1451_v20 = vld [vmem:[%s1598_s26 + $0x30] sm:$0xff]   ;;  %v1453_v22 = vld [vmem:[%s1598_s26 + $0x38] sm:$0xff]  }
  0x16   : > { %v1452_v21 = vld [vmem:[%s1598_s26 + $0x70] sm:$0xff]   ;;  %v1454_v23 = vld [vmem:[%s1598_s26 + $0x78] sm:$0xff]  }
  0x18   : > { %1352 = vmatpush3.bf16.msra.mxu0 %v1435_v6  ;;  %1403 = vmatpush3.bf16.msra.mxu1 %v1435_v6 }
  0x19   : > { %1353 = vmatprep.subr.bf16.mxu0 %v1436_v7  ;;  %1396 = vmatprep.subr.bf16.mxu1 %v1436_v7 }
  0x1c   : > { %1354 = vmatpush3.bf16.msra.mxu0 %v1436_v7  ;;  %1404 = vmatpush3.bf16.msra.mxu1 %v1436_v7 }
  0x1d   : > { %1355 = vmatprep.subr.bf16.mxu0 %v1437_v8  ;;  %1397 = vmatprep.subr.bf16.mxu1 %v1437_v8 }
  0x20   : > { %1356 = vmatpush3.bf16.msra.mxu0 %v1437_v8  ;;  %1405 = vmatpush3.bf16.msra.mxu1 %v1437_v8 }
  0x21   : > { %1357 = vmatprep.subr.bf16.mxu0 %v1438_v9  ;;  %1398 = vmatprep.subr.bf16.mxu1 %v1438_v9 }
  0x24   : > { %1358 = vmatpush3.bf16.msra.mxu0 %v1438_v9  ;;  %1406 = vmatpush3.bf16.msra.mxu1 %v1438_v9 }
  0x27   : > { %1360 = vmatmul.mubr.bf16.vlgmr.msra.gmra.mrb[0].mxu0 %v1441_v10  ;;  %1376 = vmatmul.mubr.bf16.vlgmr.msra.gmra.mrb[0].mxu1 %v1442_v11 }
  0x28   : > { %1363 = vmatprep.mubr.bf16.mxu0 %v1443_v12  ;;  %1379 = vmatprep.mubr.bf16.mxu1 %v1444_v13 }
  0x2f   : > { %1364 = vmatmul.mubr.bf16.gmra.mrb[4].mxu0 %v1445_v14  ;;  %1380 = vmatmul.mubr.bf16.gmra.mrb[4].mxu1 %v1446_v15 }
  0x30   : > { %1367 = vmatprep.mubr.bf16.mxu0 %v1447_v16  ;;  %1383 = vmatprep.mubr.bf16.mxu1 %v1448_v17 }
  0x37   : > { %1368 = vmatmul.mubr.bf16.gmra.mrb[8].mxu0 %v1449_v18  ;;  %1384 = vmatmul.mubr.bf16.gmra.mrb[8].mxu1 %v1450_v19 }
  0x38   : > { %1371 = vmatprep.mubr.bf16.mxu0 %v1451_v20  ;;  %1387 = vmatprep.mubr.bf16.mxu1 %v1452_v21 }
  0x3f   : > { %1372 = vmatmul.mubr.bf16.gmra.mrb[12].mxu0 %v1453_v22  ;;  %1388 = vmatmul.mubr.bf16.gmra.mrb[12].mxu1 %v1454_v23 }
  0xfa   : > { %v1361_v25 = vpop.f32.mrb[0].mxu0  ;;  %v1377_v26 = vpop.f32.mrb[0].mxu1 }
  0xfb   : > { %v789_v27 = vadd.f32 %v1361_v25, %v1634_v24  ;;  %v805_v28 = vadd.f32 %v1377_v26, %v1634_v24  ;;  %v554_v29 = vpop.f32.mrb[1].mxu0  ;;  %v618_v30 = vpop.f32.mrb[1].mxu1 }
  0xfc   : > { %v787_v31 = vadd.f32 %v1634_v24, %v554_v29  ;;  %v803_v32 = vadd.f32 %v1634_v24, %v618_v30  ;;  %v1362_v33 = vpop.f32.mrb[2].mxu0  ;;  %v1378_v34 = vpop.f32.mrb[2].mxu1 }
  0xfd   : > { %1455 = vtanh.f32 %v789_v27  ;;  %v790_v35 = vadd.f32 %v1362_v33, %v1634_v24  ;;  %v557_v36 = vpop.f32.mrb[3].mxu0  ;;  %v621_v37 = vpop.f32.mrb[3].mxu1  ;;  %v806_v38 = vadd.f32 %v1378_v34, %v1634_v24 }
  0xfe   : > { %1457 = vtanh.f32 %v805_v28  ;;  %v788_v39 = vadd.f32 %v1634_v24, %v557_v36  ;;  %v804_v40 = vadd.f32 %v1634_v24, %v621_v37 }
  0xff   : > { %1459 = vtanh.f32 %v787_v31 }
 0x100   : > { %1461 = vtanh.f32 %v803_v32 }
 0x101   : > { %1463 = vtanh.f32 %v790_v35 }
 0x102   : > { %1465 = vtanh.f32 %v806_v38  ;;  %v1365_v41 = vpop.f32.mrb[4].mxu0  ;;  %v1381_v42 = vpop.f32.mrb[4].mxu1 }
 0x103   : > { %1467 = vtanh.f32 %v788_v39  ;;  %v793_v43 = vadd.f32 %v1365_v41, %v1634_v24  ;;  %v809_v44 = vadd.f32 %v1381_v42, %v1634_v24  ;;  %v570_v45 = vpop.f32.mrb[5].mxu0  ;;  %v634_v46 = vpop.f32.mrb[5].mxu1 }
 0x104   : > { %1469 = vtanh.f32 %v804_v40  ;;  %v791_v47 = vadd.f32 %v1634_v24, %v570_v45  ;;  %v807_v48 = vadd.f32 %v1634_v24, %v634_v46  ;;  %v1366_v49 = vpop.f32.mrb[6].mxu0  ;;  %v1382_v50 = vpop.f32.mrb[6].mxu1 }
 0x105   : > { %1471 = vtanh.f32 %v793_v43  ;;  %v794_v51 = vadd.f32 %v1366_v49, %v1634_v24  ;;  %v573_v52 = vpop.f32.mrb[7].mxu0  ;;  %v637_v53 = vpop.f32.mrb[7].mxu1  ;;  %v810_v54 = vadd.f32 %v1382_v50, %v1634_v24 }
 0x106   : > { %1473 = vtanh.f32 %v809_v44  ;;  %v792_v56 = vadd.f32 %v1634_v24, %v573_v52  ;;  %v808_v58 = vadd.f32 %v1634_v24, %v637_v53 }
 0x107   : > { %v1456_v55 = vpop.eup %1455  ;;  %1475 = vtanh.f32 %v791_v47 }
 0x108   : > { %v1458_v57 = vpop.eup %1457  ;;  %1477 = vtanh.f32 %v807_v48 }
 0x109   : > { %v1460_v59 = vpop.eup %1459  ;;  %1479 = vtanh.f32 %v794_v51 }
 0x10a   : > { %v1462_v60 = vpop.eup %1461  ;;  %1481 = vtanh.f32 %v810_v54  ;;  %v1369_v61 = vpop.f32.mrb[8].mxu0 }
 0x10b   : > { %v1385_v62 = vpop.f32.mrb[8].mxu1  ;;  %v1464_v63 = vpop.eup %1463  ;;  %1483 = vtanh.f32 %v792_v56  ;;  %v797_v0 = vadd.f32 %v1369_v61, %v1634_v24 }
 0x10c   : > { %v813_v1 = vadd.f32 %v1385_v62, %v1634_v24  ;;  %v586_v2 = vpop.f32.mrb[9].mxu0  ;;  %v650_v3 = vpop.f32.mrb[9].mxu1  ;;  %v1232_v5 = vpack.c.bf16 %v1464_v63, %v1456_v55  ;;  %1485 = vtanh.f32 %v808_v58 }
 0x10d   : > { %v1466_v4 = vpop.eup %1465  ;;  %v795_v6 = vadd.f32 %v1634_v24, %v586_v2  ;;  %v811_v7 = vadd.f32 %v1634_v24, %v650_v3  ;;  %v1370_v8 = vpop.f32.mrb[10].mxu0  ;;  %1487 = vtanh.f32 %v797_v0 }
 0x10e   : > { %v1386_v9 = vpop.f32.mrb[10].mxu1  ;;  %v1468_v10 = vpop.eup %1467  ;;  %v1272_v11 = vpack.c.bf16 %v1466_v4, %v1458_v57  ;;  %v798_v12 = vadd.f32 %v1370_v8, %v1634_v24  ;;  %1304 = vst [vmem:[%s1657_s17 + $0x8] sm:$0xff] %v1232_v5   ;;  %1489 = vtanh.f32 %v813_v1 }
 0x10f   : > { %v589_v13 = vpop.f32.mrb[11].mxu0  ;;  %v653_v14 = vpop.f32.mrb[11].mxu1  ;;  %v1227_v16 = vpack.c.bf16 %v1468_v10, %v1460_v59  ;;  %v814_v17 = vadd.f32 %v1386_v9, %v1634_v24  ;;  %1491 = vtanh.f32 %v795_v6 }
 0x110   : > { %v1470_v15 = vpop.eup %1469  ;;  %1312 = vst [vmem:[%s1657_s17 + $0x48] sm:$0xff] %v1272_v11   ;;  %v796_v20 = vadd.f32 %v1634_v24, %v589_v13  ;;  %1493 = vtanh.f32 %v811_v7  ;;  %v812_v22 = vadd.f32 %v1634_v24, %v653_v14 }
 0x111   : > { %v1472_v18 = vpop.eup %1471  ;;  %v1267_v19 = vpack.c.bf16 %v1470_v15, %v1462_v60  ;;  %1228 = vst [vmem:[%s1657_s17] sm:$0xff] %v1227_v16   ;;  %1495 = vtanh.f32 %v798_v12 }
 0x112   : > { %v1474_v21 = vpop.eup %1473  ;;  %1497 = vtanh.f32 %v814_v17  ;;  %v1373_v26 = vpop.f32.mrb[12].mxu0 }
 0x113   : > { %v1476_v23 = vpop.eup %1475  ;;  %1311 = vst [vmem:[%s1657_s17 + $0x40] sm:$0xff] %v1267_v19   ;;  %v1389_v27 = vpop.f32.mrb[12].mxu1  ;;  %1499 = vtanh.f32 %v796_v20  ;;  %v801_v29 = vadd.f32 %v1373_v26, %v1634_v24 }
 0x114   : > { %v1478_v25 = vpop.eup %1477  ;;  %v817_v30 = vadd.f32 %v1389_v27, %v1634_v24  ;;  %v602_v31 = vpop.f32.mrb[13].mxu0  ;;  %1501 = vtanh.f32 %v812_v22 }
 0x115   : > { %v1480_v28 = vpop.eup %1479  ;;  %v666_v32 = vpop.f32.mrb[13].mxu1  ;;  %v799_v35 = vadd.f32 %v1634_v24, %v602_v31  ;;  %1503 = vtanh.f32 %v801_v29 }
 0x116   : > { %v1482_v33 = vpop.eup %1481  ;;  %v1242_v34 = vpack.c.bf16 %v1480_v28, %v1472_v18  ;;  %v815_v36 = vadd.f32 %v1634_v24, %v666_v32  ;;  %v1374_v37 = vpop.f32.mrb[14].mxu0  ;;  %1505 = vtanh.f32 %v817_v30 }
 0x117   : > { %v1390_v38 = vpop.f32.mrb[14].mxu1  ;;  %v1484_v39 = vpop.eup %1483  ;;  %v1282_v40 = vpack.c.bf16 %v1482_v33, %v1474_v21  ;;  %v802_v41 = vadd.f32 %v1374_v37, %v1634_v24  ;;  %1507 = vtanh.f32 %v799_v35 }
 0x118   : > { %v605_v42 = vpop.f32.mrb[15].mxu0  ;;  %v669_v43 = vpop.f32.mrb[15].mxu1  ;;  %1306 = vst [vmem:[%s1657_s17 + $0x18] sm:$0xff] %v1242_v34   ;;  %v1237_v45 = vpack.c.bf16 %v1484_v39, %v1476_v23  ;;  %v818_v46 = vadd.f32 %v1390_v38, %v1634_v24  ;;  %1509 = vtanh.f32 %v815_v36 }
 0x119   : > { %v1486_v44 = vpop.eup %1485  ;;  %1314 = vst [vmem:[%s1657_s17 + $0x58] sm:$0xff] %v1282_v40   ;;  %v800_v49 = vadd.f32 %v1634_v24, %v605_v42  ;;  %v816_v51 = vadd.f32 %v1634_v24, %v669_v43  ;;  %1511 = vtanh.f32 %v802_v41 }
 0x11a   : > { %v1488_v47 = vpop.eup %1487  ;;  %v1277_v48 = vpack.c.bf16 %v1486_v44, %v1478_v25  ;;  %1305 = vst [vmem:[%s1657_s17 + $0x10] sm:$0xff] %v1237_v45   ;;  %1513 = vtanh.f32 %v818_v46 }
 0x11b   : > { %v1490_v50 = vpop.eup %1489  ;;  %1515 = vtanh.f32 %v800_v49 }
 0x11c   : > { %v1492_v52 = vpop.eup %1491  ;;  %1313 = vst [vmem:[%s1657_s17 + $0x50] sm:$0xff] %v1277_v48   ;;  %1517 = vtanh.f32 %v816_v51 }
 0x11d   : > { %v1494_v53 = vpop.eup %1493 }
 0x11e   : > { %v1496_v54 = vpop.eup %1495 }
 0x11f   : > { %v1498_v55 = vpop.eup %1497  ;;  %v1252_v56 = vpack.c.bf16 %v1496_v54, %v1488_v47 }
 0x120   : > { %v1500_v57 = vpop.eup %1499  ;;  %v1292_v58 = vpack.c.bf16 %v1498_v55, %v1490_v50 }
 0x121   : > { %v1502_v59 = vpop.eup %1501  ;;  %1308 = vst [vmem:[%s1657_s17 + $0x28] sm:$0xff] %v1252_v56   ;;  %v1247_v60 = vpack.c.bf16 %v1500_v57, %v1492_v52 }
 0x122   : > { %v1504_v24 = vpop.eup %1503  ;;  %1316 = vst [vmem:[%s1657_s17 + $0x68] sm:$0xff] %v1292_v58   ;;  %v1287_v61 = vpack.c.bf16 %v1502_v59, %v1494_v53 }
 0x123   : > { %v1506_v62 = vpop.eup %1505  ;;  %1307 = vst [vmem:[%s1657_s17 + $0x20] sm:$0xff] %v1247_v60  }
 0x124   : > { %v1508_v63 = vpop.eup %1507  ;;  %1315 = vst [vmem:[%s1657_s17 + $0x60] sm:$0xff] %v1287_v61  }
 0x125   : > { %v1510_v0 = vpop.eup %1509 }
 0x126   : > { %v1512_v1 = vpop.eup %1511 }
 0x127   : > { %v1514_v2 = vpop.eup %1513  ;;  %v1262_v3 = vpack.c.bf16 %v1512_v1, %v1504_v24 }
 0x128   : > { %v1516_v4 = vpop.eup %1515  ;;  %v1302_v5 = vpack.c.bf16 %v1514_v2, %v1506_v62 }
 0x129   : > { %v1518_v6 = vpop.eup %1517  ;;  %1310 = vst [vmem:[%s1657_s17 + $0x38] sm:$0xff] %v1262_v3   ;;  %v1257_v7 = vpack.c.bf16 %v1516_v4, %v1508_v63 }
 0x12a   : > { %1318 = vst [vmem:[%s1657_s17 + $0x78] sm:$0xff] %v1302_v5   ;;  %v1297_v8 = vpack.c.bf16 %v1518_v6, %v1510_v0 }
 0x12b   : > { %1309 = vst [vmem:[%s1657_s17 + $0x30] sm:$0xff] %v1257_v7  }
 0x12c   : > { %1317 = vst [vmem:[%s1657_s17 + $0x70] sm:$0xff] %v1297_v8  }
 0x12d PF: > { %s13_s14 = sadd.s32 1, %s1541_s14   ;;  %s1704_s12 = smov %s1537_s13 }
 0x12e   : > { %p10_p5 = scmp.ge.s32.totalorder %s13_s14, 4   ;;  %s1705_s13 = smov %s1707_s15 }
 0x130   :  { %12 = sbr.rel (!%p10_p5) target bundleno = 2 (0x2), region = 76 }

</bundles_post_ra>
